<compile_context>
chip_gen: v5e
topology: v5e:2x2
jax: 0.10.0
libtpu: 0.0.40
codegen_flags: <defaults>
</compile_context>

<pallas_src>
import functools
import math

import jax
import jax.numpy as jnp
import numpy as np
from jax.experimental import pallas as pl
from jax.experimental.pallas import tpu as pltpu

NEG_SLOPE = 0.01                 # nn.LeakyReLU() default negative_slope
LANE = 128                       # TPU lane width; channel padding granularity
VMEM_LIMIT = 64 * 1024 * 1024    # fits v7x's 64 MiB physical VMEM


def _round_up(x, m):
    return ((x + m - 1) // m) * m


# ---------------------------------------------------------------------------
# Kernel 1: fused Conv2d(k=3, s=2, p=1) + bias + LeakyReLU, NHWC layout.
# One grid step = (one batch element, one tile of output channels).
# ---------------------------------------------------------------------------
def _conv3x3_s2_act_kernel(x_ref, w_ref, b_ref, o_ref, xp_ref):
    h, w = x_ref.shape[1], x_ref.shape[2]          # input spatial   (static)
    hout, wout = o_ref.shape[1], o_ref.shape[2]    # output spatial  (static)
    tn = o_ref.shape[3]                            # out-channel tile (static)

    # Zero-pad the image into VMEM scratch once per batch element.
    # (channel-tile axis is "arbitrary" => sequential on a core, so the fill
    #  at ni == 0 is visible to all later channel tiles of this batch element)
    @pl.when(pl.program_id(1) == 0)
    def _():
        xp_ref[...] = jnp.zeros_like(xp_ref)
        xp_ref[1:h + 1, 1:w + 1, :] = x_ref[0]

    # 9 accumulated taps on the MXU; stride-2 loads pick the conv footprint.
    acc = jnp.zeros((hout * wout, tn), jnp.float32)
    for kh in range(3):
        for kw in range(3):
            tap = xp_ref[pl.ds(kh, hout, 2), pl.ds(kw, wout, 2), :]
            tap = tap.reshape(hout * wout, tap.shape[-1])
            acc += jnp.dot(tap, w_ref[kh, kw],
                           preferred_element_type=jnp.float32)

    acc = acc + b_ref[...]                           # (1, tn) broadcast
    acc = jnp.where(acc > 0, acc, NEG_SLOPE * acc)   # LeakyReLU(0.01)
    o_ref[0] = acc.reshape(hout, wout, tn).astype(o_ref.dtype)


def conv3x3_s2_act(x, w, b):
    """x: (B,H,W,Cin) NHWC, w: (3,3,Cin,Cout), b: (1,Cout) -> (B,H//2,W//2,Cout).

    Cin/Cout must be multiples of 128 (ensured by prepare_params).
    Whole image per batch element is VMEM-resident (fine for pSp sizes,
    spatial <= 64 @ 512 ch); larger images would need an output-row grid axis.
    """
    B, H, W, Cin = x.shape
    Cout = w.shape[3]
    Hout, Wout = H // 2, W // 2
    tn = 256 if Cout % 256 == 0 else LANE            # MXU-aligned channel tile
    return pl.pallas_call(
        _conv3x3_s2_act_kernel,
        out_shape=jax.ShapeDtypeStruct((B, Hout, Wout, Cout), x.dtype),
        grid_spec=pltpu.PrefetchScalarGridSpec(
            num_scalar_prefetch=0,
            grid=(B, Cout // tn),
            in_specs=[
                pl.BlockSpec((1, H, W, Cin), lambda bi, ni: (bi, 0, 0, 0)),
                pl.BlockSpec((3, 3, Cin, tn), lambda bi, ni: (0, 0, 0, ni)),
                pl.BlockSpec((1, tn), lambda bi, ni: (0, ni)),
            ],
            out_specs=pl.BlockSpec((1, Hout, Wout, tn),
                                   lambda bi, ni: (bi, 0, 0, ni)),
            scratch_shapes=[pltpu.VMEM((H + 2, W + 2, Cin), x.dtype)],
        ),
        compiler_params=pltpu.CompilerParams(
            dimension_semantics=("parallel", "arbitrary"),
            vmem_limit_bytes=VMEM_LIMIT,
        ),
    )(x, w, b)


# ---------------------------------------------------------------------------
# Kernel 2: fused tail = last (2x2 -> 1x1) conv + LeakyReLU + EqualLinear.
# Everything is tiny (<= a few MiB even at out_c=512), one pallas_call.
# ---------------------------------------------------------------------------
def _tail_kernel(x_ref, w1_ref, b1_ref, w2_ref, b2_ref, o_ref):
    h = jnp.dot(x_ref[...], w1_ref[...], preferred_element_type=jnp.float32)
    h = h + b1_ref[...]
    h = jnp.where(h > 0, h, NEG_SLOPE * h)
    y = jnp.dot(h.astype(w2_ref.dtype), w2_ref[...],
                preferred_element_type=jnp.float32)
    o_ref[...] = (y + b2_ref[...]).astype(o_ref.dtype)


def tail_fused(x2, w1, b1, w2, b2):
    """x2: (B, 4*Cp) -> leaky(x2 @ w1 + b1) @ w2 + b2 -> (B, Cp) float32."""
    B = x2.shape[0]
    Cp = w2.shape[1]
    vmem = pl.BlockSpec(memory_space=pltpu.MemorySpace.VMEM)
    return pl.pallas_call(
        _tail_kernel,
        out_shape=jax.ShapeDtypeStruct((B, Cp), jnp.float32),
        in_specs=[vmem] * 5,
        out_specs=vmem,
        compiler_params=pltpu.CompilerParams(vmem_limit_bytes=VMEM_LIMIT),
    )(x2, w1, b1, w2, b2)


# ---------------------------------------------------------------------------
# Parameters: init (shapes match the PyTorch module) + one-time preprocessing.
# ---------------------------------------------------------------------------
def init_params(key, in_c, out_c, spatial):
    num_pools = int(math.log2(spatial))
    params = {"convs": []}
    c_in = in_c
    for _ in range(num_pools):
        key, k1, k2 = jax.random.split(key, 3)
        w = jax.random.normal(k1, (out_c, c_in, 3, 3), jnp.float32) * 0.1
        b = jax.random.normal(k2, (out_c,), jnp.float32) * 0.1
        params["convs"].append((w, b))
        c_in = out_c
    key, k1, k2 = jax.random.split(key, 3)
    params["lin_w"] = jax.random.normal(k1, (out_c, out_c), jnp.float32)
    params["lin_b"] = jax.random.normal(k2, (out_c,), jnp.float32) * 0.1
    return params


def prepare_params(params, in_c, out_c, dtype=jnp.float32):
    """One-time weight prep (outside the hot path): NHWC layout, zero-pad all
    channel dims to multiples of 128 (lane-dense MXU/stores), fold the
    EqualLinear 1/sqrt(in) scale + transpose, and build the dense matrix of the
    final 2x2->1x1 conv (only taps (1..2,1..2) touch real pixels)."""
    cp_in = _round_up(in_c, LANE)
    cp = _round_up(out_c, LANE)
    convs = params["convs"]

    conv_layers = []
    cin, cin_p = in_c, cp_in
    for w, b in convs[:-1]:
        w_t = jnp.transpose(w, (2, 3, 1, 0))                     # (3,3,cin,cout)
        w_pad = jnp.zeros((3, 3, cin_p, cp), dtype)
        w_pad = w_pad.at[:, :, :cin, :out_c].set(w_t.astype(dtype))
        b_pad = jnp.zeros((1, cp), jnp.float32).at[0, :out_c].set(b)
        conv_layers.append((w_pad, b_pad))
        cin, cin_p = out_c, cp

    # Final conv (input spatial 2, output 1x1) as a (4*Cin_p, Cp) GEMM.
    w, b = convs[-1]
    w_t = jnp.transpose(w, (2, 3, 1, 0))[1:3, 1:3]               # (2,2,cin,cout)
    w1 = jnp.zeros((2, 2, cin_p, cp), dtype)
    w1 = w1.at[:, :, :cin, :out_c].set(w_t.astype(dtype)).reshape(4 * cin_p, cp)
    b1 = jnp.zeros((1, cp), jnp.float32).at[0, :out_c].set(b)

    # EqualLinear(out_c, out_c, lr_mul=1): y = x @ (W / sqrt(in)).T + bias
    scale = 1.0 / math.sqrt(out_c)
    w2 = jnp.zeros((cp, cp), dtype)
    w2 = w2.at[:out_c, :out_c].set((params["lin_w"] * scale).T.astype(dtype))
    b2 = jnp.zeros((1, cp), jnp.float32).at[0, :out_c].set(params["lin_b"])

    return {"conv_layers": conv_layers, "w1": w1, "b1": b1, "w2": w2, "b2": b2}


# ---------------------------------------------------------------------------
# Full forward
# ---------------------------------------------------------------------------
def gradual_deformation_block(prepped, x_nchw, *, out_c):
    """x_nchw: (B, in_c, S, S) float32 -> (B, out_c) float32."""
    conv_layers = prepped["conv_layers"]
    cin_p = (conv_layers[0][0].shape[2] if conv_layers
             else prepped["w1"].shape[0] // 4)
    dtype = prepped["w1"].dtype

    x = jnp.transpose(x_nchw, (0, 2, 3, 1)).astype(dtype)          # NCHW -> NHWC
    if x.shape[-1] != cin_p:                                       # lane-pad once
        x = jnp.pad(x, ((0, 0), (0, 0), (0, 0), (0, cin_p - x.shape[-1])))

    for w, b in conv_layers:                 # spatial S -> S/2 -> ... -> 2
        x = conv3x3_s2_act(x, w, b)

    x2 = x.reshape(x.shape[0], -1)           # (B, 2*2*Cp), (h, w, c) order
    y = tail_fused(x2, prepped["w1"], prepped["b1"],
                   prepped["w2"], prepped["b2"])
    return y[:, :out_c]                      # drop padded output channels


# Pure-JAX reference for the correctness check
def reference(params, x_nchw, out_c):
    x = x_nchw
    for w, b in params["convs"]:
        x = jax.lax.conv_general_dilated(
            x, w, window_strides=(2, 2), padding=((1, 1), (1, 1)),
            dimension_numbers=("NCHW", "OIHW", "NCHW"))
        x = x + b.reshape(1, -1, 1, 1)
        x = jnp.where(x > 0, x, NEG_SLOPE * x)
    x = x.reshape(-1, out_c)
    scale = 1.0 / math.sqrt(out_c)
    return x @ (params["lin_w"] * scale).T + params["lin_b"]


if __name__ == "__main__":
    B, in_c, out_c, spatial = 2, 4, 8, 16     # num_pools=4: 16 -> 8 -> 4 -> 2 -> 1
    key = jax.random.PRNGKey(0)
    key, kx = jax.random.split(key)
    x = jax.random.normal(kx, (B, in_c, spatial, spatial), jnp.float32)
    params = init_params(key, in_c, out_c, spatial)

    prepped = prepare_params(params, in_c, out_c)        # one-time weight prep
    fwd = jax.jit(functools.partial(gradual_deformation_block, out_c=out_c))

    y = jax.block_until_ready(fwd(prepped, x))
    assert y.shape == (B, out_c)

    y_ref = reference(params, x, out_c)
    np.testing.assert_allclose(np.asarray(y), np.asarray(y_ref),
                               rtol=1e-4, atol=1e-4)
    print("KERNEL_OK")
</pallas_src>

<mosaic_0001>
module attributes {stable_mosaic.version = 11 : i64} {
  func.func @_conv3x3_s2_act_kernel(%arg0: i32, %arg1: i32, %arg2: memref<1x8x8x128xf32, #tpu.memory_space<vmem>>, %arg3: memref<3x3x128x128xf32, #tpu.memory_space<vmem>>, %arg4: memref<1x128xf32, #tpu.memory_space<vmem>>, %arg5: memref<1x4x4x128xf32, #tpu.memory_space<vmem>>, %arg6: memref<10x10x128xf32, #tpu.memory_space<vmem>>) attributes {dimension_semantics = [#tpu.dimension_semantics<parallel>, #tpu.dimension_semantics<arbitrary>], iteration_bounds = array<i64: 2, 1>, scalar_prefetch = 0 : i64, scratch_operands = 1 : i64, tpu.core_type = #tpu.core_type<tc>, window_params = [{transform_indices = @transform_0, window_bounds = array<i64: 1, 8, 8, 128>}, {transform_indices = @transform_1, window_bounds = array<i64: 3, 3, 128, 128>}, {transform_indices = @transform_2, window_bounds = array<i64: 1, 128>}, {transform_indices = @transform_3, window_bounds = array<i64: 1, 4, 4, 128>}]} {
    %c0_i32 = arith.constant 0 : i32
    %0 = arith.cmpi eq, %arg1, %c0_i32 : i32
    %1 = arith.extui %0 : i1 to i32
    %c0_i32_0 = arith.constant 0 : i32
    %2 = arith.cmpi ne, %1, %c0_i32_0 : i32
    scf.if %2 {
      %cst_78 = arith.constant 0.000000e+00 : f32
      %70 = vector.broadcast %cst_78 : f32 to vector<10x10x128xf32>
      %c0_79 = arith.constant 0 : index
      %c0_80 = arith.constant 0 : index
      %c0_81 = arith.constant 0 : index
      %71 = vector.load %arg6[%c0_79, %c0_80, %c0_81] : memref<10x10x128xf32, #tpu.memory_space<vmem>>, vector<10x10x128xf32>
      tpu.vector_store %arg6[%c0_79, %c0_80, %c0_81], %70 {strides = array<i32>} : memref<10x10x128xf32, #tpu.memory_space<vmem>>, vector<10x10x128xf32>,
      %c0_82 = arith.constant 0 : index
      %c0_83 = arith.constant 0 : index
      %c0_84 = arith.constant 0 : index
      %c0_85 = arith.constant 0 : index
      %72 = vector.load %arg2[%c0_82, %c0_83, %c0_84, %c0_85] : memref<1x8x8x128xf32, #tpu.memory_space<vmem>>, vector<1x8x8x128xf32>
      %73 = vector.shape_cast %72 : vector<1x8x8x128xf32> to vector<8x8x128xf32>
      %c1_86 = arith.constant 1 : index
      %c1_87 = arith.constant 1 : index
      %c0_88 = arith.constant 0 : index
      %74 = vector.load %arg6[%c1_86, %c1_87, %c0_88] : memref<10x10x128xf32, #tpu.memory_space<vmem>>, vector<8x8x128xf32>
      tpu.vector_store %arg6[%c1_86, %c1_87, %c0_88], %73 {strides = array<i32>} : memref<10x10x128xf32, #tpu.memory_space<vmem>>, vector<8x8x128xf32>,
    } else {
    }
    %cst = arith.constant 0.000000e+00 : f32
    %3 = vector.broadcast %cst : f32 to vector<16x128xf32>
    %c0 = arith.constant 0 : index
    %c0_1 = arith.constant 0 : index
    %c0_2 = arith.constant 0 : index
    %4 = tpu.strided_load %arg6[%c0, %c0_1, %c0_2] {strides = array<i32: 2, 2, 1>} : memref<10x10x128xf32, #tpu.memory_space<vmem>>, vector<4x4x128xf32>
    %5 = vector.shape_cast %4 : vector<4x4x128xf32> to vector<16x128xf32>
    %c0_3 = arith.constant 0 : index
    %c0_4 = arith.constant 0 : index
    %c0_5 = arith.constant 0 : index
    %c0_6 = arith.constant 0 : index
    %6 = vector.load %arg3[%c0_3, %c0_4, %c0_5, %c0_6] : memref<3x3x128x128xf32, #tpu.memory_space<vmem>>, vector<1x1x128x128xf32>
    %7 = vector.shape_cast %6 : vector<1x1x128x128xf32> to vector<128x128xf32>
    %cst_7 = arith.constant dense<0.000000e+00> : vector<16x128xf32>
    %8 = tpu.matmul %5, %7, %cst_7 {dimension_numbers = #tpu.dot_dimension_numbers<[1], [0], [0], [1], [0, 0, 1, 1], [], []>} : vector<16x128xf32>, vector<128x128xf32>, vector<16x128xf32> -> vector<16x128xf32>
    %9 = arith.addf %3, %8 : vector<16x128xf32>
    %c0_8 = arith.constant 0 : index
    %c1 = arith.constant 1 : index
    %c0_9 = arith.constant 0 : index
    %10 = tpu.strided_load %arg6[%c0_8, %c1, %c0_9] {strides = array<i32: 2, 2, 1>} : memref<10x10x128xf32, #tpu.memory_space<vmem>>, vector<4x4x128xf32>
    %11 = vector.shape_cast %10 : vector<4x4x128xf32> to vector<16x128xf32>
    %c0_10 = arith.constant 0 : index
    %c1_11 = arith.constant 1 : index
    %c0_12 = arith.constant 0 : index
    %c0_13 = arith.constant 0 : index
    %12 = vector.load %arg3[%c0_10, %c1_11, %c0_12, %c0_13] : memref<3x3x128x128xf32, #tpu.memory_space<vmem>>, vector<1x1x128x128xf32>
    %13 = vector.shape_cast %12 : vector<1x1x128x128xf32> to vector<128x128xf32>
    %cst_14 = arith.constant dense<0.000000e+00> : vector<16x128xf32>
    %14 = tpu.matmul %11, %13, %cst_14 {dimension_numbers = #tpu.dot_dimension_numbers<[1], [0], [0], [1], [0, 0, 1, 1], [], []>} : vector<16x128xf32>, vector<128x128xf32>, vector<16x128xf32> -> vector<16x128xf32>
    %15 = arith.addf %9, %14 : vector<16x128xf32>
    %c0_15 = arith.constant 0 : index
    %c2 = arith.constant 2 : index
    %c0_16 = arith.constant 0 : index
    %16 = tpu.strided_load %arg6[%c0_15, %c2, %c0_16] {strides = array<i32: 2, 2, 1>} : memref<10x10x128xf32, #tpu.memory_space<vmem>>, vector<4x4x128xf32>
    %17 = vector.shape_cast %16 : vector<4x4x128xf32> to vector<16x128xf32>
    %c0_17 = arith.constant 0 : index
    %c2_18 = arith.constant 2 : index
    %c0_19 = arith.constant 0 : index
    %c0_20 = arith.constant 0 : index
    %18 = vector.load %arg3[%c0_17, %c2_18, %c0_19, %c0_20] : memref<3x3x128x128xf32, #tpu.memory_space<vmem>>, vector<1x1x128x128xf32>
    %19 = vector.shape_cast %18 : vector<1x1x128x128xf32> to vector<128x128xf32>
    %cst_21 = arith.constant dense<0.000000e+00> : vector<16x128xf32>
    %20 = tpu.matmul %17, %19, %cst_21 {dimension_numbers = #tpu.dot_dimension_numbers<[1], [0], [0], [1], [0, 0, 1, 1], [], []>} : vector<16x128xf32>, vector<128x128xf32>, vector<16x128xf32> -> vector<16x128xf32>
    %21 = arith.addf %15, %20 : vector<16x128xf32>
    %c1_22 = arith.constant 1 : index
    %c0_23 = arith.constant 0 : index
    %c0_24 = arith.constant 0 : index
    %22 = tpu.strided_load %arg6[%c1_22, %c0_23, %c0_24] {strides = array<i32: 2, 2, 1>} : memref<10x10x128xf32, #tpu.memory_space<vmem>>, vector<4x4x128xf32>
    %23 = vector.shape_cast %22 : vector<4x4x128xf32> to vector<16x128xf32>
    %c1_25 = arith.constant 1 : index
    %c0_26 = arith.constant 0 : index
    %c0_27 = arith.constant 0 : index
    %c0_28 = arith.constant 0 : index
    %24 = vector.load %arg3[%c1_25, %c0_26, %c0_27, %c0_28] : memref<3x3x128x128xf32, #tpu.memory_space<vmem>>, vector<1x1x128x128xf32>
    %25 = vector.shape_cast %24 : vector<1x1x128x128xf32> to vector<128x128xf32>
    %cst_29 = arith.constant dense<0.000000e+00> : vector<16x128xf32>
    %26 = tpu.matmul %23, %25, %cst_29 {dimension_numbers = #tpu.dot_dimension_numbers<[1], [0], [0], [1], [0, 0, 1, 1], [], []>} : vector<16x128xf32>, vector<128x128xf32>, vector<16x128xf32> -> vector<16x128xf32>
    %27 = arith.addf %21, %26 : vector<16x128xf32>
    %c1_30 = arith.constant 1 : index
    %c1_31 = arith.constant 1 : index
    %c0_32 = arith.constant 0 : index
    %28 = tpu.strided_load %arg6[%c1_30, %c1_31, %c0_32] {strides = array<i32: 2, 2, 1>} : memref<10x10x128xf32, #tpu.memory_space<vmem>>, vector<4x4x128xf32>
    %29 = vector.shape_cast %28 : vector<4x4x128xf32> to vector<16x128xf32>
    %c1_33 = arith.constant 1 : index
    %c1_34 = arith.constant 1 : index
    %c0_35 = arith.constant 0 : index
    %c0_36 = arith.constant 0 : index
    %30 = vector.load %arg3[%c1_33, %c1_34, %c0_35, %c0_36] : memref<3x3x128x128xf32, #tpu.memory_space<vmem>>, vector<1x1x128x128xf32>
    %31 = vector.shape_cast %30 : vector<1x1x128x128xf32> to vector<128x128xf32>
    %cst_37 = arith.constant dense<0.000000e+00> : vector<16x128xf32>
    %32 = tpu.matmul %29, %31, %cst_37 {dimension_numbers = #tpu.dot_dimension_numbers<[1], [0], [0], [1], [0, 0, 1, 1], [], []>} : vector<16x128xf32>, vector<128x128xf32>, vector<16x128xf32> -> vector<16x128xf32>
    %33 = arith.addf %27, %32 : vector<16x128xf32>
    %c1_38 = arith.constant 1 : index
    %c2_39 = arith.constant 2 : index
    %c0_40 = arith.constant 0 : index
    %34 = tpu.strided_load %arg6[%c1_38, %c2_39, %c0_40] {strides = array<i32: 2, 2, 1>} : memref<10x10x128xf32, #tpu.memory_space<vmem>>, vector<4x4x128xf32>
    %35 = vector.shape_cast %34 : vector<4x4x128xf32> to vector<16x128xf32>
    %c1_41 = arith.constant 1 : index
    %c2_42 = arith.constant 2 : index
    %c0_43 = arith.constant 0 : index
    %c0_44 = arith.constant 0 : index
    %36 = vector.load %arg3[%c1_41, %c2_42, %c0_43, %c0_44] : memref<3x3x128x128xf32, #tpu.memory_space<vmem>>, vector<1x1x128x128xf32>
    %37 = vector.shape_cast %36 : vector<1x1x128x128xf32> to vector<128x128xf32>
    %cst_45 = arith.constant dense<0.000000e+00> : vector<16x128xf32>
    %38 = tpu.matmul %35, %37, %cst_45 {dimension_numbers = #tpu.dot_dimension_numbers<[1], [0], [0], [1], [0, 0, 1, 1], [], []>} : vector<16x128xf32>, vector<128x128xf32>, vector<16x128xf32> -> vector<16x128xf32>
    %39 = arith.addf %33, %38 : vector<16x128xf32>
    %c2_46 = arith.constant 2 : index
    %c0_47 = arith.constant 0 : index
    %c0_48 = arith.constant 0 : index
    %40 = tpu.strided_load %arg6[%c2_46, %c0_47, %c0_48] {strides = array<i32: 2, 2, 1>} : memref<10x10x128xf32, #tpu.memory_space<vmem>>, vector<4x4x128xf32>
    %41 = vector.shape_cast %40 : vector<4x4x128xf32> to vector<16x128xf32>
    %c2_49 = arith.constant 2 : index
    %c0_50 = arith.constant 0 : index
    %c0_51 = arith.constant 0 : index
    %c0_52 = arith.constant 0 : index
    %42 = vector.load %arg3[%c2_49, %c0_50, %c0_51, %c0_52] : memref<3x3x128x128xf32, #tpu.memory_space<vmem>>, vector<1x1x128x128xf32>
    %43 = vector.shape_cast %42 : vector<1x1x128x128xf32> to vector<128x128xf32>
    %cst_53 = arith.constant dense<0.000000e+00> : vector<16x128xf32>
    %44 = tpu.matmul %41, %43, %cst_53 {dimension_numbers = #tpu.dot_dimension_numbers<[1], [0], [0], [1], [0, 0, 1, 1], [], []>} : vector<16x128xf32>, vector<128x128xf32>, vector<16x128xf32> -> vector<16x128xf32>
    %45 = arith.addf %39, %44 : vector<16x128xf32>
    %c2_54 = arith.constant 2 : index
    %c1_55 = arith.constant 1 : index
    %c0_56 = arith.constant 0 : index
    %46 = tpu.strided_load %arg6[%c2_54, %c1_55, %c0_56] {strides = array<i32: 2, 2, 1>} : memref<10x10x128xf32, #tpu.memory_space<vmem>>, vector<4x4x128xf32>
    %47 = vector.shape_cast %46 : vector<4x4x128xf32> to vector<16x128xf32>
    %c2_57 = arith.constant 2 : index
    %c1_58 = arith.constant 1 : index
    %c0_59 = arith.constant 0 : index
    %c0_60 = arith.constant 0 : index
    %48 = vector.load %arg3[%c2_57, %c1_58, %c0_59, %c0_60] : memref<3x3x128x128xf32, #tpu.memory_space<vmem>>, vector<1x1x128x128xf32>
    %49 = vector.shape_cast %48 : vector<1x1x128x128xf32> to vector<128x128xf32>
    %cst_61 = arith.constant dense<0.000000e+00> : vector<16x128xf32>
    %50 = tpu.matmul %47, %49, %cst_61 {dimension_numbers = #tpu.dot_dimension_numbers<[1], [0], [0], [1], [0, 0, 1, 1], [], []>} : vector<16x128xf32>, vector<128x128xf32>, vector<16x128xf32> -> vector<16x128xf32>
    %51 = arith.addf %45, %50 : vector<16x128xf32>
    %c2_62 = arith.constant 2 : index
    %c2_63 = arith.constant 2 : index
    %c0_64 = arith.constant 0 : index
    %52 = tpu.strided_load %arg6[%c2_62, %c2_63, %c0_64] {strides = array<i32: 2, 2, 1>} : memref<10x10x128xf32, #tpu.memory_space<vmem>>, vector<4x4x128xf32>
    %53 = vector.shape_cast %52 : vector<4x4x128xf32> to vector<16x128xf32>
    %c2_65 = arith.constant 2 : index
    %c2_66 = arith.constant 2 : index
    %c0_67 = arith.constant 0 : index
    %c0_68 = arith.constant 0 : index
    %54 = vector.load %arg3[%c2_65, %c2_66, %c0_67, %c0_68] : memref<3x3x128x128xf32, #tpu.memory_space<vmem>>, vector<1x1x128x128xf32>
    %55 = vector.shape_cast %54 : vector<1x1x128x128xf32> to vector<128x128xf32>
    %cst_69 = arith.constant dense<0.000000e+00> : vector<16x128xf32>
    %56 = tpu.matmul %53, %55, %cst_69 {dimension_numbers = #tpu.dot_dimension_numbers<[1], [0], [0], [1], [0, 0, 1, 1], [], []>} : vector<16x128xf32>, vector<128x128xf32>, vector<16x128xf32> -> vector<16x128xf32>
    %57 = arith.addf %51, %56 : vector<16x128xf32>
    %c0_70 = arith.constant 0 : index
    %c0_71 = arith.constant 0 : index
    %58 = vector.load %arg4[%c0_70, %c0_71] : memref<1x128xf32, #tpu.memory_space<vmem>>, vector<1x128xf32>
    %59 = vector.broadcast %58 : vector<1x128xf32> to vector<16x128xf32>
    %60 = arith.addf %57, %59 : vector<16x128xf32>
    %cst_72 = arith.constant 0.000000e+00 : f32
    %61 = vector.broadcast %cst_72 : f32 to vector<16x128xf32>
    %62 = arith.cmpf ogt, %60, %61 : vector<16x128xf32>
    %cst_73 = arith.constant 0.00999999977 : f32
    %63 = vector.broadcast %cst_73 : f32 to vector<16x128xf32>
    %64 = arith.mulf %63, %60 : vector<16x128xf32>
    %65 = arith.select %62, %60, %64 : vector<16x128xi1>, vector<16x128xf32>
    %66 = vector.shape_cast %65 : vector<16x128xf32> to vector<4x4x128xf32>
    %c0_74 = arith.constant 0 : index
    %c0_75 = arith.constant 0 : index
    %c0_76 = arith.constant 0 : index
    %c0_77 = arith.constant 0 : index
    %67 = vector.load %arg5[%c0_74, %c0_75, %c0_76, %c0_77] : memref<1x4x4x128xf32, #tpu.memory_space<vmem>>, vector<1x4x4x128xf32>
    %68 = vector.shape_cast %67 : vector<1x4x4x128xf32> to vector<4x4x128xf32>
    %69 = vector.shape_cast %66 : vector<4x4x128xf32> to vector<1x4x4x128xf32>
    tpu.vector_store %arg5[%c0_74, %c0_75, %c0_76, %c0_77], %69 {strides = array<i32>} : memref<1x4x4x128xf32, #tpu.memory_space<vmem>>, vector<1x4x4x128xf32>,
    return
  }
  func.func @transform_0(%arg0: i32, %arg1: i32) -> (i32, i32, i32, i32) {
    %c0_i32 = arith.constant 0 : i32
    %c0_i32_0 = arith.constant 0 : i32
    %c0_i32_1 = arith.constant 0 : i32
    %c0_i32_2 = arith.constant 0 : i32
    return %arg0, %c0_i32, %c0_i32_0, %c0_i32_1 : i32, i32, i32, i32
  }
  func.func @transform_1(%arg0: i32, %arg1: i32) -> (i32, i32, i32, i32) {
    %c0_i32 = arith.constant 0 : i32
    %c0_i32_0 = arith.constant 0 : i32
    %c0_i32_1 = arith.constant 0 : i32
    %c0_i32_2 = arith.constant 0 : i32
    return %c0_i32, %c0_i32_0, %c0_i32_1, %arg1 : i32, i32, i32, i32
  }
  func.func @transform_2(%arg0: i32, %arg1: i32) -> (i32, i32) {
    %c0_i32 = arith.constant 0 : i32
    %c0_i32_0 = arith.constant 0 : i32
    return %c0_i32, %arg1 : i32, i32
  }
  func.func @transform_3(%arg0: i32, %arg1: i32) -> (i32, i32, i32, i32) {
    %c0_i32 = arith.constant 0 : i32
    %c0_i32_0 = arith.constant 0 : i32
    %c0_i32_1 = arith.constant 0 : i32
    return %arg0, %c0_i32, %c0_i32_0, %arg1 : i32, i32, i32, i32
  }
}

module attributes {stable_mosaic.version = 11 : i64} {
  func.func @_conv3x3_s2_act_kernel(%arg0: i32, %arg1: i32, %arg2: memref<1x16x16x128xf32, #tpu.memory_space<vmem>>, %arg3: memref<3x3x128x128xf32, #tpu.memory_space<vmem>>, %arg4: memref<1x128xf32, #tpu.memory_space<vmem>>, %arg5: memref<1x8x8x128xf32, #tpu.memory_space<vmem>>, %arg6: memref<18x18x128xf32, #tpu.memory_space<vmem>>) attributes {dimension_semantics = [#tpu.dimension_semantics<parallel>, #tpu.dimension_semantics<arbitrary>], iteration_bounds = array<i64: 2, 1>, scalar_prefetch = 0 : i64, scratch_operands = 1 : i64, tpu.core_type = #tpu.core_type<tc>, window_params = [{transform_indices = @transform_0, window_bounds = array<i64: 1, 16, 16, 128>}, {transform_indices = @transform_1, window_bounds = array<i64: 3, 3, 128, 128>}, {transform_indices = @transform_2, window_bounds = array<i64: 1, 128>}, {transform_indices = @transform_3, window_bounds = array<i64: 1, 8, 8, 128>}]} {
    %c0_i32 = arith.constant 0 : i32
    %0 = arith.cmpi eq, %arg1, %c0_i32 : i32
    %1 = arith.extui %0 : i1 to i32
    %c0_i32_0 = arith.constant 0 : i32
    %2 = arith.cmpi ne, %1, %c0_i32_0 : i32
    scf.if %2 {
      %cst_78 = arith.constant 0.000000e+00 : f32
      %70 = vector.broadcast %cst_78 : f32 to vector<18x18x128xf32>
      %c0_79 = arith.constant 0 : index
      %c0_80 = arith.constant 0 : index
      %c0_81 = arith.constant 0 : index
      %71 = vector.load %arg6[%c0_79, %c0_80, %c0_81] : memref<18x18x128xf32, #tpu.memory_space<vmem>>, vector<18x18x128xf32>
      tpu.vector_store %arg6[%c0_79, %c0_80, %c0_81], %70 {strides = array<i32>} : memref<18x18x128xf32, #tpu.memory_space<vmem>>, vector<18x18x128xf32>,
      %c0_82 = arith.constant 0 : index
      %c0_83 = arith.constant 0 : index
      %c0_84 = arith.constant 0 : index
      %c0_85 = arith.constant 0 : index
      %72 = vector.load %arg2[%c0_82, %c0_83, %c0_84, %c0_85] : memref<1x16x16x128xf32, #tpu.memory_space<vmem>>, vector<1x16x16x128xf32>
      %73 = vector.shape_cast %72 : vector<1x16x16x128xf32> to vector<16x16x128xf32>
      %c1_86 = arith.constant 1 : index
      %c1_87 = arith.constant 1 : index
      %c0_88 = arith.constant 0 : index
      %74 = vector.load %arg6[%c1_86, %c1_87, %c0_88] : memref<18x18x128xf32, #tpu.memory_space<vmem>>, vector<16x16x128xf32>
      tpu.vector_store %arg6[%c1_86, %c1_87, %c0_88], %73 {strides = array<i32>} : memref<18x18x128xf32, #tpu.memory_space<vmem>>, vector<16x16x128xf32>,
    } else {
    }
    %cst = arith.constant 0.000000e+00 : f32
    %3 = vector.broadcast %cst : f32 to vector<64x128xf32>
    %c0 = arith.constant 0 : index
    %c0_1 = arith.constant 0 : index
    %c0_2 = arith.constant 0 : index
    %4 = tpu.strided_load %arg6[%c0, %c0_1, %c0_2] {strides = array<i32: 2, 2, 1>} : memref<18x18x128xf32, #tpu.memory_space<vmem>>, vector<8x8x128xf32>
    %5 = vector.shape_cast %4 : vector<8x8x128xf32> to vector<64x128xf32>
    %c0_3 = arith.constant 0 : index
    %c0_4 = arith.constant 0 : index
    %c0_5 = arith.constant 0 : index
    %c0_6 = arith.constant 0 : index
    %6 = vector.load %arg3[%c0_3, %c0_4, %c0_5, %c0_6] : memref<3x3x128x128xf32, #tpu.memory_space<vmem>>, vector<1x1x128x128xf32>
    %7 = vector.shape_cast %6 : vector<1x1x128x128xf32> to vector<128x128xf32>
    %cst_7 = arith.constant dense<0.000000e+00> : vector<64x128xf32>
    %8 = tpu.matmul %5, %7, %cst_7 {dimension_numbers = #tpu.dot_dimension_numbers<[1], [0], [0], [1], [0, 0, 1, 1], [], []>} : vector<64x128xf32>, vector<128x128xf32>, vector<64x128xf32> -> vector<64x128xf32>
    %9 = arith.addf %3, %8 : vector<64x128xf32>
    %c0_8 = arith.constant 0 : index
    %c1 = arith.constant 1 : index
    %c0_9 = arith.constant 0 : index
    %10 = tpu.strided_load %arg6[%c0_8, %c1, %c0_9] {strides = array<i32: 2, 2, 1>} : memref<18x18x128xf32, #tpu.memory_space<vmem>>, vector<8x8x128xf32>
    %11 = vector.shape_cast %10 : vector<8x8x128xf32> to vector<64x128xf32>
    %c0_10 = arith.constant 0 : index
    %c1_11 = arith.constant 1 : index
    %c0_12 = arith.constant 0 : index
    %c0_13 = arith.constant 0 : index
    %12 = vector.load %arg3[%c0_10, %c1_11, %c0_12, %c0_13] : memref<3x3x128x128xf32, #tpu.memory_space<vmem>>, vector<1x1x128x128xf32>
    %13 = vector.shape_cast %12 : vector<1x1x128x128xf32> to vector<128x128xf32>
    %cst_14 = arith.constant dense<0.000000e+00> : vector<64x128xf32>
    %14 = tpu.matmul %11, %13, %cst_14 {dimension_numbers = #tpu.dot_dimension_numbers<[1], [0], [0], [1], [0, 0, 1, 1], [], []>} : vector<64x128xf32>, vector<128x128xf32>, vector<64x128xf32> -> vector<64x128xf32>
    %15 = arith.addf %9, %14 : vector<64x128xf32>
    %c0_15 = arith.constant 0 : index
    %c2 = arith.constant 2 : index
    %c0_16 = arith.constant 0 : index
    %16 = tpu.strided_load %arg6[%c0_15, %c2, %c0_16] {strides = array<i32: 2, 2, 1>} : memref<18x18x128xf32, #tpu.memory_space<vmem>>, vector<8x8x128xf32>
    %17 = vector.shape_cast %16 : vector<8x8x128xf32> to vector<64x128xf32>
    %c0_17 = arith.constant 0 : index
    %c2_18 = arith.constant 2 : index
    %c0_19 = arith.constant 0 : index
    %c0_20 = arith.constant 0 : index
    %18 = vector.load %arg3[%c0_17, %c2_18, %c0_19, %c0_20] : memref<3x3x128x128xf32, #tpu.memory_space<vmem>>, vector<1x1x128x128xf32>
    %19 = vector.shape_cast %18 : vector<1x1x128x128xf32> to vector<128x128xf32>
    %cst_21 = arith.constant dense<0.000000e+00> : vector<64x128xf32>
    %20 = tpu.matmul %17, %19, %cst_21 {dimension_numbers = #tpu.dot_dimension_numbers<[1], [0], [0], [1], [0, 0, 1, 1], [], []>} : vector<64x128xf32>, vector<128x128xf32>, vector<64x128xf32> -> vector<64x128xf32>
    %21 = arith.addf %15, %20 : vector<64x128xf32>
    %c1_22 = arith.constant 1 : index
    %c0_23 = arith.constant 0 : index
    %c0_24 = arith.constant 0 : index
    %22 = tpu.strided_load %arg6[%c1_22, %c0_23, %c0_24] {strides = array<i32: 2, 2, 1>} : memref<18x18x128xf32, #tpu.memory_space<vmem>>, vector<8x8x128xf32>
    %23 = vector.shape_cast %22 : vector<8x8x128xf32> to vector<64x128xf32>
    %c1_25 = arith.constant 1 : index
    %c0_26 = arith.constant 0 : index
    %c0_27 = arith.constant 0 : index
    %c0_28 = arith.constant 0 : index
    %24 = vector.load %arg3[%c1_25, %c0_26, %c0_27, %c0_28] : memref<3x3x128x128xf32, #tpu.memory_space<vmem>>, vector<1x1x128x128xf32>
    %25 = vector.shape_cast %24 : vector<1x1x128x128xf32> to vector<128x128xf32>
    %cst_29 = arith.constant dense<0.000000e+00> : vector<64x128xf32>
    %26 = tpu.matmul %23, %25, %cst_29 {dimension_numbers = #tpu.dot_dimension_numbers<[1], [0], [0], [1], [0, 0, 1, 1], [], []>} : vector<64x128xf32>, vector<128x128xf32>, vector<64x128xf32> -> vector<64x128xf32>
    %27 = arith.addf %21, %26 : vector<64x128xf32>
    %c1_30 = arith.constant 1 : index
    %c1_31 = arith.constant 1 : index
    %c0_32 = arith.constant 0 : index
    %28 = tpu.strided_load %arg6[%c1_30, %c1_31, %c0_32] {strides = array<i32: 2, 2, 1>} : memref<18x18x128xf32, #tpu.memory_space<vmem>>, vector<8x8x128xf32>
    %29 = vector.shape_cast %28 : vector<8x8x128xf32> to vector<64x128xf32>
    %c1_33 = arith.constant 1 : index
    %c1_34 = arith.constant 1 : index
    %c0_35 = arith.constant 0 : index
    %c0_36 = arith.constant 0 : index
    %30 = vector.load %arg3[%c1_33, %c1_34, %c0_35, %c0_36] : memref<3x3x128x128xf32, #tpu.memory_space<vmem>>, vector<1x1x128x128xf32>
    %31 = vector.shape_cast %30 : vector<1x1x128x128xf32> to vector<128x128xf32>
    %cst_37 = arith.constant dense<0.000000e+00> : vector<64x128xf32>
    %32 = tpu.matmul %29, %31, %cst_37 {dimension_numbers = #tpu.dot_dimension_numbers<[1], [0], [0], [1], [0, 0, 1, 1], [], []>} : vector<64x128xf32>, vector<128x128xf32>, vector<64x128xf32> -> vector<64x128xf32>
    %33 = arith.addf %27, %32 : vector<64x128xf32>
    %c1_38 = arith.constant 1 : index
    %c2_39 = arith.constant 2 : index
    %c0_40 = arith.constant 0 : index
    %34 = tpu.strided_load %arg6[%c1_38, %c2_39, %c0_40] {strides = array<i32: 2, 2, 1>} : memref<18x18x128xf32, #tpu.memory_space<vmem>>, vector<8x8x128xf32>
    %35 = vector.shape_cast %34 : vector<8x8x128xf32> to vector<64x128xf32>
    %c1_41 = arith.constant 1 : index
    %c2_42 = arith.constant 2 : index
    %c0_43 = arith.constant 0 : index
    %c0_44 = arith.constant 0 : index
    %36 = vector.load %arg3[%c1_41, %c2_42, %c0_43, %c0_44] : memref<3x3x128x128xf32, #tpu.memory_space<vmem>>, vector<1x1x128x128xf32>
    %37 = vector.shape_cast %36 : vector<1x1x128x128xf32> to vector<128x128xf32>
    %cst_45 = arith.constant dense<0.000000e+00> : vector<64x128xf32>
    %38 = tpu.matmul %35, %37, %cst_45 {dimension_numbers = #tpu.dot_dimension_numbers<[1], [0], [0], [1], [0, 0, 1, 1], [], []>} : vector<64x128xf32>, vector<128x128xf32>, vector<64x128xf32> -> vector<64x128xf32>
    %39 = arith.addf %33, %38 : vector<64x128xf32>
    %c2_46 = arith.constant 2 : index
    %c0_47 = arith.constant 0 : index
    %c0_48 = arith.constant 0 : index
    %40 = tpu.strided_load %arg6[%c2_46, %c0_47, %c0_48] {strides = array<i32: 2, 2, 1>} : memref<18x18x128xf32, #tpu.memory_space<vmem>>, vector<8x8x128xf32>
    %41 = vector.shape_cast %40 : vector<8x8x128xf32> to vector<64x128xf32>
    %c2_49 = arith.constant 2 : index
    %c0_50 = arith.constant 0 : index
    %c0_51 = arith.constant 0 : index
    %c0_52 = arith.constant 0 : index
    %42 = vector.load %arg3[%c2_49, %c0_50, %c0_51, %c0_52] : memref<3x3x128x128xf32, #tpu.memory_space<vmem>>, vector<1x1x128x128xf32>
    %43 = vector.shape_cast %42 : vector<1x1x128x128xf32> to vector<128x128xf32>
    %cst_53 = arith.constant dense<0.000000e+00> : vector<64x128xf32>
    %44 = tpu.matmul %41, %43, %cst_53 {dimension_numbers = #tpu.dot_dimension_numbers<[1], [0], [0], [1], [0, 0, 1, 1], [], []>} : vector<64x128xf32>, vector<128x128xf32>, vector<64x128xf32> -> vector<64x128xf32>
    %45 = arith.addf %39, %44 : vector<64x128xf32>
    %c2_54 = arith.constant 2 : index
    %c1_55 = arith.constant 1 : index
    %c0_56 = arith.constant 0 : index
    %46 = tpu.strided_load %arg6[%c2_54, %c1_55, %c0_56] {strides = array<i32: 2, 2, 1>} : memref<18x18x128xf32, #tpu.memory_space<vmem>>, vector<8x8x128xf32>
    %47 = vector.shape_cast %46 : vector<8x8x128xf32> to vector<64x128xf32>
    %c2_57 = arith.constant 2 : index
    %c1_58 = arith.constant 1 : index
    %c0_59 = arith.constant 0 : index
    %c0_60 = arith.constant 0 : index
    %48 = vector.load %arg3[%c2_57, %c1_58, %c0_59, %c0_60] : memref<3x3x128x128xf32, #tpu.memory_space<vmem>>, vector<1x1x128x128xf32>
    %49 = vector.shape_cast %48 : vector<1x1x128x128xf32> to vector<128x128xf32>
    %cst_61 = arith.constant dense<0.000000e+00> : vector<64x128xf32>
    %50 = tpu.matmul %47, %49, %cst_61 {dimension_numbers = #tpu.dot_dimension_numbers<[1], [0], [0], [1], [0, 0, 1, 1], [], []>} : vector<64x128xf32>, vector<128x128xf32>, vector<64x128xf32> -> vector<64x128xf32>
    %51 = arith.addf %45, %50 : vector<64x128xf32>
    %c2_62 = arith.constant 2 : index
    %c2_63 = arith.constant 2 : index
    %c0_64 = arith.constant 0 : index
    %52 = tpu.strided_load %arg6[%c2_62, %c2_63, %c0_64] {strides = array<i32: 2, 2, 1>} : memref<18x18x128xf32, #tpu.memory_space<vmem>>, vector<8x8x128xf32>
    %53 = vector.shape_cast %52 : vector<8x8x128xf32> to vector<64x128xf32>
    %c2_65 = arith.constant 2 : index
    %c2_66 = arith.constant 2 : index
    %c0_67 = arith.constant 0 : index
    %c0_68 = arith.constant 0 : index
    %54 = vector.load %arg3[%c2_65, %c2_66, %c0_67, %c0_68] : memref<3x3x128x128xf32, #tpu.memory_space<vmem>>, vector<1x1x128x128xf32>
    %55 = vector.shape_cast %54 : vector<1x1x128x128xf32> to vector<128x128xf32>
    %cst_69 = arith.constant dense<0.000000e+00> : vector<64x128xf32>
    %56 = tpu.matmul %53, %55, %cst_69 {dimension_numbers = #tpu.dot_dimension_numbers<[1], [0], [0], [1], [0, 0, 1, 1], [], []>} : vector<64x128xf32>, vector<128x128xf32>, vector<64x128xf32> -> vector<64x128xf32>
    %57 = arith.addf %51, %56 : vector<64x128xf32>
    %c0_70 = arith.constant 0 : index
    %c0_71 = arith.constant 0 : index
    %58 = vector.load %arg4[%c0_70, %c0_71] : memref<1x128xf32, #tpu.memory_space<vmem>>, vector<1x128xf32>
    %59 = vector.broadcast %58 : vector<1x128xf32> to vector<64x128xf32>
    %60 = arith.addf %57, %59 : vector<64x128xf32>
    %cst_72 = arith.constant 0.000000e+00 : f32
    %61 = vector.broadcast %cst_72 : f32 to vector<64x128xf32>
    %62 = arith.cmpf ogt, %60, %61 : vector<64x128xf32>
    %cst_73 = arith.constant 0.00999999977 : f32
    %63 = vector.broadcast %cst_73 : f32 to vector<64x128xf32>
    %64 = arith.mulf %63, %60 : vector<64x128xf32>
    %65 = arith.select %62, %60, %64 : vector<64x128xi1>, vector<64x128xf32>
    %66 = vector.shape_cast %65 : vector<64x128xf32> to vector<8x8x128xf32>
    %c0_74 = arith.constant 0 : index
    %c0_75 = arith.constant 0 : index
    %c0_76 = arith.constant 0 : index
    %c0_77 = arith.constant 0 : index
    %67 = vector.load %arg5[%c0_74, %c0_75, %c0_76, %c0_77] : memref<1x8x8x128xf32, #tpu.memory_space<vmem>>, vector<1x8x8x128xf32>
    %68 = vector.shape_cast %67 : vector<1x8x8x128xf32> to vector<8x8x128xf32>
    %69 = vector.shape_cast %66 : vector<8x8x128xf32> to vector<1x8x8x128xf32>
    tpu.vector_store %arg5[%c0_74, %c0_75, %c0_76, %c0_77], %69 {strides = array<i32>} : memref<1x8x8x128xf32, #tpu.memory_space<vmem>>, vector<1x8x8x128xf32>,
    return
  }
  func.func @transform_0(%arg0: i32, %arg1: i32) -> (i32, i32, i32, i32) {
    %c0_i32 = arith.constant 0 : i32
    %c0_i32_0 = arith.constant 0 : i32
    %c0_i32_1 = arith.constant 0 : i32
    %c0_i32_2 = arith.constant 0 : i32
    return %arg0, %c0_i32, %c0_i32_0, %c0_i32_1 : i32, i32, i32, i32
  }
  func.func @transform_1(%arg0: i32, %arg1: i32) -> (i32, i32, i32, i32) {
    %c0_i32 = arith.constant 0 : i32
    %c0_i32_0 = arith.constant 0 : i32
    %c0_i32_1 = arith.constant 0 : i32
    %c0_i32_2 = arith.constant 0 : i32
    return %c0_i32, %c0_i32_0, %c0_i32_1, %arg1 : i32, i32, i32, i32
  }
  func.func @transform_2(%arg0: i32, %arg1: i32) -> (i32, i32) {
    %c0_i32 = arith.constant 0 : i32
    %c0_i32_0 = arith.constant 0 : i32
    return %c0_i32, %arg1 : i32, i32
  }
  func.func @transform_3(%arg0: i32, %arg1: i32) -> (i32, i32, i32, i32) {
    %c0_i32 = arith.constant 0 : i32
    %c0_i32_0 = arith.constant 0 : i32
    %c0_i32_1 = arith.constant 0 : i32
    return %arg0, %c0_i32, %c0_i32_0, %arg1 : i32, i32, i32, i32
  }
}

module attributes {stable_mosaic.version = 11 : i64} {
  func.func @_tail_kernel(%arg0: memref<2x512xf32, #tpu.memory_space<vmem>>, %arg1: memref<512x128xf32, #tpu.memory_space<vmem>>, %arg2: memref<1x128xf32, #tpu.memory_space<vmem>>, %arg3: memref<128x128xf32, #tpu.memory_space<vmem>>, %arg4: memref<1x128xf32, #tpu.memory_space<vmem>>, %arg5: memref<2x128xf32, #tpu.memory_space<vmem>>) attributes {dimension_semantics = [], scalar_prefetch = 0 : i64, scratch_operands = 0 : i64, tpu.core_type = #tpu.core_type<tc>} {
    %c0 = arith.constant 0 : index
    %c0_0 = arith.constant 0 : index
    %0 = vector.load %arg0[%c0, %c0_0] : memref<2x512xf32, #tpu.memory_space<vmem>>, vector<2x512xf32>
    %c0_1 = arith.constant 0 : index
    %c0_2 = arith.constant 0 : index
    %1 = vector.load %arg1[%c0_1, %c0_2] : memref<512x128xf32, #tpu.memory_space<vmem>>, vector<512x128xf32>
    %cst = arith.constant dense<0.000000e+00> : vector<2x128xf32>
    %2 = tpu.matmul %0, %1, %cst {dimension_numbers = #tpu.dot_dimension_numbers<[1], [0], [0], [1], [0, 0, 1, 1], [], []>} : vector<2x512xf32>, vector<512x128xf32>, vector<2x128xf32> -> vector<2x128xf32>
    %c0_3 = arith.constant 0 : index
    %c0_4 = arith.constant 0 : index
    %3 = vector.load %arg2[%c0_3, %c0_4] : memref<1x128xf32, #tpu.memory_space<vmem>>, vector<1x128xf32>
    %4 = vector.broadcast %3 : vector<1x128xf32> to vector<2x128xf32>
    %5 = arith.addf %2, %4 : vector<2x128xf32>
    %cst_5 = arith.constant 0.000000e+00 : f32
    %6 = vector.broadcast %cst_5 : f32 to vector<2x128xf32>
    %7 = arith.cmpf ogt, %5, %6 : vector<2x128xf32>
    %cst_6 = arith.constant 0.00999999977 : f32
    %8 = vector.broadcast %cst_6 : f32 to vector<2x128xf32>
    %9 = arith.mulf %8, %5 : vector<2x128xf32>
    %10 = arith.select %7, %5, %9 : vector<2x128xi1>, vector<2x128xf32>
    %c0_7 = arith.constant 0 : index
    %c0_8 = arith.constant 0 : index
    %11 = vector.load %arg3[%c0_7, %c0_8] : memref<128x128xf32, #tpu.memory_space<vmem>>, vector<128x128xf32>
    %cst_9 = arith.constant dense<0.000000e+00> : vector<2x128xf32>
    %12 = tpu.matmul %10, %11, %cst_9 {dimension_numbers = #tpu.dot_dimension_numbers<[1], [0], [0], [1], [0, 0, 1, 1], [], []>} : vector<2x128xf32>, vector<128x128xf32>, vector<2x128xf32> -> vector<2x128xf32>
    %c0_10 = arith.constant 0 : index
    %c0_11 = arith.constant 0 : index
    %13 = vector.load %arg4[%c0_10, %c0_11] : memref<1x128xf32, #tpu.memory_space<vmem>>, vector<1x128xf32>
    %14 = vector.broadcast %13 : vector<1x128xf32> to vector<2x128xf32>
    %15 = arith.addf %12, %14 : vector<2x128xf32>
    %c0_12 = arith.constant 0 : index
    %c0_13 = arith.constant 0 : index
    %16 = vector.load %arg5[%c0_12, %c0_13] : memref<2x128xf32, #tpu.memory_space<vmem>>, vector<2x128xf32>
    tpu.vector_store %arg5[%c0_12, %c0_13], %15 {strides = array<i32>} : memref<2x128xf32, #tpu.memory_space<vmem>>, vector<2x128xf32>,
    return
  }
}

module attributes {stable_mosaic.version = 11 : i64} {
  func.func @_conv3x3_s2_act_kernel(%arg0: i32, %arg1: i32, %arg2: memref<1x4x4x128xf32, #tpu.memory_space<vmem>>, %arg3: memref<3x3x128x128xf32, #tpu.memory_space<vmem>>, %arg4: memref<1x128xf32, #tpu.memory_space<vmem>>, %arg5: memref<1x2x2x128xf32, #tpu.memory_space<vmem>>, %arg6: memref<6x6x128xf32, #tpu.memory_space<vmem>>) attributes {dimension_semantics = [#tpu.dimension_semantics<parallel>, #tpu.dimension_semantics<arbitrary>], iteration_bounds = array<i64: 2, 1>, scalar_prefetch = 0 : i64, scratch_operands = 1 : i64, tpu.core_type = #tpu.core_type<tc>, window_params = [{transform_indices = @transform_0, window_bounds = array<i64: 1, 4, 4, 128>}, {transform_indices = @transform_1, window_bounds = array<i64: 3, 3, 128, 128>}, {transform_indices = @transform_2, window_bounds = array<i64: 1, 128>}, {transform_indices = @transform_3, window_bounds = array<i64: 1, 2, 2, 128>}]} {
    %c0_i32 = arith.constant 0 : i32
    %0 = arith.cmpi eq, %arg1, %c0_i32 : i32
    %1 = arith.extui %0 : i1 to i32
    %c0_i32_0 = arith.constant 0 : i32
    %2 = arith.cmpi ne, %1, %c0_i32_0 : i32
    scf.if %2 {
      %cst_78 = arith.constant 0.000000e+00 : f32
      %70 = vector.broadcast %cst_78 : f32 to vector<6x6x128xf32>
      %c0_79 = arith.constant 0 : index
      %c0_80 = arith.constant 0 : index
      %c0_81 = arith.constant 0 : index
      %71 = vector.load %arg6[%c0_79, %c0_80, %c0_81] : memref<6x6x128xf32, #tpu.memory_space<vmem>>, vector<6x6x128xf32>
      tpu.vector_store %arg6[%c0_79, %c0_80, %c0_81], %70 {strides = array<i32>} : memref<6x6x128xf32, #tpu.memory_space<vmem>>, vector<6x6x128xf32>,
      %c0_82 = arith.constant 0 : index
      %c0_83 = arith.constant 0 : index
      %c0_84 = arith.constant 0 : index
      %c0_85 = arith.constant 0 : index
      %72 = vector.load %arg2[%c0_82, %c0_83, %c0_84, %c0_85] : memref<1x4x4x128xf32, #tpu.memory_space<vmem>>, vector<1x4x4x128xf32>
      %73 = vector.shape_cast %72 : vector<1x4x4x128xf32> to vector<4x4x128xf32>
      %c1_86 = arith.constant 1 : index
      %c1_87 = arith.constant 1 : index
      %c0_88 = arith.constant 0 : index
      %74 = vector.load %arg6[%c1_86, %c1_87, %c0_88] : memref<6x6x128xf32, #tpu.memory_space<vmem>>, vector<4x4x128xf32>
      tpu.vector_store %arg6[%c1_86, %c1_87, %c0_88], %73 {strides = array<i32>} : memref<6x6x128xf32, #tpu.memory_space<vmem>>, vector<4x4x128xf32>,
    } else {
    }
    %cst = arith.constant 0.000000e+00 : f32
    %3 = vector.broadcast %cst : f32 to vector<4x128xf32>
    %c0 = arith.constant 0 : index
    %c0_1 = arith.constant 0 : index
    %c0_2 = arith.constant 0 : index
    %4 = tpu.strided_load %arg6[%c0, %c0_1, %c0_2] {strides = array<i32: 2, 2, 1>} : memref<6x6x128xf32, #tpu.memory_space<vmem>>, vector<2x2x128xf32>
    %5 = vector.shape_cast %4 : vector<2x2x128xf32> to vector<4x128xf32>
    %c0_3 = arith.constant 0 : index
    %c0_4 = arith.constant 0 : index
    %c0_5 = arith.constant 0 : index
    %c0_6 = arith.constant 0 : index
    %6 = vector.load %arg3[%c0_3, %c0_4, %c0_5, %c0_6] : memref<3x3x128x128xf32, #tpu.memory_space<vmem>>, vector<1x1x128x128xf32>
    %7 = vector.shape_cast %6 : vector<1x1x128x128xf32> to vector<128x128xf32>
    %cst_7 = arith.constant dense<0.000000e+00> : vector<4x128xf32>
    %8 = tpu.matmul %5, %7, %cst_7 {dimension_numbers = #tpu.dot_dimension_numbers<[1], [0], [0], [1], [0, 0, 1, 1], [], []>} : vector<4x128xf32>, vector<128x128xf32>, vector<4x128xf32> -> vector<4x128xf32>
    %9 = arith.addf %3, %8 : vector<4x128xf32>
    %c0_8 = arith.constant 0 : index
    %c1 = arith.constant 1 : index
    %c0_9 = arith.constant 0 : index
    %10 = tpu.strided_load %arg6[%c0_8, %c1, %c0_9] {strides = array<i32: 2, 2, 1>} : memref<6x6x128xf32, #tpu.memory_space<vmem>>, vector<2x2x128xf32>
    %11 = vector.shape_cast %10 : vector<2x2x128xf32> to vector<4x128xf32>
    %c0_10 = arith.constant 0 : index
    %c1_11 = arith.constant 1 : index
    %c0_12 = arith.constant 0 : index
    %c0_13 = arith.constant 0 : index
    %12 = vector.load %arg3[%c0_10, %c1_11, %c0_12, %c0_13] : memref<3x3x128x128xf32, #tpu.memory_space<vmem>>, vector<1x1x128x128xf32>
    %13 = vector.shape_cast %12 : vector<1x1x128x128xf32> to vector<128x128xf32>
    %cst_14 = arith.constant dense<0.000000e+00> : vector<4x128xf32>
    %14 = tpu.matmul %11, %13, %cst_14 {dimension_numbers = #tpu.dot_dimension_numbers<[1], [0], [0], [1], [0, 0, 1, 1], [], []>} : vector<4x128xf32>, vector<128x128xf32>, vector<4x128xf32> -> vector<4x128xf32>
    %15 = arith.addf %9, %14 : vector<4x128xf32>
    %c0_15 = arith.constant 0 : index
    %c2 = arith.constant 2 : index
    %c0_16 = arith.constant 0 : index
    %16 = tpu.strided_load %arg6[%c0_15, %c2, %c0_16] {strides = array<i32: 2, 2, 1>} : memref<6x6x128xf32, #tpu.memory_space<vmem>>, vector<2x2x128xf32>
    %17 = vector.shape_cast %16 : vector<2x2x128xf32> to vector<4x128xf32>
    %c0_17 = arith.constant 0 : index
    %c2_18 = arith.constant 2 : index
    %c0_19 = arith.constant 0 : index
    %c0_20 = arith.constant 0 : index
    %18 = vector.load %arg3[%c0_17, %c2_18, %c0_19, %c0_20] : memref<3x3x128x128xf32, #tpu.memory_space<vmem>>, vector<1x1x128x128xf32>
    %19 = vector.shape_cast %18 : vector<1x1x128x128xf32> to vector<128x128xf32>
    %cst_21 = arith.constant dense<0.000000e+00> : vector<4x128xf32>
    %20 = tpu.matmul %17, %19, %cst_21 {dimension_numbers = #tpu.dot_dimension_numbers<[1], [0], [0], [1], [0, 0, 1, 1], [], []>} : vector<4x128xf32>, vector<128x128xf32>, vector<4x128xf32> -> vector<4x128xf32>
    %21 = arith.addf %15, %20 : vector<4x128xf32>
    %c1_22 = arith.constant 1 : index
    %c0_23 = arith.constant 0 : index
    %c0_24 = arith.constant 0 : index
    %22 = tpu.strided_load %arg6[%c1_22, %c0_23, %c0_24] {strides = array<i32: 2, 2, 1>} : memref<6x6x128xf32, #tpu.memory_space<vmem>>, vector<2x2x128xf32>
    %23 = vector.shape_cast %22 : vector<2x2x128xf32> to vector<4x128xf32>
    %c1_25 = arith.constant 1 : index
    %c0_26 = arith.constant 0 : index
    %c0_27 = arith.constant 0 : index
    %c0_28 = arith.constant 0 : index
    %24 = vector.load %arg3[%c1_25, %c0_26, %c0_27, %c0_28] : memref<3x3x128x128xf32, #tpu.memory_space<vmem>>, vector<1x1x128x128xf32>
    %25 = vector.shape_cast %24 : vector<1x1x128x128xf32> to vector<128x128xf32>
    %cst_29 = arith.constant dense<0.000000e+00> : vector<4x128xf32>
    %26 = tpu.matmul %23, %25, %cst_29 {dimension_numbers = #tpu.dot_dimension_numbers<[1], [0], [0], [1], [0, 0, 1, 1], [], []>} : vector<4x128xf32>, vector<128x128xf32>, vector<4x128xf32> -> vector<4x128xf32>
    %27 = arith.addf %21, %26 : vector<4x128xf32>
    %c1_30 = arith.constant 1 : index
    %c1_31 = arith.constant 1 : index
    %c0_32 = arith.constant 0 : index
    %28 = tpu.strided_load %arg6[%c1_30, %c1_31, %c0_32] {strides = array<i32: 2, 2, 1>} : memref<6x6x128xf32, #tpu.memory_space<vmem>>, vector<2x2x128xf32>
    %29 = vector.shape_cast %28 : vector<2x2x128xf32> to vector<4x128xf32>
    %c1_33 = arith.constant 1 : index
    %c1_34 = arith.constant 1 : index
    %c0_35 = arith.constant 0 : index
    %c0_36 = arith.constant 0 : index
    %30 = vector.load %arg3[%c1_33, %c1_34, %c0_35, %c0_36] : memref<3x3x128x128xf32, #tpu.memory_space<vmem>>, vector<1x1x128x128xf32>
    %31 = vector.shape_cast %30 : vector<1x1x128x128xf32> to vector<128x128xf32>
    %cst_37 = arith.constant dense<0.000000e+00> : vector<4x128xf32>
    %32 = tpu.matmul %29, %31, %cst_37 {dimension_numbers = #tpu.dot_dimension_numbers<[1], [0], [0], [1], [0, 0, 1, 1], [], []>} : vector<4x128xf32>, vector<128x128xf32>, vector<4x128xf32> -> vector<4x128xf32>
    %33 = arith.addf %27, %32 : vector<4x128xf32>
    %c1_38 = arith.constant 1 : index
    %c2_39 = arith.constant 2 : index
    %c0_40 = arith.constant 0 : index
    %34 = tpu.strided_load %arg6[%c1_38, %c2_39, %c0_40] {strides = array<i32: 2, 2, 1>} : memref<6x6x128xf32, #tpu.memory_space<vmem>>, vector<2x2x128xf32>
    %35 = vector.shape_cast %34 : vector<2x2x128xf32> to vector<4x128xf32>
    %c1_41 = arith.constant 1 : index
    %c2_42 = arith.constant 2 : index
    %c0_43 = arith.constant 0 : index
    %c0_44 = arith.constant 0 : index
    %36 = vector.load %arg3[%c1_41, %c2_42, %c0_43, %c0_44] : memref<3x3x128x128xf32, #tpu.memory_space<vmem>>, vector<1x1x128x128xf32>
    %37 = vector.shape_cast %36 : vector<1x1x128x128xf32> to vector<128x128xf32>
    %cst_45 = arith.constant dense<0.000000e+00> : vector<4x128xf32>
    %38 = tpu.matmul %35, %37, %cst_45 {dimension_numbers = #tpu.dot_dimension_numbers<[1], [0], [0], [1], [0, 0, 1, 1], [], []>} : vector<4x128xf32>, vector<128x128xf32>, vector<4x128xf32> -> vector<4x128xf32>
    %39 = arith.addf %33, %38 : vector<4x128xf32>
    %c2_46 = arith.constant 2 : index
    %c0_47 = arith.constant 0 : index
    %c0_48 = arith.constant 0 : index
    %40 = tpu.strided_load %arg6[%c2_46, %c0_47, %c0_48] {strides = array<i32: 2, 2, 1>} : memref<6x6x128xf32, #tpu.memory_space<vmem>>, vector<2x2x128xf32>
    %41 = vector.shape_cast %40 : vector<2x2x128xf32> to vector<4x128xf32>
    %c2_49 = arith.constant 2 : index
    %c0_50 = arith.constant 0 : index
    %c0_51 = arith.constant 0 : index
    %c0_52 = arith.constant 0 : index
    %42 = vector.load %arg3[%c2_49, %c0_50, %c0_51, %c0_52] : memref<3x3x128x128xf32, #tpu.memory_space<vmem>>, vector<1x1x128x128xf32>
    %43 = vector.shape_cast %42 : vector<1x1x128x128xf32> to vector<128x128xf32>
    %cst_53 = arith.constant dense<0.000000e+00> : vector<4x128xf32>
    %44 = tpu.matmul %41, %43, %cst_53 {dimension_numbers = #tpu.dot_dimension_numbers<[1], [0], [0], [1], [0, 0, 1, 1], [], []>} : vector<4x128xf32>, vector<128x128xf32>, vector<4x128xf32> -> vector<4x128xf32>
    %45 = arith.addf %39, %44 : vector<4x128xf32>
    %c2_54 = arith.constant 2 : index
    %c1_55 = arith.constant 1 : index
    %c0_56 = arith.constant 0 : index
    %46 = tpu.strided_load %arg6[%c2_54, %c1_55, %c0_56] {strides = array<i32: 2, 2, 1>} : memref<6x6x128xf32, #tpu.memory_space<vmem>>, vector<2x2x128xf32>
    %47 = vector.shape_cast %46 : vector<2x2x128xf32> to vector<4x128xf32>
    %c2_57 = arith.constant 2 : index
    %c1_58 = arith.constant 1 : index
    %c0_59 = arith.constant 0 : index
    %c0_60 = arith.constant 0 : index
    %48 = vector.load %arg3[%c2_57, %c1_58, %c0_59, %c0_60] : memref<3x3x128x128xf32, #tpu.memory_space<vmem>>, vector<1x1x128x128xf32>
    %49 = vector.shape_cast %48 : vector<1x1x128x128xf32> to vector<128x128xf32>
    %cst_61 = arith.constant dense<0.000000e+00> : vector<4x128xf32>
    %50 = tpu.matmul %47, %49, %cst_61 {dimension_numbers = #tpu.dot_dimension_numbers<[1], [0], [0], [1], [0, 0, 1, 1], [], []>} : vector<4x128xf32>, vector<128x128xf32>, vector<4x128xf32> -> vector<4x128xf32>
    %51 = arith.addf %45, %50 : vector<4x128xf32>
    %c2_62 = arith.constant 2 : index
    %c2_63 = arith.constant 2 : index
    %c0_64 = arith.constant 0 : index
    %52 = tpu.strided_load %arg6[%c2_62, %c2_63, %c0_64] {strides = array<i32: 2, 2, 1>} : memref<6x6x128xf32, #tpu.memory_space<vmem>>, vector<2x2x128xf32>
    %53 = vector.shape_cast %52 : vector<2x2x128xf32> to vector<4x128xf32>
    %c2_65 = arith.constant 2 : index
    %c2_66 = arith.constant 2 : index
    %c0_67 = arith.constant 0 : index
    %c0_68 = arith.constant 0 : index
    %54 = vector.load %arg3[%c2_65, %c2_66, %c0_67, %c0_68] : memref<3x3x128x128xf32, #tpu.memory_space<vmem>>, vector<1x1x128x128xf32>
    %55 = vector.shape_cast %54 : vector<1x1x128x128xf32> to vector<128x128xf32>
    %cst_69 = arith.constant dense<0.000000e+00> : vector<4x128xf32>
    %56 = tpu.matmul %53, %55, %cst_69 {dimension_numbers = #tpu.dot_dimension_numbers<[1], [0], [0], [1], [0, 0, 1, 1], [], []>} : vector<4x128xf32>, vector<128x128xf32>, vector<4x128xf32> -> vector<4x128xf32>
    %57 = arith.addf %51, %56 : vector<4x128xf32>
    %c0_70 = arith.constant 0 : index
    %c0_71 = arith.constant 0 : index
    %58 = vector.load %arg4[%c0_70, %c0_71] : memref<1x128xf32, #tpu.memory_space<vmem>>, vector<1x128xf32>
    %59 = vector.broadcast %58 : vector<1x128xf32> to vector<4x128xf32>
    %60 = arith.addf %57, %59 : vector<4x128xf32>
    %cst_72 = arith.constant 0.000000e+00 : f32
    %61 = vector.broadcast %cst_72 : f32 to vector<4x128xf32>
    %62 = arith.cmpf ogt, %60, %61 : vector<4x128xf32>
    %cst_73 = arith.constant 0.00999999977 : f32
    %63 = vector.broadcast %cst_73 : f32 to vector<4x128xf32>
    %64 = arith.mulf %63, %60 : vector<4x128xf32>
    %65 = arith.select %62, %60, %64 : vector<4x128xi1>, vector<4x128xf32>
    %66 = vector.shape_cast %65 : vector<4x128xf32> to vector<2x2x128xf32>
    %c0_74 = arith.constant 0 : index
    %c0_75 = arith.constant 0 : index
    %c0_76 = arith.constant 0 : index
    %c0_77 = arith.constant 0 : index
    %67 = vector.load %arg5[%c0_74, %c0_75, %c0_76, %c0_77] : memref<1x2x2x128xf32, #tpu.memory_space<vmem>>, vector<1x2x2x128xf32>
    %68 = vector.shape_cast %67 : vector<1x2x2x128xf32> to vector<2x2x128xf32>
    %69 = vector.shape_cast %66 : vector<2x2x128xf32> to vector<1x2x2x128xf32>
    tpu.vector_store %arg5[%c0_74, %c0_75, %c0_76, %c0_77], %69 {strides = array<i32>} : memref<1x2x2x128xf32, #tpu.memory_space<vmem>>, vector<1x2x2x128xf32>,
    return
  }
  func.func @transform_0(%arg0: i32, %arg1: i32) -> (i32, i32, i32, i32) {
    %c0_i32 = arith.constant 0 : i32
    %c0_i32_0 = arith.constant 0 : i32
    %c0_i32_1 = arith.constant 0 : i32
    %c0_i32_2 = arith.constant 0 : i32
    return %arg0, %c0_i32, %c0_i32_0, %c0_i32_1 : i32, i32, i32, i32
  }
  func.func @transform_1(%arg0: i32, %arg1: i32) -> (i32, i32, i32, i32) {
    %c0_i32 = arith.constant 0 : i32
    %c0_i32_0 = arith.constant 0 : i32
    %c0_i32_1 = arith.constant 0 : i32
    %c0_i32_2 = arith.constant 0 : i32
    return %c0_i32, %c0_i32_0, %c0_i32_1, %arg1 : i32, i32, i32, i32
  }
  func.func @transform_2(%arg0: i32, %arg1: i32) -> (i32, i32) {
    %c0_i32 = arith.constant 0 : i32
    %c0_i32_0 = arith.constant 0 : i32
    return %c0_i32, %arg1 : i32, i32
  }
  func.func @transform_3(%arg0: i32, %arg1: i32) -> (i32, i32, i32, i32) {
    %c0_i32 = arith.constant 0 : i32
    %c0_i32_0 = arith.constant 0 : i32
    %c0_i32_1 = arith.constant 0 : i32
    return %arg0, %c0_i32, %c0_i32_0, %arg1 : i32, i32, i32, i32
  }
}

</mosaic_0001>

<bundles_post_ra>
// kernel: gradual_deformation_block.7
= control target key start
LH: loop header
LB: loop body
LE: loop exit
PB: predicated region body
PF: predicated region fallthrough
CT: control target
= control target key end

     0   :  { %10 = vsyncpa [#allocation3], 0  ;;  %s556_s0 = inlined_call_operand.vmem [shape: f32[2,512], index: 0, kind: input, shape index: {}]   ;;  %s557_s1 = inlined_call_operand.vmem [shape: f32[512,128], index: 1, kind: input, shape index: {}]   ;;  %s558_s2 = inlined_call_operand.vmem [shape: f32[1,128], index: 2, kind: input, shape index: {}]   ;;  %s559_s3 = inlined_call_operand.hbm [shape: f32[128,128], index: 3, kind: input, shape index: {}]   ;;  %s560_s4 = inlined_call_operand.vmem [shape: f32[1,128], index: 4, kind: input, shape index: {}]   ;;  %s561_s5 = inlined_call_operand.hbm [shape: f32[2,128], index: 5, kind: output, shape index: {}]  }
   0x1   :  { %11 = vsyncpa [#allocation4], 0  ;;  %s22_s20 = sshll.u32 %s559_s3, 4  ;;  %s315_s21 = smov [#allocation2]   ;;  %s23_s20 = int_to_ptr.hbm [resolvable:$true] %s22_s20 }
   0x2   :  { %s24_s22 = sshll.u32 %s315_s21, 4  ;;  %s316_s23 = smov 128   ;;  %s25_s22 = int_to_ptr.vmem [resolvable:$true] %s24_s22 }
   0x3   :  { %s317_s24 = smov 8  }
   0x4   :  { %30 = dma.hbm_to_vmem [thread:$0]  %s23_s20, 2048, %s25_s22, [#allocation3], %s316_s23, %s316_s23, %s317_s24  }
   0x5   :  { %311 = dma.done.wait [#allocation3], 2048  }
   0x6   :  { %312 = vsyncadd [#allocation3], 4294965248  ;;  %v85_v0 = vld [vmem:[%s557_s1 + $0x178] sm:$0xff]  ;;  %v84_v2 = vld [vmem:[%s557_s1 + $0x170] sm:$0xff]  ;;  %s318_s26 = smov [#allocation5]   ;;  %s247_s29 = sshll.u32 %s561_s5, 4  ;;  %s248_s29 = int_to_ptr.hbm [resolvable:$true] %s247_s29 }
   0x7   :  { %v53_v1 = vld [vmem:[%s557_s1 + $0x78] sm:$0xff]  ;;  %156 = vmatpush.msra.mxu2 %v85_v0  ;;  %v52_v4 = vld [vmem:[%s557_s1 + $0x70] sm:$0xff]  ;;  %v83_v6 = vld [vmem:[%s557_s1 + $0x168] sm:$0xff]  ;;  %s245_s27 = sshll.u32 %s318_s26, 4  ;;  %s246_s27 = int_to_ptr.vmem [resolvable:$true] %s245_s27 }
   0x8   :  { %116 = vmatpush.msra.mxu0 %v53_v1  ;;  %v101_v3 = vld [vmem:[%s557_s1 + $0x1f8] sm:$0xff]  ;;  %v100_v7 = vld [vmem:[%s557_s1 + $0x1f0] sm:$0xff]  ;;  %v51_v8 = vld [vmem:[%s557_s1 + $0x68] sm:$0xff] }
   0x9   :  { %v69_v5 = vld [vmem:[%s557_s1 + $0xf8] sm:$0xff]  ;;  %176 = vmatpush.msra.mxu3 %v101_v3  ;;  %157 = vmatpush.msra.mxu2 %v84_v2  ;;  %v68_v9 = vld [vmem:[%s557_s1 + $0xf0] sm:$0xff]  ;;  %v99_v10 = vld [vmem:[%s557_s1 + $0x1e8] sm:$0xff] }
   0xa   :  { %136 = vmatpush.msra.mxu1 %v69_v5  ;;  %117 = vmatpush.msra.mxu0 %v52_v4  ;;  %v82_v11 = vld [vmem:[%s557_s1 + $0x160] sm:$0xff]  ;;  %v67_v13 = vld [vmem:[%s557_s1 + $0xe8] sm:$0xff]  ;;  %v81_v16 = vld [vmem:[%s557_s1 + $0x158] sm:$0xff] }
   0xb   :  { %177 = vmatpush.msra.mxu3 %v100_v7  ;;  %v50_v12 = vld [vmem:[%s557_s1 + $0x60] sm:$0xff]  ;;  %158 = vmatpush.msra.mxu2 %v83_v6  ;;  %v49_v17 = vld [vmem:[%s557_s1 + $0x58] sm:$0xff]  ;;  %v80_v20 = vld [vmem:[%s557_s1 + $0x150] sm:$0xff] }
   0xc   :  { %137 = vmatpush.msra.mxu1 %v68_v9  ;;  %118 = vmatpush.msra.mxu0 %v51_v8  ;;  %v98_v14 = vld [vmem:[%s557_s1 + $0x1e0] sm:$0xff]  ;;  %v97_v18 = vld [vmem:[%s557_s1 + $0x1d8] sm:$0xff]  ;;  %v48_v21 = vld [vmem:[%s557_s1 + $0x50] sm:$0xff] }
   0xd   :  { %v66_v15 = vld [vmem:[%s557_s1 + $0xe0] sm:$0xff]  ;;  %178 = vmatpush.msra.mxu3 %v99_v10  ;;  %159 = vmatpush.msra.mxu2 %v82_v11  ;;  %v65_v19 = vld [vmem:[%s557_s1 + $0xd8] sm:$0xff]  ;;  %v96_v22 = vld [vmem:[%s557_s1 + $0x1d0] sm:$0xff] }
   0xe   :  { %138 = vmatpush.msra.mxu1 %v67_v13  ;;  %119 = vmatpush.msra.mxu0 %v50_v12  ;;  %v64_v23 = vld [vmem:[%s557_s1 + $0xd0] sm:$0xff]  ;;  %v79_v24 = vld [vmem:[%s557_s1 + $0x148] sm:$0xff]  ;;  %v78_v28 = vld [vmem:[%s557_s1 + $0x140] sm:$0xff] }
   0xf   :  { %179 = vmatpush.msra.mxu3 %v98_v14  ;;  %160 = vmatpush.msra.mxu2 %v81_v16  ;;  %v47_v25 = vld [vmem:[%s557_s1 + $0x48] sm:$0xff]  ;;  %v46_v29 = vld [vmem:[%s557_s1 + $0x40] sm:$0xff]  ;;  %v77_v32 = vld [vmem:[%s557_s1 + $0x138] sm:$0xff] }
  0x10   :  { %139 = vmatpush.msra.mxu1 %v66_v15  ;;  %120 = vmatpush.msra.mxu0 %v49_v17  ;;  %v95_v26 = vld [vmem:[%s557_s1 + $0x1c8] sm:$0xff]  ;;  %v94_v30 = vld [vmem:[%s557_s1 + $0x1c0] sm:$0xff]  ;;  %v45_v33 = vld [vmem:[%s557_s1 + $0x38] sm:$0xff] }
  0x11   :  { %180 = vmatpush.msra.mxu3 %v97_v18  ;;  %161 = vmatpush.msra.mxu2 %v80_v20  ;;  %v63_v27 = vld [vmem:[%s557_s1 + $0xc8] sm:$0xff]  ;;  %v62_v31 = vld [vmem:[%s557_s1 + $0xc0] sm:$0xff]  ;;  %v93_v34 = vld [vmem:[%s557_s1 + $0x1b8] sm:$0xff] }
  0x12   :  { %140 = vmatpush.msra.mxu1 %v65_v19  ;;  %121 = vmatpush.msra.mxu0 %v48_v21  ;;  %v61_v35 = vld [vmem:[%s557_s1 + $0xb8] sm:$0xff]  ;;  %v76_v36 = vld [vmem:[%s557_s1 + $0x130] sm:$0xff]  ;;  %v75_v40 = vld [vmem:[%s557_s1 + $0x128] sm:$0xff] }
  0x13   :  { %181 = vmatpush.msra.mxu3 %v96_v22  ;;  %162 = vmatpush.msra.mxu2 %v79_v24  ;;  %v44_v37 = vld [vmem:[%s557_s1 + $0x30] sm:$0xff]  ;;  %v43_v41 = vld [vmem:[%s557_s1 + $0x28] sm:$0xff]  ;;  %v74_v44 = vld [vmem:[%s557_s1 + $0x120] sm:$0xff] }
  0x14   :  { %141 = vmatpush.msra.mxu1 %v64_v23  ;;  %122 = vmatpush.msra.mxu0 %v47_v25  ;;  %v92_v38 = vld [vmem:[%s557_s1 + $0x1b0] sm:$0xff]  ;;  %v91_v42 = vld [vmem:[%s557_s1 + $0x1a8] sm:$0xff]  ;;  %v42_v45 = vld [vmem:[%s557_s1 + $0x20] sm:$0xff] }
  0x15   :  { %182 = vmatpush.msra.mxu3 %v95_v26  ;;  %163 = vmatpush.msra.mxu2 %v78_v28  ;;  %v60_v39 = vld [vmem:[%s557_s1 + $0xb0] sm:$0xff]  ;;  %v59_v43 = vld [vmem:[%s557_s1 + $0xa8] sm:$0xff]  ;;  %v37_v46 = vld [vmem:[%s556_s0] sm:$0xff] }
  0x16   :  { %142 = vmatpush.msra.mxu1 %v63_v27  ;;  %123 = vmatpush.msra.mxu0 %v46_v29  ;;  %v90_v47 = vld [vmem:[%s557_s1 + $0x1a0] sm:$0xff]  ;;  %107 = vst [vmem:[#allocation1] ss:$4 sm:$0xff] %v37_v46  ;;  %v73_v49 = vld [vmem:[%s557_s1 + $0x118] sm:$0xff]  ;;  %v72_v53 = vld [vmem:[%s557_s1 + $0x110] sm:$0xff] }
  0x17   :  { %183 = vmatpush.msra.mxu3 %v94_v30  ;;  %164 = vmatpush.msra.mxu2 %v77_v32  ;;  %v58_v48 = vld [vmem:[%s557_s1 + $0xa0] sm:$0xff]  ;;  %v41_v50 = vld [vmem:[%s557_s1 + $0x18] sm:$0xff]  ;;  %v40_v54 = vld [vmem:[%s557_s1 + $0x10] sm:$0xff] }
  0x18   :  { %143 = vmatpush.msra.mxu1 %v62_v31  ;;  %124 = vmatpush.msra.mxu0 %v45_v33  ;;  %v89_v51 = vld [vmem:[%s557_s1 + $0x198] sm:$0xff]  ;;  %v88_v55 = vld [vmem:[%s557_s1 + $0x190] sm:$0xff]  ;;  %v71_v57 = vld [vmem:[%s557_s1 + $0x108] sm:$0xff] }
  0x19   :  { %184 = vmatpush.msra.mxu3 %v93_v34  ;;  %165 = vmatpush.msra.mxu2 %v76_v36  ;;  %v57_v52 = vld [vmem:[%s557_s1 + $0x98] sm:$0xff]  ;;  %v56_v56 = vld [vmem:[%s557_s1 + $0x90] sm:$0xff]  ;;  %v39_v58 = vld [vmem:[%s557_s1 + $0x8] sm:$0xff] }
  0x1a   :  { %144 = vmatpush.msra.mxu1 %v61_v35  ;;  %125 = vmatpush.msra.mxu0 %v44_v37  ;;  %v87_v59 = vld [vmem:[%s557_s1 + $0x188] sm:$0xff]  ;;  %v70_v61 = vld [vmem:[%s557_s1 + $0x100] sm:$0xff]  ;;  %v213_v6 = vld [vmem:[#allocation2 + $0x70] sm:$0xff] }
  0x1b   :  { %185 = vmatpush.msra.mxu3 %v92_v38  ;;  %166 = vmatpush.msra.mxu2 %v75_v40  ;;  %v55_v60 = vld [vmem:[%s557_s1 + $0x88] sm:$0xff]  ;;  %v38_v62 = vld [vmem:[%s557_s1] sm:$0xff]  ;;  %v212_v7 = vld [vmem:[#allocation2 + $0x68] sm:$0xff] }
  0x1c   :  { %145 = vmatpush.msra.mxu1 %v60_v39  ;;  %126 = vmatpush.msra.mxu0 %v43_v41  ;;  %v86_v0 = vld [vmem:[%s557_s1 + $0x180] sm:$0xff]  ;;  %v211_v8 = vld [vmem:[#allocation2 + $0x60] sm:$0xff]  ;;  %v209_v10 = vld [vmem:[#allocation2 + $0x50] sm:$0xff] }
  0x1d   :  { %186 = vmatpush.msra.mxu3 %v91_v42  ;;  %167 = vmatpush.msra.mxu2 %v74_v44  ;;  %v110_v63 = vld.sshfl [vmem:[#allocation1 + $0x10] sm:$0xff pattern:$0x73625140]  ;;  %v108_v1 = vld.sshfl [vmem:[#allocation1] sm:$0xff pattern:$0x73625140] }
  0x1e   :  { %146 = vmatpush.msra.mxu1 %v59_v43  ;;  %127 = vmatpush.msra.mxu0 %v42_v45  ;;  %v111_v2 = vld.sshfl [vmem:[#allocation1 + $0x18] sm:$0xff pattern:$0x73625140]  ;;  %v54_v3 = vld [vmem:[%s557_s1 + $0x80] sm:$0xff]  ;;  %v208_v11 = vld [vmem:[#allocation2 + $0x48] sm:$0xff] }
  0x1f   :  { %187 = vmatpush.msra.mxu3 %v90_v47  ;;  %168 = vmatpush.msra.mxu2 %v73_v49  ;;  %v214_v4 = vld [vmem:[#allocation2 + $0x78] sm:$0xff]  ;;  %v109_v5 = vld.sshfl [vmem:[#allocation1 + $0x8] sm:$0xff pattern:$0x73625140]  ;;  %v205_v14 = vld [vmem:[#allocation2 + $0x30] sm:$0xff] }
  0x20   :  { %147 = vmatpush.msra.mxu1 %v58_v48  ;;  %128 = vmatpush.msra.mxu0 %v41_v50  ;;  %v210_v9 = vld [vmem:[#allocation2 + $0x58] sm:$0xff]  ;;  %v207_v12 = vld [vmem:[#allocation2 + $0x40] sm:$0xff]  ;;  %v204_v15 = vld [vmem:[#allocation2 + $0x28] sm:$0xff] }
  0x21   :  { %188 = vmatpush.msra.mxu3 %v89_v51  ;;  %169 = vmatpush.msra.mxu2 %v72_v53  ;;  %v206_v13 = vld [vmem:[#allocation2 + $0x38] sm:$0xff]  ;;  %v203_v16 = vld [vmem:[#allocation2 + $0x20] sm:$0xff]  ;;  %v201_v18 = vld [vmem:[#allocation2 + $0x10] sm:$0xff] }
  0x22   :  { %148 = vmatpush.msra.mxu1 %v57_v52  ;;  %129 = vmatpush.msra.mxu0 %v40_v54  ;;  %v202_v17 = vld [vmem:[#allocation2 + $0x18] sm:$0xff]  ;;  %v200_v19 = vld [vmem:[#allocation2 + $0x8] sm:$0xff]  ;;  %v199_v20 = vld [vmem:[#allocation2] sm:$0xff] }
  0x23   :  { %189 = vmatpush.msra.mxu3 %v88_v55  ;;  %170 = vmatpush.msra.mxu2 %v71_v57  ;;  %v261_v21 = vld [vmem:[%s558_s2] ss:$0 sm:$0xff] }
  0x24   :  { %149 = vmatpush.msra.mxu1 %v56_v56  ;;  %130 = vmatpush.msra.mxu0 %v39_v58  ;;  %v262_v32 = vld [vmem:[%s560_s4] ss:$0 sm:$0xff] }
  0x25   :  { %190 = vmatpush.msra.mxu3 %v87_v59  ;;  %171 = vmatpush.msra.mxu2 %v70_v61 }
  0x26   :  { %150 = vmatpush.msra.mxu1 %v55_v60  ;;  %131 = vmatpush.msra.mxu0 %v38_v62 }
  0x27   :  { %172 = vmatmul.f32.vlgmr.msra.gmra.mxu2 %v110_v63  ;;  %191 = vmatpush.msra.mxu3 %v86_v0 }
  0x28   :  { %132 = vmatmul.f32.vlgmr.msra.gmra.mxu0 %v108_v1  ;;  %192 = vmatmul.f32.vlgmr.msra.gmra.mxu3 %v111_v2 }
  0x29   :  { %151 = vmatpush.msra.mxu1 %v54_v3  ;;  %219 = vmatpush.msrb.mxu0 %v214_v4 }
  0x2a   :  { %152 = vmatmul.f32.vlgmr.msra.gmra.mxu1 %v109_v5 }
  0x2b   :  { %220 = vmatpush.msrb.mxu0 %v213_v6 }
  0x2d   :  { %221 = vmatpush.msrb.mxu0 %v212_v7 }
  0x2f   :  { %222 = vmatpush.msrb.mxu0 %v211_v8 }
  0x31   :  { %223 = vmatpush.msrb.mxu0 %v210_v9 }
  0x33   :  { %224 = vmatpush.msrb.mxu0 %v209_v10 }
  0x35   :  { %225 = vmatpush.msrb.mxu0 %v208_v11 }
  0x37   :  { %226 = vmatpush.msrb.mxu0 %v207_v12 }
  0x39   :  { %227 = vmatpush.msrb.mxu0 %v206_v13 }
  0x3b   :  { %228 = vmatpush.msrb.mxu0 %v205_v14 }
  0x3d   :  { %229 = vmatpush.msrb.mxu0 %v204_v15 }
  0x3f   :  { %230 = vmatpush.msrb.mxu0 %v203_v16 }
  0x41   :  { %231 = vmatpush.msrb.mxu0 %v202_v17 }
  0x43   :  { %232 = vmatpush.msrb.mxu0 %v201_v18 }
  0x45   :  { %233 = vmatpush.msrb.mxu0 %v200_v19 }
  0x47   :  { %234 = vmatpush.msrb.mxu0 %v199_v20 }
  0xa5   :  { %v133_v22 = vpop.f32.mrf.mxu0 }
  0xa6   :  { %v134_v23 = vadd.f32 %v261_v21, %v133_v22 }
  0xa7   :  { %v153_v24 = vpop.f32.mrf.mxu1 }
  0xa8   :  { %v154_v25 = vadd.f32 %v153_v24, %v134_v23 }
  0xaa   :  { %v173_v26 = vpop.f32.mrf.mxu2 }
  0xab   :  { %v174_v27 = vadd.f32 %v173_v26, %v154_v25  ;;  %v193_v28 = vpop.f32.mrf.mxu3 }
  0xad   :  { %v194_v29 = vadd.f32 %v193_v28, %v174_v27 }
  0xaf   :  { %v197_v30 = vmul.f32 0.01, %v194_v29  ;;  %vm196_vm0 = vcmp.gt.f32.partialorder %v194_v29, 0.0 }
  0xb1   :  { %v198_v31 = vsel %vm196_vm0, %v194_v29, %v197_v30 }
  0xb2   :  { %235 = vmatmul.f32.vlgmr.msrb.gmra.mxu0 %v198_v31 }
 0x12f   :  { %v236_v33 = vpop.f32.mrf.mxu0 }
 0x130   :  { %v237_v34 = vadd.f32 %v262_v32, %v236_v33 }
 0x132   :  { %239 = vst [vmem:[#allocation5] sm:$0x3] %v237_v34 }
 0x133   :  { %250 = dma.vmem_to_hbm [thread:$0]  %s246_s27, 32, %s248_s29, [#allocation4]  }
 0x134   :  { %313 = dma.done.wait [#allocation4], 32  }
 0x135   :  { %314 = vsyncadd [#allocation4], 4294967264 }
 0x136   :  { %255 = vsyncpa [#allocation3], 1 }
 0x137   :  { %256 = vsyncpa [#allocation4], 1 }

// kernel: gradual_deformation_block.5
= control target key start
LH: loop header
LB: loop body
LE: loop exit
PB: predicated region body
PF: predicated region fallthrough
CT: control target
= control target key end

     0   :  { %8 = vsyncpa [#allocation4], 0  ;;  %s1150_s12 = smov 0   ;;  %s1152_s13 = smov 0   ;;  %s1228_s0 = inlined_call_operand.vmem [shape: f32[2,8,8,128], index: 0, kind: input, shape index: {}]   ;;  %s1229_s1 = inlined_call_operand.hbm [shape: f32[3,3,128,128], index: 1, kind: input, shape index: {}]   ;;  %s1230_s2 = inlined_call_operand.vmem [shape: f32[1,128], index: 2, kind: input, shape index: {}]   ;;  %s1231_s3 = inlined_call_operand.vmem [shape: f32[2,4,4,128], index: 3, kind: output, shape index: {}]  }
   0x1   :  { %s1154_s14 = smov 0  }
   0x2 LB: > { %s997_s15 = sadd.s32 4294967295, %s1124_s14   ;;  %s26_s16 = sadd.s32 1, %s1120_s13  ;;  %s1124_s14 = sphi %s1154_s14, %s14_s14   ;;  %s1120_s13 = sphi %s1152_s13, %s1233_s13   ;;  %s1116_s12 = sphi %s1150_s12, %s1232_s12  }
   0x3   : > { %p28_p0 = scmp.ge.s32.totalorder %s26_s16, 2  ;;  %p999_p1 = scmp.ge.s32.totalorder %s1124_s14, 1 }
   0x4   : > { %p137_p2 = scmp.lt.s32.totalorder %s1124_s14, 3  ;;  %p1037_p4 = scmp.eq.s32.totalorder %s997_s15, 0 }
   0x5   : > { %s1235_s16 = smov (%p28_p0, %s26_s16), 0  ;;  %s150_s19 = sshll.u32 %s1229_s1, 4  ;;  %s151_s19 = int_to_ptr.hbm [resolvable:$true] %s150_s19 }
   0x6   : > { %p138_p3 = pnand %p999_p1, %p137_p2  ;;  %s1126_s20 = smov [#allocation3]  }
   0x7   : > { %s152_s21 = sshll.u32 %s1126_s20, 4  ;;  %s1127_s22 = smov 128   ;;  %s153_s21 = int_to_ptr.vmem [resolvable:$true] %s152_s21 }
   0x8   : > { %p1033_p5 = pneg %p138_p3  ;;  %s1128_s23 = smov 8  }
   0x9   : > { %182 = sbr.rel (%p138_p3) target bundleno = 273 (0x111), region = 32 }
   0xa   : > { %p1034_p6 = pnand %p1037_p4, %p1033_p5 }
   0xc   : > { %1036 = dma.hbm_to_vmem [thread:$0]  (!%p1034_p6), %s151_s19, 18432, %s153_s21, [#allocation4], %s1127_s22, %s1127_s22, %s1128_s23  }
   0xe   : > { %1111 = dma.done.wait (%p1037_p4), [#allocation4], 18432  }
   0xf   : > { %1113 = vsyncadd (%p1037_p4), [#allocation4], 4294948864  ;;  %v1129_v0 = vmov 0.0   ;;  %v317_v1 = vld [vmem:[#allocation3 + $0xf8] sm:$0xff]  ;;  %v316_v3 = vld [vmem:[#allocation3 + $0xf0] sm:$0xff]  ;;  %p213_p7 = scmp.lt.s32.totalorder %s1116_s12, 1 }
  0x10   : > { %233 = vst [vmem:[#allocation2] sm:$0xff] %v1129_v0  ;;  %v292_v2 = vld [vmem:[#allocation3 + $0x78] sm:$0xff]  ;;  %333 = vmatpush.msra.mxu0 %v317_v1  ;;  %v291_v4 = vld [vmem:[#allocation3 + $0x70] sm:$0xff]  ;;  %v315_v6 = vld [vmem:[#allocation3 + $0xe8] sm:$0xff] }
  0x11   : > { %234 = vst [vmem:[#allocation2 + $0x8] sm:$0x3] %v1129_v0  ;;  %371 = vmatpush.msra.mxu1 %v292_v2  ;;  %v418_v5 = vld [vmem:[#allocation3 + $0x178] sm:$0xff]  ;;  %v290_v7 = vld [vmem:[#allocation3 + $0x68] sm:$0xff]  ;;  %v417_v8 = vld [vmem:[#allocation3 + $0x170] sm:$0xff]  ;;  %s1237_s12 = smov (!%p213_p7, %s1116_s12), 1 }
  0x12   : > { %237 = vst [vmem:[#allocation2 + $0x20] sm:$0xff] %v1129_v0  ;;  %434 = vmatpush.msra.mxu2 %v418_v5  ;;  %334 = vmatpush.msra.mxu0 %v316_v3  ;;  %v416_v9 = vld [vmem:[#allocation3 + $0x168] sm:$0xff]  ;;  %v314_v10 = vld [vmem:[#allocation3 + $0xe0] sm:$0xff]  ;;  %v483_v13 = vld [vmem:[#allocation3 + $0x1f8] sm:$0xff]  ;;  %s1011_s24 = sshll.u32 %s1237_s12, 6  ;;  %s1012_s30 = sshll.u32 %s1237_s12, 4 }
  0x13   : > { %238 = vst [vmem:[#allocation2 + $0x28] sm:$0x3] %v1129_v0  ;;  %372 = vmatpush.msra.mxu1 %v291_v4  ;;  %v289_v11 = vld [vmem:[#allocation3 + $0x60] sm:$0xff]  ;;  %v313_v14 = vld [vmem:[#allocation3 + $0xd8] sm:$0xff]  ;;  %499 = vmatpush.msra.mxu3 %v483_v13  ;;  %v482_v16 = vld [vmem:[#allocation3 + $0x1f0] sm:$0xff]  ;;  %s1202_s27 = scalar_lea.vmem %s1228_s0, %s1011_s24  ;;  %s228_s6 = scalar_lea.vmem %s1231_s3, %s1012_s30 }
  0x14   : > { %235 = vst [vmem:[#allocation2 + $0x10] sm:$0xff] %v1129_v0  ;;  %435 = vmatpush.msra.mxu2 %v417_v8  ;;  %335 = vmatpush.msra.mxu0 %v315_v6  ;;  %v415_v12 = vld [vmem:[#allocation3 + $0x160] sm:$0xff]  ;;  %v288_v15 = vld [vmem:[#allocation3 + $0x58] sm:$0xff]  ;;  %v312_v18 = vld [vmem:[#allocation3 + $0xd0] sm:$0xff] }
  0x15   : > { %236 = vst [vmem:[#allocation2 + $0x18] sm:$0x3] %v1129_v0  ;;  %373 = vmatpush.msra.mxu1 %v290_v7  ;;  %v414_v17 = vld [vmem:[#allocation3 + $0x158] sm:$0xff]  ;;  %v287_v19 = vld [vmem:[#allocation3 + $0x50] sm:$0xff]  ;;  %500 = vmatpush.msra.mxu3 %v482_v16  ;;  %v481_v20 = vld [vmem:[#allocation3 + $0x1e8] sm:$0xff] }
  0x16   : > { %239 = vst [vmem:[#allocation2 + $0x30] sm:$0xff] %v1129_v0  ;;  %436 = vmatpush.msra.mxu2 %v416_v9  ;;  %336 = vmatpush.msra.mxu0 %v314_v10  ;;  %v413_v21 = vld [vmem:[#allocation3 + $0x150] sm:$0xff]  ;;  %v480_v22 = vld [vmem:[#allocation3 + $0x1e0] sm:$0xff]  ;;  %v311_v23 = vld [vmem:[#allocation3 + $0xc8] sm:$0xff] }
  0x17   : > { %240 = vst [vmem:[#allocation2 + $0x38] sm:$0x3] %v1129_v0  ;;  %374 = vmatpush.msra.mxu1 %v289_v11  ;;  %v286_v24 = vld [vmem:[#allocation3 + $0x48] sm:$0xff]  ;;  %501 = vmatpush.msra.mxu3 %v481_v20  ;;  %v479_v26 = vld [vmem:[#allocation3 + $0x1d8] sm:$0xff]  ;;  %v310_v27 = vld [vmem:[#allocation3 + $0xc0] sm:$0xff] }
  0x18   : > { %241 = vst [vmem:[#allocation2 + $0x40] sm:$0xff] %v1129_v0  ;;  %437 = vmatpush.msra.mxu2 %v415_v12  ;;  %337 = vmatpush.msra.mxu0 %v313_v14  ;;  %v412_v25 = vld [vmem:[#allocation3 + $0x148] sm:$0xff]  ;;  %v285_v28 = vld [vmem:[#allocation3 + $0x40] sm:$0xff]  ;;  %v478_v30 = vld [vmem:[#allocation3 + $0x1d0] sm:$0xff] }
  0x19   : > { %242 = vst [vmem:[#allocation2 + $0x48] sm:$0x3] %v1129_v0  ;;  %375 = vmatpush.msra.mxu1 %v288_v15  ;;  %502 = vmatpush.msra.mxu3 %v480_v22  ;;  %v411_v29 = vld [vmem:[#allocation3 + $0x140] sm:$0xff]  ;;  %v309_v31 = vld [vmem:[#allocation3 + $0xb8] sm:$0xff]  ;;  %v477_v34 = vld [vmem:[#allocation3 + $0x1c8] sm:$0xff] }
  0x1a   : > { %243 = vst [vmem:[#allocation2 + $0x50] sm:$0xff] %v1129_v0  ;;  %438 = vmatpush.msra.mxu2 %v414_v17  ;;  %338 = vmatpush.msra.mxu0 %v312_v18  ;;  %v284_v32 = vld [vmem:[#allocation3 + $0x38] sm:$0xff]  ;;  %v308_v35 = vld [vmem:[#allocation3 + $0xb0] sm:$0xff]  ;;  %v476_v38 = vld [vmem:[#allocation3 + $0x1c0] sm:$0xff] }
  0x1b   : > { %244 = vst [vmem:[#allocation2 + $0x58] sm:$0x3] %v1129_v0  ;;  %376 = vmatpush.msra.mxu1 %v287_v19  ;;  %503 = vmatpush.msra.mxu3 %v479_v26  ;;  %v410_v33 = vld [vmem:[#allocation3 + $0x138] sm:$0xff]  ;;  %v283_v36 = vld [vmem:[#allocation3 + $0x30] sm:$0xff]  ;;  %v307_v39 = vld [vmem:[#allocation3 + $0xa8] sm:$0xff] }
  0x1c   : > { %245 = vst [vmem:[#allocation2 + $0x60] sm:$0xff] %v1129_v0  ;;  %439 = vmatpush.msra.mxu2 %v413_v21  ;;  %339 = vmatpush.msra.mxu0 %v311_v23  ;;  %v409_v37 = vld [vmem:[#allocation3 + $0x130] sm:$0xff]  ;;  %v282_v40 = vld [vmem:[#allocation3 + $0x28] sm:$0xff]  ;;  %v475_v42 = vld [vmem:[#allocation3 + $0x1b8] sm:$0xff] }
  0x1d   : > { %246 = vst [vmem:[#allocation2 + $0x68] sm:$0x3] %v1129_v0  ;;  %377 = vmatpush.msra.mxu1 %v286_v24  ;;  %504 = vmatpush.msra.mxu3 %v478_v30  ;;  %v408_v41 = vld [vmem:[#allocation3 + $0x128] sm:$0xff]  ;;  %v306_v43 = vld [vmem:[#allocation3 + $0xa0] sm:$0xff]  ;;  %v474_v46 = vld [vmem:[#allocation3 + $0x1b0] sm:$0xff] }
  0x1e   : > { %247 = vst [vmem:[#allocation2 + $0x70] sm:$0xff] %v1129_v0  ;;  %440 = vmatpush.msra.mxu2 %v412_v25  ;;  %340 = vmatpush.msra.mxu0 %v310_v27  ;;  %v281_v44 = vld [vmem:[#allocation3 + $0x20] sm:$0xff]  ;;  %v305_v47 = vld [vmem:[#allocation3 + $0x98] sm:$0xff]  ;;  %v473_v50 = vld [vmem:[#allocation3 + $0x1a8] sm:$0xff] }
  0x1f   : > { %248 = vst [vmem:[#allocation2 + $0x78] sm:$0x3] %v1129_v0  ;;  %378 = vmatpush.msra.mxu1 %v285_v28  ;;  %505 = vmatpush.msra.mxu3 %v477_v34  ;;  %v407_v45 = vld [vmem:[#allocation3 + $0x120] sm:$0xff]  ;;  %v280_v48 = vld [vmem:[#allocation3 + $0x18] sm:$0xff]  ;;  %v304_v51 = vld [vmem:[#allocation3 + $0x90] sm:$0xff] }
  0x20   : > { %249 = vst [vmem:[#allocation2 + $0x80] sm:$0xff] %v1129_v0  ;;  %441 = vmatpush.msra.mxu2 %v411_v29  ;;  %341 = vmatpush.msra.mxu0 %v309_v31  ;;  %v406_v49 = vld [vmem:[#allocation3 + $0x118] sm:$0xff]  ;;  %v279_v52 = vld [vmem:[#allocation3 + $0x10] sm:$0xff]  ;;  %v472_v54 = vld [vmem:[#allocation3 + $0x1a0] sm:$0xff] }
  0x21   : > { %250 = vst [vmem:[#allocation2 + $0x88] sm:$0x3] %v1129_v0  ;;  %379 = vmatpush.msra.mxu1 %v284_v32  ;;  %506 = vmatpush.msra.mxu3 %v476_v38  ;;  %v405_v53 = vld [vmem:[#allocation3 + $0x110] sm:$0xff]  ;;  %v303_v55 = vld [vmem:[#allocation3 + $0x88] sm:$0xff]  ;;  %v471_v58 = vld [vmem:[#allocation3 + $0x198] sm:$0xff] }
  0x22   : > { %442 = vmatpush.msra.mxu2 %v410_v33  ;;  %342 = vmatpush.msra.mxu0 %v308_v35  ;;  %v278_v56 = vld [vmem:[#allocation3 + $0x8] sm:$0xff]  ;;  %v302_v59 = vld [vmem:[#allocation3 + $0x80] sm:$0xff]  ;;  %v548_v61 = vld [vmem:[#allocation3 + $0x278] sm:$0xff] }
  0x23   : > { %380 = vmatpush.msra.mxu1 %v283_v36  ;;  %507 = vmatpush.msra.mxu3 %v475_v42  ;;  %v404_v57 = vld [vmem:[#allocation3 + $0x108] sm:$0xff]  ;;  %v277_v60 = vld [vmem:[#allocation3] sm:$0xff]  ;;  %v613_v62 = vld [vmem:[#allocation3 + $0x2f8] sm:$0xff] }
  0x24   : > { %443 = vmatpush.msra.mxu2 %v409_v37  ;;  %343 = vmatpush.msra.mxu0 %v307_v39  ;;  %v403_v63 = vld [vmem:[#allocation3 + $0x100] sm:$0xff]  ;;  %v547_v0 = vld [vmem:[#allocation3 + $0x270] sm:$0xff]  ;;  %v678_v3 = vld [vmem:[#allocation3 + $0x378] sm:$0xff] }
  0x25   : > { %381 = vmatpush.msra.mxu1 %v282_v40  ;;  %508 = vmatpush.msra.mxu3 %v474_v46  ;;  %v612_v1 = vld [vmem:[#allocation3 + $0x2f0] sm:$0xff]  ;;  %v469_v4 = vld [vmem:[#allocation3 + $0x188] sm:$0xff]  ;;  %v254_v5 = vld [vmem:[%s1202_s27 + $0x8] sm:$0xff] }
  0x26   : > { %444 = vmatpush.msra.mxu2 %v408_v41  ;;  %344 = vmatpush.msra.mxu0 %v306_v43  ;;  %v470_v2 = vld [vmem:[#allocation3 + $0x190] sm:$0xff]  ;;  %263 = vst [vmem:[#allocation2 + $0x21] sm:$0xff] %v254_v5  ;;  %v294_v6 = vld [vmem:[#allocation2 + $0x1] ss:$2 sm:$0xf]  ;;  %v253_v7 = vld [vmem:[%s1202_s27] sm:$0xff] }
  0x27   : > { %382 = vmatpush.msra.mxu1 %v281_v44  ;;  %509 = vmatpush.msra.mxu3 %v473_v50  ;;  %v255_v8 = vld [vmem:[%s1202_s27 + $0x10] sm:$0xff]  ;;  %322 = vst [vmem:[#allocation1] ss:$2 sm:$0xff] %v294_v6  ;;  %v256_v11 = vld [vmem:[%s1202_s27 + $0x18] sm:$0xff]  ;;  %v468_v13 = vld [vmem:[#allocation3 + $0x180] sm:$0xff] }
  0x28   : > { %445 = vmatpush.msra.mxu2 %v407_v45  ;;  %345 = vmatpush.msra.mxu0 %v305_v47  ;;  %v546_v9 = vld [vmem:[#allocation3 + $0x268] sm:$0xff]  ;;  %v677_v12 = vld [vmem:[#allocation3 + $0x370] sm:$0xff]  ;;  %262 = vst [vmem:[#allocation2 + $0x11] sm:$0xff] %v253_v7  ;;  %v545_v14 = vld [vmem:[#allocation3 + $0x260] sm:$0xff] }
  0x29   : > { %383 = vmatpush.msra.mxu1 %v280_v48  ;;  %510 = vmatpush.msra.mxu3 %v472_v54  ;;  %v611_v10 = vld [vmem:[#allocation3 + $0x2e8] sm:$0xff]  ;;  %v610_v15 = vld [vmem:[#allocation3 + $0x2e0] sm:$0xff]  ;;  %264 = vst [vmem:[#allocation2 + $0x31] sm:$0xff] %v255_v8  ;;  %v743_v17 = vld [vmem:[#allocation3 + $0x3f8] sm:$0xff] }
  0x2a   : > { %446 = vmatpush.msra.mxu2 %v406_v49  ;;  %346 = vmatpush.msra.mxu0 %v304_v51  ;;  %v676_v16 = vld [vmem:[#allocation3 + $0x368] sm:$0xff]  ;;  %265 = vst [vmem:[#allocation2 + $0x41] sm:$0xff] %v256_v11  ;;  %v544_v18 = vld [vmem:[#allocation3 + $0x258] sm:$0xff]  ;;  %v675_v20 = vld [vmem:[#allocation3 + $0x360] sm:$0xff] }
  0x2b   : > { %384 = vmatpush.msra.mxu1 %v279_v52  ;;  %511 = vmatpush.msra.mxu3 %v471_v58  ;;  %v609_v19 = vld [vmem:[#allocation3 + $0x2d8] sm:$0xff]  ;;  %v742_v21 = vld [vmem:[#allocation3 + $0x3f0] sm:$0xff]  ;;  %v741_v26 = vld [vmem:[#allocation3 + $0x3e8] sm:$0xff] }
  0x2c   : > { %447 = vmatpush.msra.mxu2 %v405_v53  ;;  %347 = vmatpush.msra.mxu0 %v303_v55  ;;  %v543_v22 = vld [vmem:[#allocation3 + $0x250] sm:$0xff]  ;;  %v674_v25 = vld [vmem:[#allocation3 + $0x358] sm:$0xff]  ;;  %v258_v27 = vld [vmem:[%s1202_s27 + $0x28] sm:$0xff] }
  0x2d   : > { %385 = vmatpush.msra.mxu1 %v278_v56  ;;  %512 = vmatpush.msra.mxu3 %v470_v2  ;;  %v608_v23 = vld [vmem:[#allocation3 + $0x2d0] sm:$0xff]  ;;  %v296_v24 = vld [vmem:[#allocation2 + $0x21] ss:$2 sm:$0xf]  ;;  %v542_v28 = vld [vmem:[#allocation3 + $0x248] sm:$0xff]  ;;  %267 = vst [vmem:[#allocation2 + $0x61] sm:$0xff] %v258_v27 }
  0x2e   : > { %448 = vmatpush.msra.mxu2 %v404_v57  ;;  %348 = vmatpush.msra.mxu0 %v302_v59  ;;  %324 = vst [vmem:[#allocation1 + $0x1] ss:$2 sm:$0xff] %v296_v24  ;;  %v607_v29 = vld [vmem:[#allocation3 + $0x2c8] sm:$0xff]  ;;  %v257_v30 = vld [vmem:[%s1202_s27 + $0x20] sm:$0xff]  ;;  %v673_v31 = vld [vmem:[#allocation3 + $0x350] sm:$0xff] }
  0x2f   : > { %386 = vmatpush.msra.mxu1 %v277_v60  ;;  %513 = vmatpush.msra.mxu3 %v469_v4  ;;  %v541_v32 = vld [vmem:[#allocation3 + $0x240] sm:$0xff]  ;;  %v672_v35 = vld [vmem:[#allocation3 + $0x348] sm:$0xff]  ;;  %v540_v37 = vld [vmem:[#allocation3 + $0x238] sm:$0xff]  ;;  %266 = vst [vmem:[#allocation2 + $0x51] sm:$0xff] %v257_v30 }
  0x30   : > { %564 = vmatpush.msrb.mxu0 %v548_v61  ;;  %449 = vmatpush.msra.mxu2 %v403_v63  ;;  %v740_v33 = vld [vmem:[#allocation3 + $0x3e0] sm:$0xff]  ;;  %v259_v36 = vld [vmem:[%s1202_s27 + $0x30] sm:$0xff]  ;;  %v739_v38 = vld [vmem:[#allocation3 + $0x3d8] sm:$0xff] }
  0x31   : > { %629 = vmatpush.msrb.mxu1 %v613_v62  ;;  %514 = vmatpush.msra.mxu3 %v468_v13  ;;  %v606_v34 = vld [vmem:[#allocation3 + $0x2c0] sm:$0xff]  ;;  %v605_v40 = vld [vmem:[#allocation3 + $0x2b8] sm:$0xff]  ;;  %268 = vst [vmem:[#allocation2 + $0x71] sm:$0xff] %v259_v36  ;;  %v539_v45 = vld [vmem:[#allocation3 + $0x230] sm:$0xff] }
  0x32   : > { %565 = vmatpush.msrb.mxu0 %v547_v0  ;;  %694 = vmatpush.msrb.mxu2 %v678_v3  ;;  %v298_v39 = vld [vmem:[#allocation2 + $0x41] ss:$2 sm:$0xf]  ;;  %v270_v41 = vld [vmem:[#allocation2] ss:$2 sm:$0xf] }
  0x33   : > { %630 = vmatpush.msrb.mxu1 %v612_v1  ;;  %759 = vmatpush.msrb.mxu3 %v743_v17  ;;  %326 = vst [vmem:[#allocation1 + $0x10] ss:$2 sm:$0xff] %v298_v39  ;;  %v671_v42 = vld [vmem:[#allocation3 + $0x340] sm:$0xff]  ;;  %v604_v46 = vld [vmem:[#allocation3 + $0x2b0] sm:$0xff]  ;;  %v670_v47 = vld [vmem:[#allocation3 + $0x338] sm:$0xff] }
  0x34   : > { %566 = vmatpush.msrb.mxu0 %v546_v9  ;;  %695 = vmatpush.msrb.mxu2 %v677_v12  ;;  %v272_v43 = vld [vmem:[#allocation2 + $0x20] ss:$2 sm:$0xf]  ;;  %v538_v48 = vld [vmem:[#allocation3 + $0x228] sm:$0xff]  ;;  %v738_v49 = vld [vmem:[#allocation3 + $0x3d0] sm:$0xff] }
  0x35   : > { %631 = vmatpush.msrb.mxu1 %v611_v10  ;;  %760 = vmatpush.msrb.mxu3 %v742_v21  ;;  %v329_v44 = vld.sshfl [vmem:[#allocation1] sm:$0xff pattern:$0x75316420]  ;;  %v603_v50 = vld [vmem:[#allocation3 + $0x2a8] sm:$0xff]  ;;  %v669_v52 = vld [vmem:[#allocation3 + $0x330] sm:$0xff] }
  0x36   : > { %567 = vmatpush.msrb.mxu0 %v545_v14  ;;  %696 = vmatpush.msrb.mxu2 %v676_v16  ;;  %360 = vst [vmem:[#allocation1] ss:$2 sm:$0xff] %v270_v41  ;;  %v300_v51 = vld [vmem:[#allocation2 + $0x61] ss:$2 sm:$0xf]  ;;  %v737_v53 = vld [vmem:[#allocation3 + $0x3c8] sm:$0xff] }
  0x37   : > { %632 = vmatpush.msrb.mxu1 %v610_v15  ;;  %761 = vmatpush.msrb.mxu3 %v741_v26  ;;  %362 = vst [vmem:[#allocation1 + $0x1] ss:$2 sm:$0xff] %v272_v43  ;;  %v537_v54 = vld [vmem:[#allocation3 + $0x220] sm:$0xff]  ;;  %v668_v57 = vld [vmem:[#allocation3 + $0x328] sm:$0xff]  ;;  %v536_v60 = vld [vmem:[#allocation3 + $0x218] sm:$0xff] }
  0x38   : > { %568 = vmatpush.msrb.mxu0 %v544_v18  ;;  %697 = vmatpush.msrb.mxu2 %v675_v20  ;;  %328 = vst [vmem:[#allocation1 + $0x11] ss:$2 sm:$0xff] %v300_v51  ;;  %v602_v55 = vld [vmem:[#allocation3 + $0x2a0] sm:$0xff]  ;;  %v601_v61 = vld [vmem:[#allocation3 + $0x298] sm:$0xff]  ;;  %v535_v0 = vld [vmem:[#allocation3 + $0x210] sm:$0xff] }
  0x39   : > { %633 = vmatpush.msrb.mxu1 %v609_v19  ;;  %762 = vmatpush.msrb.mxu3 %v740_v33  ;;  %v395_v56 = vld [vmem:[#allocation2 + $0x2] ss:$2 sm:$0xf]  ;;  %v600_v2 = vld [vmem:[#allocation3 + $0x290] sm:$0xff]  ;;  %v735_v3 = vld [vmem:[#allocation3 + $0x3b8] sm:$0xff] }
  0x3a   : > { %569 = vmatpush.msrb.mxu0 %v543_v22  ;;  %698 = vmatpush.msrb.mxu2 %v674_v25  ;;  %v736_v58 = vld [vmem:[#allocation3 + $0x3c0] sm:$0xff]  ;;  %v666_v5 = vld [vmem:[#allocation3 + $0x318] sm:$0xff]  ;;  %v599_v7 = vld [vmem:[#allocation3 + $0x288] sm:$0xff] }
  0x3b   : > { %634 = vmatpush.msrb.mxu1 %v608_v23  ;;  %763 = vmatpush.msrb.mxu3 %v739_v38  ;;  %v397_v59 = vld [vmem:[#allocation2 + $0x22] ss:$2 sm:$0xf]  ;;  %v734_v9 = vld [vmem:[#allocation3 + $0x3b0] sm:$0xff]  ;;  %v808_v15 = vld [vmem:[#allocation3 + $0x478] sm:$0xff] }
  0x3c   : > { %570 = vmatpush.msrb.mxu0 %v542_v28  ;;  %699 = vmatpush.msrb.mxu2 %v673_v31  ;;  %v667_v62 = vld [vmem:[#allocation3 + $0x320] sm:$0xff]  ;;  %v534_v8 = vld [vmem:[#allocation3 + $0x208] sm:$0xff]  ;;  %v665_v10 = vld [vmem:[#allocation3 + $0x310] sm:$0xff] }
  0x3d   : > { %635 = vmatpush.msrb.mxu1 %v607_v29  ;;  %349 = vmatmul.f32.vlgmr.msra.gmra.mxu0 %v329_v44  ;;  %v274_v63 = vld [vmem:[#allocation2 + $0x40] ss:$2 sm:$0xf]  ;;  %v733_v13 = vld [vmem:[#allocation3 + $0x3a8] sm:$0xff]  ;;  %v260_v17 = vld [vmem:[%s1202_s27 + $0x38] sm:$0xff] }
  0x3e   : > { %571 = vmatpush.msrb.mxu0 %v541_v32  ;;  %700 = vmatpush.msrb.mxu2 %v672_v35  ;;  %v276_v1 = vld [vmem:[#allocation2 + $0x60] ss:$2 sm:$0xf]  ;;  %v367_v4 = vld.sshfl [vmem:[#allocation1] sm:$0xff pattern:$0x75316420] }
  0x3f   : > { %636 = vmatpush.msrb.mxu1 %v606_v34  ;;  %764 = vmatpush.msrb.mxu3 %v738_v49  ;;  %423 = vst [vmem:[#allocation1] ss:$2 sm:$0xff] %v395_v56  ;;  %v330_v6 = vld.sshfl [vmem:[#allocation1 + $0x10] sm:$0xff pattern:$0x75316420]  ;;  %v598_v11 = vld [vmem:[#allocation3 + $0x280] sm:$0xff] }
  0x40   : > { %572 = vmatpush.msrb.mxu0 %v540_v37  ;;  %701 = vmatpush.msrb.mxu2 %v671_v42  ;;  %425 = vst [vmem:[#allocation1 + $0x1] ss:$2 sm:$0xff] %v397_v59  ;;  %v533_v12 = vld [vmem:[#allocation3 + $0x200] sm:$0xff]  ;;  %v664_v14 = vld [vmem:[#allocation3 + $0x308] sm:$0xff]  ;;  %v807_v19 = vld [vmem:[#allocation3 + $0x470] sm:$0xff] }
  0x41   : > { %637 = vmatpush.msrb.mxu1 %v605_v40  ;;  %765 = vmatpush.msrb.mxu3 %v737_v53  ;;  %364 = vst [vmem:[#allocation1 + $0x10] ss:$2 sm:$0xff] %v274_v63  ;;  %v732_v16 = vld [vmem:[#allocation3 + $0x3a0] sm:$0xff]  ;;  %v460_v18 = vld [vmem:[#allocation2 + $0x10] ss:$2 sm:$0xf] }
  0x42   : > { %573 = vmatpush.msrb.mxu0 %v539_v45  ;;  %702 = vmatpush.msrb.mxu2 %v670_v47  ;;  %366 = vst [vmem:[#allocation1 + $0x11] ss:$2 sm:$0xff] %v276_v1  ;;  %v462_v20 = vld [vmem:[#allocation2 + $0x30] ss:$2 sm:$0xf]  ;;  %v663_v21 = vld [vmem:[#allocation3 + $0x300] sm:$0xff] }
  0x43   : > { %638 = vmatpush.msrb.mxu1 %v604_v46  ;;  %766 = vmatpush.msrb.mxu3 %v736_v58  ;;  %269 = vst [vmem:[#allocation2 + $0x81] sm:$0xff] %v260_v17  ;;  %v399_v23 = vld [vmem:[#allocation2 + $0x42] ss:$2 sm:$0xf]  ;;  %v731_v26 = vld [vmem:[#allocation3 + $0x398] sm:$0xff]  ;;  %v730_v28 = vld [vmem:[#allocation3 + $0x390] sm:$0xff] }
  0x44   : > { %574 = vmatpush.msrb.mxu0 %v538_v48  ;;  %703 = vmatpush.msrb.mxu2 %v669_v52  ;;  %v401_v24 = vld [vmem:[#allocation2 + $0x62] ss:$2 sm:$0xf]  ;;  %v525_v29 = vld [vmem:[#allocation2 + $0x11] ss:$2 sm:$0xf] }
  0x45   : > { %639 = vmatpush.msrb.mxu1 %v603_v50  ;;  %767 = vmatpush.msrb.mxu3 %v735_v3  ;;  %v806_v27 = vld [vmem:[#allocation3 + $0x468] sm:$0xff]  ;;  %v805_v30 = vld [vmem:[#allocation3 + $0x460] sm:$0xff]  ;;  %v527_v31 = vld [vmem:[#allocation2 + $0x31] ss:$2 sm:$0xf] }
  0x46   : > { %575 = vmatpush.msrb.mxu0 %v537_v54  ;;  %704 = vmatpush.msrb.mxu2 %v668_v57  ;;  %v729_v32 = vld [vmem:[#allocation3 + $0x388] sm:$0xff]  ;;  %v804_v33 = vld [vmem:[#allocation3 + $0x458] sm:$0xff]  ;;  %v464_v35 = vld [vmem:[#allocation2 + $0x50] ss:$2 sm:$0xf] }
  0x47   : > { %640 = vmatpush.msrb.mxu1 %v602_v55  ;;  %352 = vmatmul.f32.gmra.mxu0 %v330_v6  ;;  %v430_v22 = vld.sshfl [vmem:[#allocation1] sm:$0xff pattern:$0x75316420]  ;;  %v466_v36 = vld [vmem:[#allocation2 + $0x70] ss:$2 sm:$0xf] }
  0x48   : > { %576 = vmatpush.msrb.mxu0 %v536_v60  ;;  %387 = vmatmul.f32.vlgmr.msra.gmra.mxu1 %v367_v4  ;;  %488 = vst [vmem:[#allocation1] ss:$2 sm:$0xff] %v460_v18  ;;  %v728_v37 = vld [vmem:[#allocation3 + $0x380] sm:$0xff]  ;;  %v803_v39 = vld [vmem:[#allocation3 + $0x450] sm:$0xff]  ;;  %v802_v42 = vld [vmem:[#allocation3 + $0x448] sm:$0xff] }
  0x49   : > { %641 = vmatpush.msrb.mxu1 %v601_v61  ;;  %705 = vmatpush.msrb.mxu2 %v667_v62  ;;  %490 = vst [vmem:[#allocation1 + $0x1] ss:$2 sm:$0xff] %v462_v20  ;;  %v368_v25 = vld.sshfl [vmem:[#allocation1 + $0x10] sm:$0xff pattern:$0x75316420]  ;;  %v801_v43 = vld [vmem:[#allocation3 + $0x440] sm:$0xff] }
  0x4a   : > { %577 = vmatpush.msrb.mxu0 %v535_v0  ;;  %768 = vmatpush.msrb.mxu3 %v734_v9  ;;  %427 = vst [vmem:[#allocation1 + $0x10] ss:$2 sm:$0xff] %v399_v23  ;;  %v590_v40 = vld [vmem:[#allocation2 + $0x12] ss:$2 sm:$0xf]  ;;  %v798_v52 = vld [vmem:[#allocation3 + $0x428] sm:$0xff] }
  0x4b   : > { %642 = vmatpush.msrb.mxu1 %v600_v2  ;;  %706 = vmatpush.msrb.mxu2 %v666_v5  ;;  %429 = vst [vmem:[#allocation1 + $0x11] ss:$2 sm:$0xff] %v401_v24  ;;  %v592_v41 = vld [vmem:[#allocation2 + $0x32] ss:$2 sm:$0xf]  ;;  %v797_v53 = vld [vmem:[#allocation3 + $0x420] sm:$0xff] }
  0x4c   : > { %578 = vmatpush.msrb.mxu0 %v534_v8  ;;  %769 = vmatpush.msrb.mxu3 %v733_v13  ;;  %v529_v44 = vld [vmem:[#allocation2 + $0x51] ss:$2 sm:$0xf]  ;;  %v800_v47 = vld [vmem:[#allocation3 + $0x438] sm:$0xff]  ;;  %v794_v60 = vld [vmem:[#allocation3 + $0x408] sm:$0xff] }
  0x4d   : > { %643 = vmatpush.msrb.mxu1 %v599_v7  ;;  %707 = vmatpush.msrb.mxu2 %v665_v10  ;;  %v531_v46 = vld [vmem:[#allocation2 + $0x71] ss:$2 sm:$0xf]  ;;  %v655_v50 = vld [vmem:[#allocation2 + $0x20] ss:$2 sm:$0xf] }
  0x4e   : > { %579 = vmatpush.msrb.mxu0 %v533_v12  ;;  %770 = vmatpush.msrb.mxu3 %v732_v16  ;;  %v799_v49 = vld [vmem:[#allocation3 + $0x430] sm:$0xff]  ;;  %v657_v51 = vld [vmem:[#allocation2 + $0x40] ss:$2 sm:$0xf]  ;;  %v796_v57 = vld [vmem:[#allocation3 + $0x418] sm:$0xff] }
  0x4f   : > { %644 = vmatpush.msrb.mxu1 %v598_v11  ;;  %708 = vmatpush.msrb.mxu2 %v664_v14  ;;  %v594_v55 = vld [vmem:[#allocation2 + $0x52] ss:$2 sm:$0xf]  ;;  %v720_v61 = vld [vmem:[#allocation2 + $0x21] ss:$2 sm:$0xf] }
  0x50   : > { %824 = vmatpush.msra.mxu0 %v808_v15  ;;  %450 = vmatmul.f32.vlgmr.msra.gmra.mxu2 %v430_v22  ;;  %v495_v34 = vld.sshfl [vmem:[#allocation1] sm:$0xff pattern:$0x75316420]  ;;  %v795_v59 = vld [vmem:[#allocation3 + $0x410] sm:$0xff]  ;;  %v793_v62 = vld [vmem:[#allocation3 + $0x400] sm:$0xff] }
  0x51   : > { %1013 = vmatpush.msra.mxu1 %v808_v15  ;;  %709 = vmatpush.msrb.mxu2 %v663_v21  ;;  %553 = vst [vmem:[#allocation1] ss:$2 sm:$0xff] %v525_v29  ;;  %v596_v56 = vld [vmem:[#allocation2 + $0x72] ss:$2 sm:$0xf] }
  0x52   : > { %825 = vmatpush.msra.mxu0 %v807_v19  ;;  %390 = vmatmul.f32.gmra.mxu1 %v368_v25  ;;  %555 = vst [vmem:[#allocation1 + $0x1] ss:$2 sm:$0xff] %v527_v31  ;;  %v431_v38 = vld.sshfl [vmem:[#allocation1 + $0x10] sm:$0xff pattern:$0x75316420] }
  0x53   : > { %1014 = vmatpush.msra.mxu1 %v807_v19  ;;  %771 = vmatpush.msrb.mxu3 %v731_v26  ;;  %492 = vst [vmem:[#allocation1 + $0x10] ss:$2 sm:$0xff] %v464_v35  ;;  %v722_v63 = vld [vmem:[#allocation2 + $0x41] ss:$2 sm:$0xf] }
  0x54   : > { %826 = vmatpush.msra.mxu0 %v806_v27  ;;  %515 = vmatmul.f32.vlgmr.msra.gmra.mxu3 %v495_v34  ;;  %494 = vst [vmem:[#allocation1 + $0x11] ss:$2 sm:$0xff] %v466_v36  ;;  %v659_v1 = vld [vmem:[#allocation2 + $0x60] ss:$2 sm:$0xf] }
  0x55   : > { %1015 = vmatpush.msra.mxu1 %v806_v27  ;;  %772 = vmatpush.msrb.mxu3 %v730_v28  ;;  %v661_v2 = vld [vmem:[#allocation2 + $0x80] ss:$2 sm:$0xf]  ;;  %v724_v7 = vld [vmem:[#allocation2 + $0x61] ss:$2 sm:$0xf] }
  0x56   : > { %827 = vmatpush.msra.mxu0 %v805_v30  ;;  %v785_v4 = vld [vmem:[#allocation2 + $0x22] ss:$2 sm:$0xf]  ;;  %v726_v8 = vld [vmem:[#allocation2 + $0x81] ss:$2 sm:$0xf] }
  0x57   : > { %1016 = vmatpush.msra.mxu1 %v805_v30  ;;  %773 = vmatpush.msrb.mxu3 %v729_v32  ;;  %v787_v5 = vld [vmem:[#allocation2 + $0x42] ss:$2 sm:$0xf] }
  0x58   : > { %828 = vmatpush.msra.mxu0 %v804_v33  ;;  %453 = vmatmul.f32.gmra.mxu2 %v431_v38  ;;  %v789_v10 = vld [vmem:[#allocation2 + $0x62] ss:$2 sm:$0xf]  ;;  %v1067_v38 = vld [vmem:[%s1230_s2] ss:$0 sm:$0xff] }
  0x59   : > { %1017 = vmatpush.msra.mxu1 %v804_v33  ;;  %774 = vmatpush.msrb.mxu3 %v728_v37  ;;  %v560_v45 = vld.sshfl [vmem:[#allocation1] sm:$0xff pattern:$0x75316420]  ;;  %v791_v12 = vld [vmem:[#allocation2 + $0x82] ss:$2 sm:$0xf] }
  0x5a   : > { %829 = vmatpush.msra.mxu0 %v803_v39  ;;  %618 = vst [vmem:[#allocation1] ss:$2 sm:$0xff] %v590_v40 }
  0x5b   : > { %1018 = vmatpush.msra.mxu1 %v803_v39  ;;  %580 = vmatmul.f32.vlgmr.msrb.gmra.mxu0 %v560_v45  ;;  %v496_v48 = vld.sshfl [vmem:[#allocation1 + $0x10] sm:$0xff pattern:$0x75316420]  ;;  %620 = vst [vmem:[#allocation1 + $0x1] ss:$2 sm:$0xff] %v592_v41 }
  0x5c   : > { %830 = vmatpush.msra.mxu0 %v802_v42  ;;  %518 = vmatmul.f32.gmra.mxu3 %v496_v48  ;;  %557 = vst [vmem:[#allocation1 + $0x10] ss:$2 sm:$0xff] %v529_v44 }
  0x5d   : > { %1019 = vmatpush.msra.mxu1 %v802_v42  ;;  %559 = vst [vmem:[#allocation1 + $0x11] ss:$2 sm:$0xff] %v531_v46 }
  0x5e   : > { %831 = vmatpush.msra.mxu0 %v801_v43 }
  0x5f   : > { %1020 = vmatpush.msra.mxu1 %v801_v43 }
  0x60   : > { %832 = vmatpush.msra.mxu0 %v800_v47 }
  0x61   : > { %1021 = vmatpush.msra.mxu1 %v800_v47 }
  0x62   : > { %833 = vmatpush.msra.mxu0 %v799_v49  ;;  %v625_v54 = vld.sshfl [vmem:[#allocation1] sm:$0xff pattern:$0x75316420] }
  0x63   : > { %1022 = vmatpush.msra.mxu1 %v799_v49  ;;  %683 = vst [vmem:[#allocation1] ss:$2 sm:$0xff] %v655_v50 }
  0x64   : > { %834 = vmatpush.msra.mxu0 %v798_v52  ;;  %645 = vmatmul.f32.vlgmr.msrb.gmra.mxu1 %v625_v54  ;;  %685 = vst [vmem:[#allocation1 + $0x1] ss:$2 sm:$0xff] %v657_v51  ;;  %v561_v58 = vld.sshfl [vmem:[#allocation1 + $0x10] sm:$0xff pattern:$0x75316420] }
  0x65   : > { %1023 = vmatpush.msra.mxu1 %v798_v52  ;;  %622 = vst [vmem:[#allocation1 + $0x10] ss:$2 sm:$0xff] %v594_v55  ;;  %583 = vmatmul.f32.gmra.mxu0 %v561_v58 }
  0x66   : > { %835 = vmatpush.msra.mxu0 %v797_v53  ;;  %624 = vst [vmem:[#allocation1 + $0x11] ss:$2 sm:$0xff] %v596_v56 }
  0x67   : > { %1024 = vmatpush.msra.mxu1 %v797_v53 }
  0x68   : > { %836 = vmatpush.msra.mxu0 %v796_v57 }
  0x69   : > { %1025 = vmatpush.msra.mxu1 %v796_v57 }
  0x6a   : > { %837 = vmatpush.msra.mxu0 %v795_v59 }
  0x6b   : > { %1026 = vmatpush.msra.mxu1 %v795_v59  ;;  %v690_v0 = vld.sshfl [vmem:[#allocation1] sm:$0xff pattern:$0x75316420] }
  0x6c   : > { %838 = vmatpush.msra.mxu0 %v794_v60  ;;  %710 = vmatmul.f32.vlgmr.msrb.gmra.mxu2 %v690_v0  ;;  %748 = vst [vmem:[#allocation1] ss:$2 sm:$0xff] %v720_v61 }
  0x6d   : > { %1027 = vmatpush.msra.mxu1 %v794_v60  ;;  %750 = vst [vmem:[#allocation1 + $0x1] ss:$2 sm:$0xff] %v722_v63  ;;  %v626_v3 = vld.sshfl [vmem:[#allocation1 + $0x10] sm:$0xff pattern:$0x75316420] }
  0x6e   : > { %839 = vmatpush.msra.mxu0 %v793_v62  ;;  %687 = vst [vmem:[#allocation1 + $0x10] ss:$2 sm:$0xff] %v659_v1  ;;  %648 = vmatmul.f32.gmra.mxu1 %v626_v3 }
  0x6f   : > { %1028 = vmatpush.msra.mxu1 %v793_v62  ;;  %689 = vst [vmem:[#allocation1 + $0x11] ss:$2 sm:$0xff] %v661_v2 }
  0x74   : > { %v755_v6 = vld.sshfl [vmem:[#allocation1] sm:$0xff pattern:$0x75316420] }
  0x75   : > { %775 = vmatmul.f32.vlgmr.msrb.gmra.mxu3 %v755_v6  ;;  %813 = vst [vmem:[#allocation1] ss:$2 sm:$0xff] %v785_v4 }
  0x76   : > { %815 = vst [vmem:[#allocation1 + $0x1] ss:$2 sm:$0xff] %v787_v5  ;;  %v691_v9 = vld.sshfl [vmem:[#allocation1 + $0x10] sm:$0xff pattern:$0x75316420] }
  0x77   : > { %713 = vmatmul.f32.gmra.mxu2 %v691_v9  ;;  %752 = vst [vmem:[#allocation1 + $0x10] ss:$2 sm:$0xff] %v724_v7 }
  0x78   : > { %754 = vst [vmem:[#allocation1 + $0x11] ss:$2 sm:$0xff] %v726_v8 }
  0x7d   : > { %v820_v11 = vld.sshfl [vmem:[#allocation1] sm:$0xff pattern:$0x75316420] }
  0x7e   : > { %840 = vmatmul.f32.vlgmr.msra.gmra.mxu0 %v820_v11 }
  0x7f   : > { %v756_v13 = vld.sshfl [vmem:[#allocation1 + $0x10] sm:$0xff pattern:$0x75316420] }
  0x80   : > { %778 = vmatmul.f32.gmra.mxu3 %v756_v13  ;;  %817 = vst [vmem:[#allocation1 + $0x10] ss:$2 sm:$0xff] %v789_v10 }
  0x81   : > { %819 = vst [vmem:[#allocation1 + $0x11] ss:$2 sm:$0xff] %v791_v12 }
  0x88   : > { %v821_v14 = vld.sshfl [vmem:[#allocation1 + $0x10] sm:$0xff pattern:$0x75316420] }
  0x89   : > { %843 = vmatmul.f32.vlgmr.msra.gmra.mxu1 %v821_v14 }
  0xba   : > { %v350_v15 = vpop.f32.mrf.mxu0 }
  0xc4   : > { %v353_v17 = vpop.f32.mrf.mxu0 }
  0xc5   : > { %v388_v16 = vpop.f32.mrf.mxu1 }
  0xc6   : > { %v389_v19 = vadd.f32 %v388_v16, %v350_v15 }
  0xcf   : > { %v391_v21 = vpop.f32.mrf.mxu1 }
  0xd0   : > { %v392_v27 = vadd.f32 %v391_v21, %v353_v17 }
  0xd3   : > { %v451_v18 = vpop.f32.mrf.mxu2 }
  0xd4   : > { %v457_v22 = vadd.f32 %v451_v18, %v389_v19 }
  0xd7   : > { %v516_v20 = vpop.f32.mrf.mxu3 }
  0xd8   : > { %v581_v23 = vpop.f32.mrf.mxu0  ;;  %v522_v25 = vadd.f32 %v516_v20, %v457_v22 }
  0xda   : > { %v587_v28 = vadd.f32 %v581_v23, %v522_v25 }
  0xdb   : > { %v454_v24 = vpop.f32.mrf.mxu2 }
  0xdc   : > { %v458_v30 = vadd.f32 %v454_v24, %v392_v27 }
  0xdf   : > { %v519_v26 = vpop.f32.mrf.mxu3 }
  0xe0   : > { %v523_v34 = vadd.f32 %v519_v26, %v458_v30 }
  0xe1   : > { %v646_v29 = vpop.f32.mrf.mxu1 }
  0xe2   : > { %v584_v31 = vpop.f32.mrf.mxu0  ;;  %v652_v32 = vadd.f32 %v646_v29, %v587_v28 }
  0xe3   : > { %v588_v39 = vadd.f32 %v584_v31, %v523_v34 }
  0xeb   : > { %v649_v41 = vpop.f32.mrf.mxu1 }
  0xec   : > { %v653_v44 = vadd.f32 %v649_v41, %v588_v39 }
  0xef   : > { %v711_v33 = vpop.f32.mrf.mxu2 }
  0xf0   : > { %v717_v35 = vadd.f32 %v711_v33, %v652_v32 }
  0xf8   : > { %v776_v36 = vpop.f32.mrf.mxu3 }
  0xf9   : > { %v782_v37 = vadd.f32 %v776_v36, %v717_v35 }
  0xfa   : > { %v714_v45 = vpop.f32.mrf.mxu2 }
  0xfb   : > { %v841_v40 = vpop.f32.mrf.mxu0  ;;  %v718_v48 = vadd.f32 %v714_v45, %v653_v44 }
  0xfc   : > { %v847_v42 = vadd.f32 %v841_v40, %v782_v37 }
  0xfe   : > { %v853_v43 = vadd.f32 %v1067_v38, %v847_v42 }
 0x100   : > { %vm855_vm0 = vcmp.gt.f32.partialorder %v853_v43, 0.0  ;;  %v857_v46 = vmul.f32 0.01, %v853_v43 }
 0x102   : > { %v859_v47 = vsel %vm855_vm0, %v853_v43, %v857_v46 }
 0x103   : > { %v779_v49 = vpop.f32.mrf.mxu3  ;;  %v863_v50 = vrot.slane %v859_v47, 4  ;;  %867 = vst [vmem:[%s228_s6] sm:$0xf] %v859_v47 }
 0x104   : > { %v783_v51 = vadd.f32 %v779_v49, %v718_v48 }
 0x105   : > { %868 = vst [vmem:[%s228_s6 + $0x4] sm:$0xf] %v863_v50 }
 0x106   : > { %v844_v52 = vpop.f32.mrf.mxu1 }
 0x107   : > { %v848_v53 = vadd.f32 %v844_v52, %v783_v51 }
 0x109   : > { %v854_v54 = vadd.f32 %v1067_v38, %v848_v53 }
 0x10b   : > { %vm856_vm1 = vcmp.gt.f32.partialorder %v854_v54, 0.0  ;;  %v858_v55 = vmul.f32 0.01, %v854_v54 }
 0x10d   : > { %v860_v56 = vsel %vm856_vm1, %v854_v54, %v858_v55 }
 0x10e   : > { %v864_v57 = vrot.slane %v860_v56, 4  ;;  %869 = vst [vmem:[%s228_s6 + $0x8] sm:$0xf] %v860_v56 }
 0x110   : > { %870 = vst [vmem:[%s228_s6 + $0xc] sm:$0xf] %v864_v57 }
 0x111 PF: > { %s14_s14 = sadd.s32 1, %s1124_s14   ;;  %s1232_s12 = smov %s1120_s13 }
 0x112   : > { %p11_p8 = scmp.ge.s32.totalorder %s14_s14, 4   ;;  %s1233_s13 = smov %s1235_s16 }
 0x114   :  { %13 = sbr.rel (!%p11_p8) target bundleno = 2 (0x2), region = 146 }
 0x119   :  { %898 = vsyncpa [#allocation4], 1 }
 0x11a   :  { %900 = vsyncpa [#allocation4 + $0x1], 1 }

// kernel: gradual_deformation_block.4
= control target key start
LH: loop header
LB: loop body
LE: loop exit
PB: predicated region body
PF: predicated region fallthrough
CT: control target
= control target key end

     0   :  { %s1506_s12 = smov 0   ;;  %s1508_s13 = smov 0   ;;  %s2149_s0 = inlined_call_operand.vmem [shape: f32[2,16,16,128], index: 0, kind: input, shape index: {}]   ;;  %s2150_s1 = inlined_call_operand.vmem [shape: f32[3,3,128,128], index: 1, kind: input, shape index: {}]   ;;  %s2151_s2 = inlined_call_operand.vmem [shape: f32[1,128], index: 2, kind: input, shape index: {}]   ;;  %s2152_s3 = inlined_call_operand.vmem [shape: f32[2,8,8,128], index: 3, kind: output, shape index: {}]  }
   0x1   :  { %s1510_s14 = smov 0  }
   0x2 LB: > { %s25_s15 = sadd.s32 1, %s1479_s13  ;;  %p1266_p0 = scmp.ge.s32.totalorder %s1483_s14, 1  ;;  %s1483_s14 = sphi %s1510_s14, %s13_s14   ;;  %s1479_s13 = sphi %s1508_s13, %s2154_s13   ;;  %s1475_s12 = sphi %s1506_s12, %s2153_s12  }
   0x3   : > { %p27_p1 = scmp.ge.s32.totalorder %s25_s15, 2  ;;  %p168_p2 = scmp.lt.s32.totalorder %s1483_s14, 3 }
   0x5   : > { %s2156_s15 = smov (%p27_p1, %s25_s15), 0  ;;  %p169_p3 = pnand %p1266_p0, %p168_p2 }
   0x6   : > { %p202_p4 = scmp.lt.s32.totalorder (!%p169_p3), %s1475_s12, 1 }
   0x7   : > { %172 = sbr.rel (%p169_p3) target bundleno = 360 (0x168), region = 32 }
   0xc   : > { %v1286_v0 = vld [vmem:[%s2150_s1 + $0xf8] sm:$0xff]  ;;  %v1285_v1 = vld [vmem:[%s2150_s1 + $0xf0] sm:$0xff]  ;;  %v1485_v2 = vmov 0.0   ;;  %v1284_v3 = vld [vmem:[%s2150_s1 + $0xe8] sm:$0xff]  ;;  %s2158_s12 = smov (!%p202_p4, %s1475_s12), 1 }
   0xd   : > { %1403 = vmatpush.msra.mxu1 %v1286_v0  ;;  %409 = vmatpush.msra.mxu0 %v1286_v0  ;;  %250 = vst [vmem:[#allocation2 + $0xc0] sm:$0xff] %v1485_v2  ;;  %v1302_v4 = vld [vmem:[%s2150_s1 + $0x178] sm:$0xff]  ;;  %v1301_v5 = vld [vmem:[%s2150_s1 + $0x170] sm:$0xff]  ;;  %v1283_v6 = vld [vmem:[%s2150_s1 + $0xe0] sm:$0xff]  ;;  %s1401_s28 = sshll.u32 %s2158_s12, 8  ;;  %s1402_s22 = sshll.u32 %s2158_s12, 6 }
   0xe   : > { %251 = vst [vmem:[#allocation2 + $0xc8] sm:$0xff] %v1485_v2  ;;  %524 = vmatpush.msra.mxu2 %v1302_v4  ;;  %v1300_v7 = vld [vmem:[%s2150_s1 + $0x168] sm:$0xff]  ;;  %s1555_s6 = scalar_lea.vmem %s2149_s0, %s1401_s28  ;;  %v1282_v8 = vld [vmem:[%s2150_s1 + $0xd8] sm:$0xff]  ;;  %v1281_v9 = vld [vmem:[%s2150_s1 + $0xd0] sm:$0xff]  ;;  %s2109_s25 = scalar_lea.vmem %s2152_s3, %s1402_s22 }
   0xf   : > { %1404 = vmatpush.msra.mxu1 %v1285_v1  ;;  %410 = vmatpush.msra.mxu0 %v1285_v1  ;;  %252 = vst [vmem:[#allocation2 + $0xd0] sm:$0x3] %v1485_v2  ;;  %v1299_v10 = vld [vmem:[%s2150_s1 + $0x160] sm:$0xff]  ;;  %v1318_v11 = vld [vmem:[%s2150_s1 + $0x1f8] sm:$0xff]  ;;  %v294_v12 = vld [vmem:[%s1555_s6 + $0x70] sm:$0xff] }
  0x10   : > { %226 = vst [vmem:[#allocation2] sm:$0xff] %v1485_v2  ;;  %525 = vmatpush.msra.mxu2 %v1301_v5  ;;  %v295_v13 = vld [vmem:[%s1555_s6 + $0x78] sm:$0xff]  ;;  %v1317_v15 = vld [vmem:[%s2150_s1 + $0x1f0] sm:$0xff]  ;;  %v1280_v16 = vld [vmem:[%s2150_s1 + $0xc8] sm:$0xff]  ;;  %606 = vmatpush.msra.mxu3 %v1318_v11 }
  0x11   : > { %1405 = vmatpush.msra.mxu1 %v1284_v3  ;;  %411 = vmatpush.msra.mxu0 %v1284_v3  ;;  %227 = vst [vmem:[#allocation2 + $0x8] sm:$0xff] %v1485_v2  ;;  %v1298_v14 = vld [vmem:[%s2150_s1 + $0x158] sm:$0xff]  ;;  %v1297_v17 = vld [vmem:[%s2150_s1 + $0x150] sm:$0xff]  ;;  %v1316_v18 = vld [vmem:[%s2150_s1 + $0x1e8] sm:$0xff] }
  0x12   : > { %228 = vst [vmem:[#allocation2 + $0x10] sm:$0x3] %v1485_v2  ;;  %526 = vmatpush.msra.mxu2 %v1300_v7  ;;  %v1279_v19 = vld [vmem:[%s2150_s1 + $0xc0] sm:$0xff]  ;;  %607 = vmatpush.msra.mxu3 %v1317_v15  ;;  %v1296_v20 = vld [vmem:[%s2150_s1 + $0x148] sm:$0xff]  ;;  %v1278_v22 = vld [vmem:[%s2150_s1 + $0xb8] sm:$0xff] }
  0x13   : > { %1406 = vmatpush.msra.mxu1 %v1283_v6  ;;  %412 = vmatpush.msra.mxu0 %v1283_v6  ;;  %229 = vst [vmem:[#allocation2 + $0x18] sm:$0xff] %v1485_v2  ;;  %v1315_v21 = vld [vmem:[%s2150_s1 + $0x1e0] sm:$0xff]  ;;  %v1314_v24 = vld [vmem:[%s2150_s1 + $0x1d8] sm:$0xff]  ;;  %v1277_v25 = vld [vmem:[%s2150_s1 + $0xb0] sm:$0xff] }
  0x14   : > { %230 = vst [vmem:[#allocation2 + $0x20] sm:$0xff] %v1485_v2  ;;  %527 = vmatpush.msra.mxu2 %v1299_v10  ;;  %608 = vmatpush.msra.mxu3 %v1316_v18  ;;  %v1295_v23 = vld [vmem:[%s2150_s1 + $0x140] sm:$0xff]  ;;  %v1294_v26 = vld [vmem:[%s2150_s1 + $0x138] sm:$0xff]  ;;  %v1276_v27 = vld [vmem:[%s2150_s1 + $0xa8] sm:$0xff] }
  0x15   : > { %1407 = vmatpush.msra.mxu1 %v1282_v8  ;;  %413 = vmatpush.msra.mxu0 %v1282_v8  ;;  %327 = vst [vmem:[#allocation2 + $0xc1] sm:$0xff] %v294_v12  ;;  %v1293_v28 = vld [vmem:[%s2150_s1 + $0x130] sm:$0xff]  ;;  %v1275_v29 = vld [vmem:[%s2150_s1 + $0xa0] sm:$0xff]  ;;  %v1292_v30 = vld [vmem:[%s2150_s1 + $0x128] sm:$0xff] }
  0x16   : > { %328 = vst [vmem:[#allocation2 + $0xc9] sm:$0xff] %v295_v13  ;;  %528 = vmatpush.msra.mxu2 %v1298_v14  ;;  %609 = vmatpush.msra.mxu3 %v1315_v21  ;;  %v1274_v31 = vld [vmem:[%s2150_s1 + $0x98] sm:$0xff]  ;;  %v1291_v32 = vld [vmem:[%s2150_s1 + $0x120] sm:$0xff]  ;;  %v1273_v33 = vld [vmem:[%s2150_s1 + $0x90] sm:$0xff] }
  0x17   : > { %1408 = vmatpush.msra.mxu1 %v1281_v9  ;;  %414 = vmatpush.msra.mxu0 %v1281_v9  ;;  %231 = vst [vmem:[#allocation2 + $0x28] sm:$0x3] %v1485_v2  ;;  %v1272_v34 = vld [vmem:[%s2150_s1 + $0x88] sm:$0xff]  ;;  %v1271_v35 = vld [vmem:[%s2150_s1 + $0x80] sm:$0xff]  ;;  %v375_v38 = vld [vmem:[%s2150_s1 + $0x78] sm:$0xff] }
  0x18   : > { %232 = vst [vmem:[#allocation2 + $0x30] sm:$0xff] %v1485_v2  ;;  %529 = vmatpush.msra.mxu2 %v1297_v17  ;;  %610 = vmatpush.msra.mxu3 %v1314_v24  ;;  %v377_v37 = vld [vmem:[#allocation2 + $0x1] ss:$2 sm:$0xff]  ;;  %v1334_v39 = vld [vmem:[%s2150_s1 + $0x278] sm:$0xff]  ;;  %v374_v40 = vld [vmem:[%s2150_s1 + $0x70] sm:$0xff] }
  0x19   : > { %1409 = vmatpush.msra.mxu1 %v1280_v16  ;;  %415 = vmatpush.msra.mxu0 %v1280_v16  ;;  %233 = vst [vmem:[#allocation2 + $0x38] sm:$0xff] %v1485_v2  ;;  %v373_v41 = vld [vmem:[%s2150_s1 + $0x68] sm:$0xff]  ;;  %v1290_v42 = vld [vmem:[%s2150_s1 + $0x118] sm:$0xff]  ;;  %v1313_v43 = vld [vmem:[%s2150_s1 + $0x1d0] sm:$0xff] }
  0x1a   : > { %234 = vst [vmem:[#allocation2 + $0x40] sm:$0x3] %v1485_v2  ;;  %530 = vmatpush.msra.mxu2 %v1296_v20  ;;  %v1333_v44 = vld [vmem:[%s2150_s1 + $0x270] sm:$0xff]  ;;  %v372_v46 = vld [vmem:[%s2150_s1 + $0x60] sm:$0xff]  ;;  %611 = vmatpush.msra.mxu3 %v1313_v43  ;;  %v1312_v47 = vld [vmem:[%s2150_s1 + $0x1c8] sm:$0xff] }
  0x1b   : > { %1410 = vmatpush.msra.mxu1 %v1279_v19  ;;  %416 = vmatpush.msra.mxu0 %v1279_v19  ;;  %235 = vst [vmem:[#allocation2 + $0x48] sm:$0xff] %v1485_v2  ;;  %v1289_v45 = vld [vmem:[%s2150_s1 + $0x110] sm:$0xff]  ;;  %v1332_v48 = vld [vmem:[%s2150_s1 + $0x268] sm:$0xff]  ;;  %v1311_v50 = vld [vmem:[%s2150_s1 + $0x1c0] sm:$0xff] }
  0x1c   : > { %236 = vst [vmem:[#allocation2 + $0x50] sm:$0xff] %v1485_v2  ;;  %531 = vmatpush.msra.mxu2 %v1295_v23  ;;  %v1288_v49 = vld [vmem:[%s2150_s1 + $0x108] sm:$0xff]  ;;  %v1331_v51 = vld [vmem:[%s2150_s1 + $0x260] sm:$0xff]  ;;  %v371_v52 = vld [vmem:[%s2150_s1 + $0x58] sm:$0xff]  ;;  %612 = vmatpush.msra.mxu3 %v1312_v47 }
  0x1d   : > { %1411 = vmatpush.msra.mxu1 %v1278_v22  ;;  %417 = vmatpush.msra.mxu0 %v1278_v22  ;;  %237 = vst [vmem:[#allocation2 + $0x58] sm:$0x3] %v1485_v2  ;;  %v385_v36 = vld [vmem:[#allocation2 + $0xc1] ss:$2 sm:$0xff]  ;;  %v1310_v54 = vld [vmem:[%s2150_s1 + $0x1b8] sm:$0xff]  ;;  %v370_v56 = vld [vmem:[%s2150_s1 + $0x50] sm:$0xff] }
  0x1e   : > { %238 = vst [vmem:[#allocation2 + $0x60] sm:$0xff] %v1485_v2  ;;  %532 = vmatpush.msra.mxu2 %v1294_v26  ;;  %v1287_v53 = vld [vmem:[%s2150_s1 + $0x100] sm:$0xff]  ;;  %v1330_v55 = vld [vmem:[%s2150_s1 + $0x258] sm:$0xff]  ;;  %613 = vmatpush.msra.mxu3 %v1311_v50  ;;  %v369_v58 = vld [vmem:[%s2150_s1 + $0x48] sm:$0xff] }
  0x1f   : > { %1412 = vmatpush.msra.mxu1 %v1277_v25  ;;  %418 = vmatpush.msra.mxu0 %v1277_v25  ;;  %239 = vst [vmem:[#allocation2 + $0x68] sm:$0xff] %v1485_v2  ;;  %v492_v57 = vld [vmem:[#allocation2 + $0x2] ss:$2 sm:$0xff]  ;;  %v1366_v59 = vld [vmem:[%s2150_s1 + $0x378] sm:$0xff] }
  0x20   : > { %240 = vst [vmem:[#allocation2 + $0x70] sm:$0x3] %v1485_v2  ;;  %533 = vmatpush.msra.mxu2 %v1293_v28  ;;  %614 = vmatpush.msra.mxu3 %v1310_v54  ;;  %v1309_v60 = vld [vmem:[%s2150_s1 + $0x1b0] sm:$0xff]  ;;  %v1308_v62 = vld [vmem:[%s2150_s1 + $0x1a8] sm:$0xff]  ;;  %v368_v63 = vld [vmem:[%s2150_s1 + $0x40] sm:$0xff] }
  0x21   : > { %1413 = vmatpush.msra.mxu1 %v1276_v27  ;;  %419 = vmatpush.msra.mxu0 %v1276_v27  ;;  %241 = vst [vmem:[#allocation2 + $0x78] sm:$0xff] %v1485_v2  ;;  %v1329_v61 = vld [vmem:[%s2150_s1 + $0x250] sm:$0xff]  ;;  %v1328_v0 = vld [vmem:[%s2150_s1 + $0x248] sm:$0xff]  ;;  %v1307_v3 = vld [vmem:[%s2150_s1 + $0x1a0] sm:$0xff] }
  0x22   : > { %242 = vst [vmem:[#allocation2 + $0x80] sm:$0xff] %v1485_v2  ;;  %534 = vmatpush.msra.mxu2 %v1292_v30  ;;  %615 = vmatpush.msra.mxu3 %v1309_v60  ;;  %v1365_v1 = vld [vmem:[%s2150_s1 + $0x370] sm:$0xff]  ;;  %v367_v4 = vld [vmem:[%s2150_s1 + $0x38] sm:$0xff]  ;;  %v1327_v5 = vld [vmem:[%s2150_s1 + $0x240] sm:$0xff] }
  0x23   : > { %1414 = vmatpush.msra.mxu1 %v1275_v29  ;;  %420 = vmatpush.msra.mxu0 %v1275_v29  ;;  %243 = vst [vmem:[#allocation2 + $0x88] sm:$0x3] %v1485_v2  ;;  %v1306_v6 = vld [vmem:[%s2150_s1 + $0x198] sm:$0xff]  ;;  %v366_v7 = vld [vmem:[%s2150_s1 + $0x30] sm:$0xff]  ;;  %v365_v9 = vld [vmem:[%s2150_s1 + $0x28] sm:$0xff] }
  0x24   : > { %244 = vst [vmem:[#allocation2 + $0x90] sm:$0xff] %v1485_v2  ;;  %535 = vmatpush.msra.mxu2 %v1291_v32  ;;  %616 = vmatpush.msra.mxu3 %v1308_v62  ;;  %v1326_v8 = vld [vmem:[%s2150_s1 + $0x238] sm:$0xff]  ;;  %v1364_v10 = vld [vmem:[%s2150_s1 + $0x368] sm:$0xff]  ;;  %v1305_v11 = vld [vmem:[%s2150_s1 + $0x190] sm:$0xff] }
  0x25   : > { %1415 = vmatpush.msra.mxu1 %v1274_v31  ;;  %421 = vmatpush.msra.mxu0 %v1274_v31  ;;  %245 = vst [vmem:[#allocation2 + $0x98] sm:$0xff] %v1485_v2  ;;  %v1325_v12 = vld [vmem:[%s2150_s1 + $0x230] sm:$0xff]  ;;  %v1304_v13 = vld [vmem:[%s2150_s1 + $0x188] sm:$0xff]  ;;  %v364_v14 = vld [vmem:[%s2150_s1 + $0x20] sm:$0xff] }
  0x26   : > { %246 = vst [vmem:[#allocation2 + $0xa0] sm:$0x3] %v1485_v2  ;;  %536 = vmatpush.msra.mxu2 %v1290_v42  ;;  %617 = vmatpush.msra.mxu3 %v1307_v3  ;;  %v1324_v15 = vld [vmem:[%s2150_s1 + $0x228] sm:$0xff]  ;;  %v1363_v16 = vld [vmem:[%s2150_s1 + $0x360] sm:$0xff]  ;;  %v298_v18 = vld [vmem:[%s1555_s6 + $0x90] sm:$0xff] }
  0x27   : > { %1416 = vmatpush.msra.mxu1 %v1273_v33  ;;  %247 = vst [vmem:[#allocation2 + $0xa8] sm:$0xff] %v1485_v2  ;;  %422 = vmatpush.msra.mxu0 %v1273_v33  ;;  %v1303_v17 = vld [vmem:[%s2150_s1 + $0x180] sm:$0xff]  ;;  %v363_v19 = vld [vmem:[%s2150_s1 + $0x18] sm:$0xff]  ;;  %v282_v22 = vld [vmem:[%s1555_s6 + $0x10] sm:$0xff] }
  0x28   : > { %248 = vst [vmem:[#allocation2 + $0xb0] sm:$0xff] %v1485_v2  ;;  %537 = vmatpush.msra.mxu2 %v1289_v45  ;;  %618 = vmatpush.msra.mxu3 %v1306_v6  ;;  %v299_v20 = vld [vmem:[%s1555_s6 + $0x98] sm:$0xff]  ;;  %v362_v23 = vld [vmem:[%s2150_s1 + $0x10] sm:$0xff]  ;;  %v361_v28 = vld [vmem:[%s2150_s1 + $0x8] sm:$0xff] }
  0x29   : > { %1417 = vmatpush.msra.mxu1 %v1272_v34  ;;  %249 = vst [vmem:[#allocation2 + $0xb8] sm:$0x3] %v1485_v2  ;;  %423 = vmatpush.msra.mxu0 %v1272_v34  ;;  %v1382_v21 = vld [vmem:[%s2150_s1 + $0x3f8] sm:$0xff]  ;;  %v302_v26 = vld [vmem:[%s1555_s6 + $0xb0] sm:$0xff]  ;;  %v360_v32 = vld [vmem:[%s2150_s1] sm:$0xff] }
  0x2a   : > { %253 = vst [vmem:[#allocation2 + $0xd8] sm:$0xff] %v1485_v2  ;;  %538 = vmatpush.msra.mxu2 %v1288_v49  ;;  %619 = vmatpush.msra.mxu3 %v1305_v11  ;;  %v1322_v24 = vld [vmem:[%s2150_s1 + $0x218] sm:$0xff]  ;;  %v1321_v30 = vld [vmem:[%s2150_s1 + $0x210] sm:$0xff]  ;;  %v1320_v34 = vld [vmem:[%s2150_s1 + $0x208] sm:$0xff] }
  0x2b   : > { %1418 = vmatpush.msra.mxu1 %v1271_v35  ;;  %254 = vst [vmem:[#allocation2 + $0xe0] sm:$0xff] %v1485_v2  ;;  %424 = vmatpush.msra.mxu0 %v1271_v35  ;;  %v283_v25 = vld [vmem:[%s1555_s6 + $0x18] sm:$0xff]  ;;  %v286_v31 = vld [vmem:[%s1555_s6 + $0x30] sm:$0xff]  ;;  %v281_v47 = vld [vmem:[%s1555_s6 + $0x8] sm:$0xff] }
  0x2c   : > { %437 = vmatmul.f32.vlgmr.msra.gmra.mxu1 %v385_v36  ;;  %255 = vst [vmem:[#allocation2 + $0xe8] sm:$0x3] %v1485_v2  ;;  %425 = vmatmul.f32.vlgmr.msra.gmra.mxu0 %v377_v37  ;;  %v303_v27 = vld [vmem:[%s1555_s6 + $0xb8] sm:$0xff]  ;;  %v1381_v33 = vld [vmem:[%s2150_s1 + $0x3f0] sm:$0xff]  ;;  %v1380_v36 = vld [vmem:[%s2150_s1 + $0x3e8] sm:$0xff] }
  0x2d   : > { %256 = vst [vmem:[#allocation2 + $0xf0] sm:$0xff] %v1485_v2  ;;  %450 = vmatpush.msrb.mxu1 %v375_v38  ;;  %688 = vmatpush.msrb.mxu0 %v1334_v39  ;;  %v1362_v29 = vld [vmem:[%s2150_s1 + $0x358] sm:$0xff]  ;;  %v1361_v35 = vld [vmem:[%s2150_s1 + $0x350] sm:$0xff]  ;;  %v1360_v49 = vld [vmem:[%s2150_s1 + $0x348] sm:$0xff] }
  0x2e   : > { %257 = vst [vmem:[#allocation2 + $0xf8] sm:$0xff] %v1485_v2  ;;  %539 = vmatpush.msra.mxu2 %v1287_v53  ;;  %620 = vmatpush.msra.mxu3 %v1304_v13  ;;  %v287_v37 = vld [vmem:[%s1555_s6 + $0x38] sm:$0xff]  ;;  %v306_v39 = vld [vmem:[%s1555_s6 + $0xd0] sm:$0xff]  ;;  %v1379_v50 = vld [vmem:[%s2150_s1 + $0x3e0] sm:$0xff] }
  0x2f   : > { %258 = vst [vmem:[#allocation2 + $0x100] sm:$0x3] %v1485_v2  ;;  %451 = vmatpush.msrb.mxu1 %v374_v40  ;;  %689 = vmatpush.msrb.mxu0 %v1333_v44  ;;  %v1350_v38 = vld [vmem:[%s2150_s1 + $0x2f8] sm:$0xff]  ;;  %v1319_v40 = vld [vmem:[%s2150_s1 + $0x200] sm:$0xff]  ;;  %v290_v42 = vld [vmem:[%s1555_s6 + $0x50] sm:$0xff] }
  0x30   : > { %259 = vst [vmem:[#allocation2 + $0x108] sm:$0xff] %v1485_v2  ;;  %540 = vmatmul.f32.vlgmr.msra.gmra.mxu2 %v492_v57  ;;  %621 = vmatpush.msra.mxu3 %v1303_v17  ;;  %v291_v43 = vld [vmem:[%s1555_s6 + $0x58] sm:$0xff]  ;;  %v1349_v44 = vld [vmem:[%s2150_s1 + $0x2f0] sm:$0xff]  ;;  %v284_v53 = vld [vmem:[%s1555_s6 + $0x20] sm:$0xff] }
  0x31   : > { %260 = vst [vmem:[#allocation2 + $0x110] sm:$0xff] %v1485_v2  ;;  %452 = vmatpush.msrb.mxu1 %v373_v41  ;;  %690 = vmatpush.msrb.mxu0 %v1332_v48  ;;  %v307_v41 = vld [vmem:[%s1555_s6 + $0xd8] sm:$0xff]  ;;  %v1348_v48 = vld [vmem:[%s2150_s1 + $0x2e8] sm:$0xff]  ;;  %v1347_v54 = vld [vmem:[%s2150_s1 + $0x2e0] sm:$0xff] }
  0x32   : > { %261 = vst [vmem:[#allocation2 + $0x118] sm:$0x3] %v1485_v2  ;;  %852 = vmatpush.msrb.mxu2 %v1366_v59  ;;  %934 = vmatpush.msrb.mxu3 %v1382_v21  ;;  %v285_v57 = vld [vmem:[%s1555_s6 + $0x28] sm:$0xff]  ;;  %v1358_v3 = vld [vmem:[%s2150_s1 + $0x338] sm:$0xff]  ;;  %v1357_v6 = vld [vmem:[%s2150_s1 + $0x330] sm:$0xff] }
  0x33   : > { %262 = vst [vmem:[#allocation2 + $0x120] sm:$0xff] %v1485_v2  ;;  %453 = vmatpush.msrb.mxu1 %v372_v46  ;;  %691 = vmatpush.msrb.mxu0 %v1331_v51  ;;  %v280_v46 = vld [vmem:[%s1555_s6] sm:$0xff]  ;;  %v289_v60 = vld [vmem:[%s1555_s6 + $0x48] sm:$0xff]  ;;  %v1374_v21 = vld [vmem:[%s2150_s1 + $0x3b8] sm:$0xff] }
  0x34   : > { %263 = vst [vmem:[#allocation2 + $0x128] sm:$0xff] %v1485_v2  ;;  %853 = vmatpush.msrb.mxu2 %v1365_v1  ;;  %935 = vmatpush.msrb.mxu3 %v1381_v33  ;;  %v1346_v1 = vld [vmem:[%s2150_s1 + $0x2d8] sm:$0xff]  ;;  %v296_v11 = vld [vmem:[%s1555_s6 + $0x80] sm:$0xff]  ;;  %v1341_v33 = vld [vmem:[%s2150_s1 + $0x2b0] sm:$0xff] }
  0x35   : > { %264 = vst [vmem:[#allocation2 + $0x130] sm:$0x3] %v1485_v2  ;;  %454 = vmatpush.msrb.mxu1 %v371_v52  ;;  %692 = vmatpush.msrb.mxu0 %v1330_v55  ;;  %v1359_v55 = vld [vmem:[%s2150_s1 + $0x340] sm:$0xff] }
  0x36   : > { %265 = vst [vmem:[#allocation2 + $0x138] sm:$0xff] %v1485_v2  ;;  %854 = vmatpush.msrb.mxu2 %v1364_v10  ;;  %936 = vmatpush.msrb.mxu3 %v1380_v36  ;;  %v1375_v17 = vld [vmem:[%s2150_s1 + $0x3c0] sm:$0xff]  ;;  %v1981_v36 = vld [vmem:[%s2150_s1 + $0x458] sm:$0xff] }
  0x37   : > { %266 = vst [vmem:[#allocation2 + $0x140] sm:$0xff] %v1485_v2  ;;  %455 = vmatpush.msrb.mxu1 %v370_v56  ;;  %693 = vmatpush.msrb.mxu0 %v1329_v61  ;;  %v1378_v56 = vld [vmem:[%s2150_s1 + $0x3d8] sm:$0xff]  ;;  %v292_v61 = vld [vmem:[%s1555_s6 + $0x60] sm:$0xff] }
  0x38   : > { %267 = vst [vmem:[#allocation2 + $0x148] sm:$0x3] %v1485_v2  ;;  %855 = vmatpush.msrb.mxu2 %v1363_v16  ;;  %937 = vmatpush.msrb.mxu3 %v1379_v50  ;;  %v1356_v16 = vld [vmem:[%s2150_s1 + $0x328] sm:$0xff] }
  0x39   : > { %268 = vst [vmem:[#allocation2 + $0x150] sm:$0xff] %v1485_v2  ;;  %456 = vmatpush.msrb.mxu1 %v369_v58  ;;  %694 = vmatpush.msrb.mxu0 %v1328_v0  ;;  %v288_v58 = vld [vmem:[%s1555_s6 + $0x40] sm:$0xff]  ;;  %v293_v0 = vld [vmem:[%s1555_s6 + $0x68] sm:$0xff] }
  0x3a   : > { %269 = vst [vmem:[#allocation2 + $0x158] sm:$0xff] %v1485_v2  ;;  %856 = vmatpush.msrb.mxu2 %v1362_v29  ;;  %938 = vmatpush.msrb.mxu3 %v1378_v56  ;;  %v1354_v29 = vld [vmem:[%s2150_s1 + $0x318] sm:$0xff]  ;;  %v1392_v50 = vld [vmem:[%s2150_s1 + $0x448] sm:$0xff] }
  0x3b   : > { %270 = vst [vmem:[#allocation2 + $0x160] sm:$0x3] %v1485_v2  ;;  %457 = vmatpush.msrb.mxu1 %v368_v63  ;;  %695 = vmatpush.msrb.mxu0 %v1327_v5  ;;  %v1345_v5 = vld [vmem:[%s2150_s1 + $0x2d0] sm:$0xff]  ;;  %v1338_v56 = vld [vmem:[%s2150_s1 + $0x298] sm:$0xff] }
  0x3c   : > { %271 = vst [vmem:[#allocation2 + $0x168] sm:$0xff] %v1485_v2  ;;  %857 = vmatpush.msrb.mxu2 %v1361_v35  ;;  %v1372_v35 = vld [vmem:[%s2150_s1 + $0x3a8] sm:$0xff] }
  0x3d   : > { %272 = vst [vmem:[#allocation2 + $0x170] sm:$0xff] %v1485_v2  ;;  %458 = vmatpush.msrb.mxu1 %v367_v4  ;;  %696 = vmatpush.msrb.mxu0 %v1326_v8  ;;  %v1377_v4 = vld [vmem:[%s2150_s1 + $0x3d0] sm:$0xff]  ;;  %v1917_v8 = vld [vmem:[%s2150_s1 + $0x478] sm:$0xff] }
  0x3e   : > { %273 = vst [vmem:[#allocation2 + $0x178] sm:$0x3] %v1485_v2  ;;  %858 = vmatpush.msrb.mxu2 %v1360_v49  ;;  %939 = vmatpush.msrb.mxu3 %v1377_v4  ;;  %v1370_v49 = vld [vmem:[%s2150_s1 + $0x398] sm:$0xff]  ;;  %v1389_v4 = vld [vmem:[%s2150_s1 + $0x430] sm:$0xff] }
  0x3f   : > { %274 = vst [vmem:[#allocation2 + $0x180] sm:$0xff] %v1485_v2  ;;  %459 = vmatpush.msrb.mxu1 %v366_v7  ;;  %697 = vmatpush.msrb.mxu0 %v1325_v12  ;;  %v1376_v7 = vld [vmem:[%s2150_s1 + $0x3c8] sm:$0xff] }
  0x40   : > { %275 = vst [vmem:[#allocation2 + $0x188] sm:$0xff] %v1485_v2  ;;  %859 = vmatpush.msrb.mxu2 %v1359_v55  ;;  %940 = vmatpush.msrb.mxu3 %v1376_v7  ;;  %v297_v12 = vld [vmem:[%s1555_s6 + $0x88] sm:$0xff] }
  0x41   : > { %276 = vst [vmem:[#allocation2 + $0x190] sm:$0x3] %v1485_v2  ;;  %460 = vmatpush.msrb.mxu1 %v365_v9  ;;  %v1323_v2 = vld [vmem:[%s2150_s1 + $0x220] sm:$0xff]  ;;  %698 = vmatpush.msrb.mxu0 %v1324_v15  ;;  %v1344_v15 = vld [vmem:[%s2150_s1 + $0x2c8] sm:$0xff] }
  0x42   : > { %331 = vst [vmem:[#allocation2 + $0xf1] sm:$0xff] %v298_v18  ;;  %860 = vmatpush.msrb.mxu2 %v1358_v3  ;;  %941 = vmatpush.msrb.mxu3 %v1375_v17  ;;  %v1336_v3 = vld [vmem:[%s2150_s1 + $0x288] sm:$0xff]  ;;  %v1383_v17 = vld [vmem:[%s2150_s1 + $0x400] sm:$0xff] }
  0x43   : > { %461 = vmatpush.msrb.mxu1 %v364_v14  ;;  %699 = vmatpush.msrb.mxu0 %v1323_v2  ;;  %332 = vst [vmem:[#allocation2 + $0xf9] sm:$0xff] %v299_v20  ;;  %v1343_v2 = vld [vmem:[%s2150_s1 + $0x2c0] sm:$0xff]  ;;  %v1388_v7 = vld [vmem:[%s2150_s1 + $0x428] sm:$0xff] }
  0x44   : > { %315 = vst [vmem:[#allocation2 + $0x31] sm:$0xff] %v282_v22  ;;  %861 = vmatpush.msrb.mxu2 %v1357_v6  ;;  %v1355_v20 = vld [vmem:[%s2150_s1 + $0x320] sm:$0xff]  ;;  %v1949_v22 = vld [vmem:[%s2150_s1 + $0x468] sm:$0xff]  ;;  %942 = vmatpush.msrb.mxu3 %v1374_v21 }
  0x45   : > { %462 = vmatpush.msrb.mxu1 %v363_v19  ;;  %700 = vmatpush.msrb.mxu0 %v1322_v24  ;;  %316 = vst [vmem:[#allocation2 + $0x39] sm:$0xff] %v283_v25  ;;  %v1934_v19 = vld [vmem:[%s2150_s1 + $0x470] sm:$0xff]  ;;  %v300_v24 = vld [vmem:[%s1555_s6 + $0xa0] sm:$0xff]  ;;  %v301_v25 = vld [vmem:[%s1555_s6 + $0xa8] sm:$0xff] }
  0x46   : > { %335 = vst [vmem:[#allocation2 + $0x121] sm:$0xff] %v302_v26  ;;  %862 = vmatpush.msrb.mxu2 %v1356_v16 }
  0x47   : > { %463 = vmatpush.msrb.mxu1 %v362_v23  ;;  %701 = vmatpush.msrb.mxu0 %v1321_v30  ;;  %336 = vst [vmem:[#allocation2 + $0x129] sm:$0xff] %v303_v27  ;;  %v345_v23 = vld [vmem:[#allocation2] ss:$2 sm:$0xff]  ;;  %v1373_v30 = vld [vmem:[%s2150_s1 + $0x3b0] sm:$0xff] }
  0x48   : > { %319 = vst [vmem:[#allocation2 + $0x61] sm:$0xff] %v286_v31  ;;  %863 = vmatpush.msrb.mxu2 %v1355_v20  ;;  %v500_v27 = vld [vmem:[#allocation2 + $0xc2] ss:$2 sm:$0xff]  ;;  %943 = vmatpush.msrb.mxu3 %v1373_v30 }
  0x49   : > { %464 = vmatpush.msrb.mxu1 %v361_v28  ;;  %702 = vmatpush.msrb.mxu0 %v1320_v34  ;;  %320 = vst [vmem:[#allocation2 + $0x69] sm:$0xff] %v287_v37  ;;  %v1342_v28 = vld [vmem:[%s2150_s1 + $0x2b8] sm:$0xff]  ;;  %v1353_v34 = vld [vmem:[%s2150_s1 + $0x310] sm:$0xff] }
  0x4a   : > { %v387_v45 = vld [vmem:[#allocation2 + $0xf1] ss:$2 sm:$0xff]  ;;  %339 = vst [vmem:[#allocation2 + $0x151] sm:$0xff] %v306_v39  ;;  %864 = vmatpush.msrb.mxu2 %v1354_v29  ;;  %944 = vmatpush.msrb.mxu3 %v1372_v35  ;;  %v305_v39 = vld [vmem:[%s1555_s6 + $0xc8] sm:$0xff] }
  0x4b   : > { %465 = vmatpush.msrb.mxu1 %v360_v32  ;;  %703 = vmatpush.msrb.mxu0 %v1319_v40  ;;  %340 = vst [vmem:[#allocation2 + $0x159] sm:$0xff] %v307_v41  ;;  %v1966_v32 = vld [vmem:[%s2150_s1 + $0x460] sm:$0xff] }
  0x4c   : > { %440 = vmatmul.f32.gmra.mxu1 %v387_v45  ;;  %v379_v51 = vld [vmem:[#allocation2 + $0x31] ss:$2 sm:$0xff]  ;;  %v494_v52 = vld [vmem:[#allocation2 + $0x32] ss:$2 sm:$0xff]  ;;  %323 = vst [vmem:[#allocation2 + $0x91] sm:$0xff] %v290_v42  ;;  %865 = vmatpush.msrb.mxu2 %v1353_v34  ;;  %v1340_v42 = vld [vmem:[%s2150_s1 + $0x2a8] sm:$0xff] }
  0x4d   : > { %770 = vmatpush.msra.mxu1 %v1350_v38  ;;  %428 = vmatmul.f32.gmra.mxu0 %v379_v51  ;;  %324 = vst [vmem:[#allocation2 + $0x99] sm:$0xff] %v291_v43  ;;  %v347_v37 = vld [vmem:[#allocation2 + $0x30] ss:$2 sm:$0xff]  ;;  %v304_v38 = vld [vmem:[%s1555_s6 + $0xc0] sm:$0xff]  ;;  %v1352_v43 = vld [vmem:[%s2150_s1 + $0x308] sm:$0xff] }
  0x4e   : > { %543 = vmatmul.f32.gmra.mxu2 %v494_v52  ;;  %313 = vst [vmem:[#allocation2 + $0x19] sm:$0xff] %v280_v46  ;;  %v389_v59 = vld [vmem:[#allocation2 + $0x121] ss:$2 sm:$0xff]  ;;  %1016 = vmatpush.msra.mxu0 %v1917_v8  ;;  %v502_v41 = vld [vmem:[#allocation2 + $0xf2] ss:$2 sm:$0xff] }
  0x4f   : > { %771 = vmatpush.msra.mxu1 %v1349_v44  ;;  %314 = vst [vmem:[#allocation2 + $0x21] sm:$0xff] %v281_v47  ;;  %v1371_v44 = vld [vmem:[%s2150_s1 + $0x3a0] sm:$0xff]  ;;  %866 = vmatpush.msrb.mxu2 %v1352_v43  ;;  %v1998_v46 = vld [vmem:[%s2150_s1 + $0x450] sm:$0xff] }
  0x50   : > { %317 = vst [vmem:[#allocation2 + $0x49] sm:$0xff] %v284_v53  ;;  %v381_v62 = vld [vmem:[#allocation2 + $0x61] ss:$2 sm:$0xff]  ;;  %v496_v63 = vld [vmem:[#allocation2 + $0x62] ss:$2 sm:$0xff]  ;;  %1017 = vmatpush.msra.mxu0 %v1934_v19  ;;  %945 = vmatpush.msrb.mxu3 %v1371_v44 }
  0x51   : > { %772 = vmatpush.msra.mxu1 %v1348_v48  ;;  %318 = vst [vmem:[#allocation2 + $0x51] sm:$0xff] %v285_v57  ;;  %v1339_v47 = vld [vmem:[%s2150_s1 + $0x2a0] sm:$0xff]  ;;  %v309_v53 = vld [vmem:[%s1555_s6 + $0xe8] sm:$0xff]  ;;  %v1369_v57 = vld [vmem:[%s2150_s1 + $0x390] sm:$0xff] }
  0x52   : > { %321 = vst [vmem:[#allocation2 + $0x79] sm:$0xff] %v288_v58  ;;  %v391_v10 = vld [vmem:[#allocation2 + $0x151] ss:$2 sm:$0xff]  ;;  %1018 = vmatpush.msra.mxu0 %v1949_v22  ;;  %v1351_v48 = vld [vmem:[%s2150_s1 + $0x300] sm:$0xff]  ;;  %946 = vmatpush.msrb.mxu3 %v1370_v49 }
  0x53   : > { %773 = vmatpush.msra.mxu1 %v1347_v54  ;;  %322 = vst [vmem:[#allocation2 + $0x81] sm:$0xff] %v289_v60  ;;  %v349_v51 = vld [vmem:[#allocation2 + $0x60] ss:$2 sm:$0xff]  ;;  %867 = vmatpush.msrb.mxu2 %v1351_v48  ;;  %v1337_v60 = vld [vmem:[%s2150_s1 + $0x290] sm:$0xff] }
  0x54   : > { %443 = vmatmul.f32.gmra.mxu1 %v389_v59  ;;  %325 = vst [vmem:[#allocation2 + $0xa9] sm:$0xff] %v292_v61  ;;  %v383_v13 = vld [vmem:[#allocation2 + $0x91] ss:$2 sm:$0xff]  ;;  %v498_v14 = vld [vmem:[#allocation2 + $0x92] ss:$2 sm:$0xff]  ;;  %1019 = vmatpush.msra.mxu0 %v1966_v32  ;;  %v1368_v61 = vld [vmem:[%s2150_s1 + $0x388] sm:$0xff] }
  0x55   : > { %774 = vmatpush.msra.mxu1 %v1346_v1  ;;  %431 = vmatmul.f32.gmra.mxu0 %v381_v62  ;;  %326 = vst [vmem:[#allocation2 + $0xb1] sm:$0xff] %v293_v0  ;;  %v308_v52 = vld [vmem:[%s1555_s6 + $0xe0] sm:$0xff]  ;;  %v1390_v62 = vld [vmem:[%s2150_s1 + $0x438] sm:$0xff] }
  0x56   : > { %546 = vmatmul.f32.gmra.mxu2 %v496_v63  ;;  %v574_v9 = vld [vmem:[#allocation2 + $0x18] ss:$2 sm:$0xff]  ;;  %329 = vst [vmem:[#allocation2 + $0xd9] sm:$0xff] %v296_v11  ;;  %v656_v26 = vld [vmem:[#allocation2 + $0x19] ss:$2 sm:$0xff]  ;;  %1020 = vmatpush.msra.mxu0 %v1981_v36 }
  0x57   : > { %775 = vmatpush.msra.mxu1 %v1345_v5  ;;  %622 = vmatmul.f32.vlgmr.msra.gmra.mxu3 %v574_v9  ;;  %330 = vst [vmem:[#allocation2 + $0xe1] sm:$0xff] %v297_v12  ;;  %v504_v55 = vld [vmem:[#allocation2 + $0x122] ss:$2 sm:$0xff]  ;;  %v506_v1 = vld [vmem:[#allocation2 + $0x152] ss:$2 sm:$0xff] }
  0x58   : > { %v576_v18 = vld [vmem:[#allocation2 + $0x48] ss:$2 sm:$0xff]  ;;  %333 = vst [vmem:[#allocation2 + $0x109] sm:$0xff] %v300_v24  ;;  %v658_v40 = vld [vmem:[#allocation2 + $0x49] ss:$2 sm:$0xff]  ;;  %1021 = vmatpush.msra.mxu0 %v1998_v46  ;;  %1419 = vmatpush.msra.mxu2 %v1917_v8  ;;  %v1391_v58 = vld [vmem:[%s2150_s1 + $0x440] sm:$0xff] }
  0x59   : > { %776 = vmatpush.msra.mxu1 %v1344_v15  ;;  %334 = vst [vmem:[#allocation2 + $0x111] sm:$0xff] %v301_v25  ;;  %947 = vmatpush.msrb.mxu3 %v1369_v57  ;;  %v351_v63 = vld [vmem:[#allocation2 + $0x90] ss:$2 sm:$0xff]  ;;  %v1367_v5 = vld [vmem:[%s2150_s1 + $0x380] sm:$0xff]  ;;  %v1384_v15 = vld [vmem:[%s2150_s1 + $0x408] sm:$0xff] }
  0x5a   : > { %v578_v31 = vld [vmem:[#allocation2 + $0x78] ss:$2 sm:$0xff]  ;;  %337 = vst [vmem:[#allocation2 + $0x139] sm:$0xff] %v304_v38  ;;  %1022 = vmatpush.msra.mxu0 %v1392_v50  ;;  %v660_v54 = vld [vmem:[#allocation2 + $0x79] ss:$2 sm:$0xff]  ;;  %1420 = vmatpush.msra.mxu2 %v1934_v19 }
  0x5b   : > { %777 = vmatpush.msra.mxu1 %v1343_v2  ;;  %338 = vst [vmem:[#allocation2 + $0x141] sm:$0xff] %v305_v39  ;;  %948 = vmatpush.msrb.mxu3 %v1368_v61  ;;  %v1335_v8 = vld [vmem:[%s2150_s1 + $0x280] sm:$0xff]  ;;  %v902_v24 = vld [vmem:[#allocation2 + $0x31] ss:$2 sm:$0xff]  ;;  %v359_v25 = vld [vmem:[#allocation2 + $0x150] ss:$2 sm:$0xff] }
  0x5c   : > { %446 = vmatmul.f32.gmra.mxu1 %v391_v10  ;;  %v580_v45 = vld [vmem:[#allocation2 + $0xa8] ss:$2 sm:$0xff]  ;;  %341 = vst [vmem:[#allocation2 + $0x169] sm:$0xff] %v308_v52  ;;  %1023 = vmatpush.msra.mxu0 %v1391_v58  ;;  %v662_v0 = vld [vmem:[#allocation2 + $0xa9] ss:$2 sm:$0xff]  ;;  %v1387_v9 = vld [vmem:[%s2150_s1 + $0x420] sm:$0xff] }
  0x5d   : > { %434 = vmatmul.f32.gmra.mxu0 %v383_v13  ;;  %778 = vmatpush.msra.mxu1 %v1342_v28  ;;  %342 = vst [vmem:[#allocation2 + $0x171] sm:$0xff] %v309_v53  ;;  %v1386_v10 = vld [vmem:[%s2150_s1 + $0x418] sm:$0xff]  ;;  %v353_v11 = vld [vmem:[#allocation2 + $0xc0] ss:$2 sm:$0xff]  ;;  %v904_v28 = vld [vmem:[#allocation2 + $0x61] ss:$2 sm:$0xff] }
  0x5e   : > { %549 = vmatmul.f32.gmra.mxu2 %v498_v14  ;;  %v582_v59 = vld [vmem:[#allocation2 + $0xd8] ss:$2 sm:$0xff]  ;;  %1024 = vmatpush.msra.mxu0 %v1390_v62  ;;  %v664_v12 = vld [vmem:[#allocation2 + $0xd9] ss:$2 sm:$0xff]  ;;  %v1385_v14 = vld [vmem:[%s2150_s1 + $0x410] sm:$0xff] }
  0x5f   : > { %625 = vmatmul.f32.gmra.mxu3 %v576_v18  ;;  %779 = vmatpush.msra.mxu1 %v1341_v33  ;;  %v820_v13 = vld [vmem:[#allocation2 + $0x30] ss:$2 sm:$0xff]  ;;  %v822_v2 = vld [vmem:[#allocation2 + $0x60] ss:$2 sm:$0xff]  ;;  %v906_v34 = vld [vmem:[#allocation2 + $0x91] ss:$2 sm:$0xff] }
  0x60   : > { %1421 = vmatpush.msra.mxu2 %v1949_v22  ;;  %v584_v6 = vld [vmem:[#allocation2 + $0x108] ss:$2 sm:$0xff]  ;;  %1025 = vmatpush.msra.mxu0 %v1389_v4  ;;  %v666_v19 = vld [vmem:[#allocation2 + $0x109] ss:$2 sm:$0xff]  ;;  %v311_v33 = vld [vmem:[%s1555_s6 + $0xf8] sm:$0xff] }
  0x61   : > { %780 = vmatpush.msra.mxu1 %v1340_v42  ;;  %949 = vmatpush.msrb.mxu3 %v1367_v5  ;;  %v355_v18 = vld [vmem:[#allocation2 + $0xf0] ss:$2 sm:$0xff]  ;;  %v357_v21 = vld [vmem:[#allocation2 + $0x120] ss:$2 sm:$0xff]  ;;  %344 = vst [vmem:[#allocation2 + $0x189] sm:$0xff] %v311_v33 }
  0x62   : > { %1422 = vmatpush.msra.mxu2 %v1966_v32  ;;  %1026 = vmatpush.msra.mxu0 %v1388_v7  ;;  %v586_v16 = vld [vmem:[#allocation2 + $0x138] ss:$2 sm:$0xff]  ;;  %v668_v22 = vld [vmem:[#allocation2 + $0x139] ss:$2 sm:$0xff]  ;;  %v310_v32 = vld [vmem:[%s1555_s6 + $0xf0] sm:$0xff] }
  0x63   : > { %781 = vmatpush.msra.mxu1 %v1339_v47  ;;  %v738_v29 = vld [vmem:[#allocation2 + $0x1a] ss:$2 sm:$0xff]  ;;  %343 = vst [vmem:[#allocation2 + $0x181] sm:$0xff] %v310_v32  ;;  %v740_v35 = vld [vmem:[#allocation2 + $0x4a] ss:$2 sm:$0xff] }
  0x64   : > { %466 = vmatmul.f32.vlgmr.msrb.gmra.mxu1 %v345_v23  ;;  %1423 = vmatpush.msra.mxu2 %v1981_v36  ;;  %v588_v20 = vld [vmem:[#allocation2 + $0x168] ss:$2 sm:$0xff]  ;;  %v908_v38 = vld [vmem:[#allocation2 + $0xc1] ss:$2 sm:$0xff]  ;;  %v910_v42 = vld [vmem:[#allocation2 + $0xf1] ss:$2 sm:$0xff] }
  0x65   : > { %704 = vmatmul.f32.vlgmr.msrb.gmra.mxu0 %v656_v26  ;;  %782 = vmatpush.msra.mxu1 %v1338_v56  ;;  %v824_v23 = vld [vmem:[#allocation2 + $0x90] ss:$2 sm:$0xff]  ;;  %v670_v26 = vld [vmem:[#allocation2 + $0x169] ss:$2 sm:$0xff] }
  0x66   : > { %552 = vmatmul.f32.gmra.mxu2 %v500_v27  ;;  %1027 = vmatpush.msra.mxu0 %v1387_v9  ;;  %v826_v27 = vld [vmem:[#allocation2 + $0xc0] ss:$2 sm:$0xff]  ;;  %v914_v52 = vld [vmem:[#allocation2 + $0x151] ss:$2 sm:$0xff] }
  0x67   : > { %628 = vmatmul.f32.gmra.mxu3 %v578_v31  ;;  %783 = vmatpush.msra.mxu1 %v1337_v60  ;;  %v984_v30 = vld [vmem:[#allocation2 + $0x32] ss:$2 sm:$0xff]  ;;  %v986_v36 = vld [vmem:[#allocation2 + $0x62] ss:$2 sm:$0xff] }
  0x68   : > { %1424 = vmatpush.msra.mxu2 %v1998_v46  ;;  %1028 = vmatpush.msra.mxu0 %v1386_v10  ;;  %v828_v31 = vld [vmem:[#allocation2 + $0xf0] ss:$2 sm:$0xff]  ;;  %v912_v46 = vld [vmem:[#allocation2 + $0x121] ss:$2 sm:$0xff] }
  0x69   : > { %784 = vmatpush.msra.mxu1 %v1336_v3  ;;  %v742_v39 = vld [vmem:[#allocation2 + $0x7a] ss:$2 sm:$0xff]  ;;  %v744_v43 = vld [vmem:[#allocation2 + $0xaa] ss:$2 sm:$0xff] }
  0x6a   : > { %1425 = vmatpush.msra.mxu2 %v1392_v50  ;;  %1029 = vmatpush.msra.mxu0 %v1385_v14  ;;  %v990_v44 = vld [vmem:[#allocation2 + $0xc2] ss:$2 sm:$0xff]  ;;  %v992_v50 = vld [vmem:[#allocation2 + $0xf2] ss:$2 sm:$0xff] }
  0x6b   : > { %785 = vmatpush.msra.mxu1 %v1335_v8  ;;  %v746_v48 = vld [vmem:[#allocation2 + $0xda] ss:$2 sm:$0xff] }
  0x6c   : > { %469 = vmatmul.f32.gmra.mxu1 %v347_v37  ;;  %1426 = vmatpush.msra.mxu2 %v1391_v58  ;;  %v830_v37 = vld [vmem:[#allocation2 + $0x120] ss:$2 sm:$0xff] }
  0x6d   : > { %707 = vmatmul.f32.gmra.mxu0 %v658_v40  ;;  %v988_v40 = vld [vmem:[#allocation2 + $0x92] ss:$2 sm:$0xff]  ;;  %v994_v57 = vld [vmem:[#allocation2 + $0x122] ss:$2 sm:$0xff] }
  0x6e   : > { %555 = vmatmul.f32.gmra.mxu2 %v502_v41  ;;  %1030 = vmatpush.msra.mxu0 %v1384_v15  ;;  %v832_v41 = vld [vmem:[#allocation2 + $0x150] ss:$2 sm:$0xff] }
  0x6f   : > { %631 = vmatmul.f32.gmra.mxu3 %v580_v45  ;;  %1427 = vmatpush.msra.mxu2 %v1390_v62  ;;  %v834_v45 = vld [vmem:[#allocation2 + $0x180] ss:$2 sm:$0xff] }
  0x70   : > { %1031 = vmatpush.msra.mxu0 %v1383_v17  ;;  %v998_v58 = vld [vmem:[#allocation2 + $0x182] ss:$2 sm:$0xff] }
  0x71   : > { %1428 = vmatpush.msra.mxu2 %v1389_v4  ;;  %v750_v61 = vld [vmem:[#allocation2 + $0x13a] ss:$2 sm:$0xff] }
  0x73   : > { %1429 = vmatpush.msra.mxu2 %v1388_v7 }
  0x74   : > { %472 = vmatmul.f32.gmra.mxu1 %v349_v51  ;;  %v996_v51 = vld [vmem:[#allocation2 + $0x152] ss:$2 sm:$0xff] }
  0x75   : > { %710 = vmatmul.f32.gmra.mxu0 %v660_v54  ;;  %1430 = vmatpush.msra.mxu2 %v1387_v9 }
  0x76   : > { %558 = vmatmul.f32.gmra.mxu2 %v504_v55  ;;  %v748_v55 = vld [vmem:[#allocation2 + $0x10a] ss:$2 sm:$0xff] }
  0x77   : > { %634 = vmatmul.f32.gmra.mxu3 %v582_v59  ;;  %1431 = vmatpush.msra.mxu2 %v1386_v10  ;;  %v916_v59 = vld [vmem:[#allocation2 + $0x181] ss:$2 sm:$0xff] }
  0x79   : > { %1432 = vmatpush.msra.mxu2 %v1385_v14 }
  0x7b   : > { %1433 = vmatpush.msra.mxu2 %v1384_v15 }
  0x7c   : > { %475 = vmatmul.f32.gmra.mxu1 %v351_v63 }
  0x7d   : > { %713 = vmatmul.f32.gmra.mxu0 %v662_v0  ;;  %1434 = vmatpush.msra.mxu2 %v1383_v17 }
  0x7e   : > { %561 = vmatmul.f32.gmra.mxu2 %v506_v1  ;;  %v752_v1 = vld [vmem:[#allocation2 + $0x16a] ss:$2 sm:$0xff] }
  0x7f   : > { %637 = vmatmul.f32.gmra.mxu3 %v584_v6 }
  0x84   : > { %478 = vmatmul.f32.gmra.mxu1 %v353_v11 }
  0x85   : > { %716 = vmatmul.f32.gmra.mxu0 %v664_v12 }
  0x86   : > { %868 = vmatmul.f32.vlgmr.msrb.gmra.mxu2 %v820_v13 }
  0x87   : > { %640 = vmatmul.f32.gmra.mxu3 %v586_v16 }
  0x8c   : > { %481 = vmatmul.f32.gmra.mxu1 %v355_v18 }
  0x8d   : > { %719 = vmatmul.f32.gmra.mxu0 %v666_v19 }
  0x8e   : > { %871 = vmatmul.f32.gmra.mxu2 %v822_v2 }
  0x8f   : > { %643 = vmatmul.f32.gmra.mxu3 %v588_v20 }
  0x94   : > { %484 = vmatmul.f32.gmra.mxu1 %v357_v21 }
  0x95   : > { %722 = vmatmul.f32.gmra.mxu0 %v668_v22 }
  0x96   : > { %874 = vmatmul.f32.gmra.mxu2 %v824_v23 }
  0x97   : > { %950 = vmatmul.f32.vlgmr.msrb.gmra.mxu3 %v902_v24 }
  0x9c   : > { %487 = vmatmul.f32.gmra.mxu1 %v359_v25 }
  0x9d   : > { %725 = vmatmul.f32.gmra.mxu0 %v670_v26 }
  0x9e   : > { %877 = vmatmul.f32.gmra.mxu2 %v826_v27 }
  0x9f   : > { %953 = vmatmul.f32.gmra.mxu3 %v904_v28 }
  0xa4   : > { %786 = vmatmul.f32.vlgmr.msra.gmra.mxu1 %v738_v29 }
  0xa5   : > { %1032 = vmatmul.f32.vlgmr.msra.gmra.mxu0 %v984_v30 }
  0xa6   : > { %880 = vmatmul.f32.gmra.mxu2 %v828_v31 }
  0xa7   : > { %956 = vmatmul.f32.gmra.mxu3 %v906_v34 }
  0xa9   : > { %v438_v47 = vpop.f32.mrf.mxu1  ;;  %v426_v49 = vpop.f32.mrf.mxu0 }
  0xac   : > { %789 = vmatmul.f32.gmra.mxu1 %v740_v35 }
  0xad   : > { %1035 = vmatmul.f32.gmra.mxu0 %v986_v36 }
  0xae   : > { %883 = vmatmul.f32.gmra.mxu2 %v830_v37 }
  0xaf   : > { %959 = vmatmul.f32.gmra.mxu3 %v908_v38 }
  0xb3   : > { %v541_v53 = vpop.f32.mrf.mxu2 }
  0xb4   : > { %792 = vmatmul.f32.gmra.mxu1 %v742_v39 }
  0xb5   : > { %1038 = vmatmul.f32.gmra.mxu0 %v988_v40 }
  0xb6   : > { %886 = vmatmul.f32.gmra.mxu2 %v832_v41 }
  0xb7   : > { %962 = vmatmul.f32.gmra.mxu3 %v910_v42 }
  0xbc   : > { %795 = vmatmul.f32.gmra.mxu1 %v744_v43 }
  0xbd   : > { %1041 = vmatmul.f32.gmra.mxu0 %v990_v44 }
  0xbe   : > { %889 = vmatmul.f32.gmra.mxu2 %v834_v45 }
  0xbf   : > { %965 = vmatmul.f32.gmra.mxu3 %v912_v46 }
  0xc4   : > { %798 = vmatmul.f32.gmra.mxu1 %v746_v48 }
  0xc5   : > { %1044 = vmatmul.f32.gmra.mxu0 %v992_v50 }
  0xc6   : > { %1050 = vmatmul.f32.vlgmr.msra.gmra.mxu2 %v996_v51 }
  0xc7   : > { %968 = vmatmul.f32.gmra.mxu3 %v914_v52 }
  0xc9   : > { %v441_v54 = vpop.f32.mrf.mxu1 }
  0xca   : > { %v429_v56 = vpop.f32.mrf.mxu0 }
  0xcc   : > { %801 = vmatmul.f32.gmra.mxu1 %v748_v55 }
  0xcd   : > { %1047 = vmatmul.f32.gmra.mxu0 %v994_v57 }
  0xce   : > { %1053 = vmatmul.f32.gmra.mxu2 %v998_v58 }
  0xcf   : > { %971 = vmatmul.f32.gmra.mxu3 %v916_v59 }
  0xd1   : > { %v444_v60 = vpop.f32.mrf.mxu1  ;;  %v544_v62 = vpop.f32.mrf.mxu2 }
  0xd2   : > { %v432_v63 = vpop.f32.mrf.mxu0 }
  0xd4   : > { %804 = vmatmul.f32.gmra.mxu1 %v750_v61 }
  0xd9   : > { %v447_v0 = vpop.f32.mrf.mxu1  ;;  %v547_v3 = vpop.f32.mrf.mxu2 }
  0xda   : > { %v435_v4 = vpop.f32.mrf.mxu0  ;;  %v623_v5 = vpop.f32.mrf.mxu3 }
  0xdc   : > { %807 = vmatmul.f32.gmra.mxu1 %v752_v1 }
  0xe1   : > { %v467_v6 = vpop.f32.mrf.mxu1  ;;  %v550_v7 = vpop.f32.mrf.mxu2 }
  0xe2   : > { %v468_v8 = vadd.f32 %v467_v6, %v426_v49  ;;  %v705_v9 = vpop.f32.mrf.mxu0  ;;  %v626_v10 = vpop.f32.mrf.mxu3 }
  0xe4   : > { %v565_v11 = vadd.f32 %v541_v53, %v468_v8 }
  0xe6   : > { %v647_v52 = vadd.f32 %v623_v5, %v565_v11 }
  0xe9   : > { %v470_v12 = vpop.f32.mrf.mxu1  ;;  %v553_v13 = vpop.f32.mrf.mxu2 }
  0xea   : > { %v471_v14 = vadd.f32 %v470_v12, %v429_v56  ;;  %v708_v15 = vpop.f32.mrf.mxu0  ;;  %v629_v16 = vpop.f32.mrf.mxu3 }
  0xec   : > { %v566_v17 = vadd.f32 %v544_v62, %v471_v14 }
  0xf1   : > { %v473_v18 = vpop.f32.mrf.mxu1  ;;  %v556_v19 = vpop.f32.mrf.mxu2 }
  0xf2   : > { %v474_v2 = vadd.f32 %v473_v18, %v432_v63  ;;  %v711_v20 = vpop.f32.mrf.mxu0  ;;  %v2071_v21 = vpop.f32.mrf.mxu3  ;;  %v2102_v63 = vld [vmem:[%s2151_s2] ss:$0 sm:$0xff] }
  0xf4   : > { %v567_v22 = vadd.f32 %v547_v3, %v474_v2 }
  0xf9   : > { %v476_v23 = vpop.f32.mrf.mxu1  ;;  %v559_v24 = vpop.f32.mrf.mxu2 }
  0xfa   : > { %v477_v25 = vadd.f32 %v476_v23, %v435_v4  ;;  %v2073_v26 = vpop.f32.mrf.mxu0  ;;  %v2075_v27 = vpop.f32.mrf.mxu3 }
  0xfc   : > { %v568_v28 = vadd.f32 %v550_v7, %v477_v25 }
 0x101   : > { %v479_v29 = vpop.f32.mrf.mxu1  ;;  %v562_v30 = vpop.f32.mrf.mxu2 }
 0x102   : > { %v480_v31 = vadd.f32 %v479_v29, %v438_v47  ;;  %v2077_v32 = vpop.f32.mrf.mxu0  ;;  %v2079_v33 = vpop.f32.mrf.mxu3 }
 0x104   : > { %v2081_v34 = vadd.f32 %v553_v13, %v480_v31 }
 0x109   : > { %v482_v35 = vpop.f32.mrf.mxu1  ;;  %v869_v36 = vpop.f32.mrf.mxu2 }
 0x10a   : > { %v483_v37 = vadd.f32 %v482_v35, %v441_v54  ;;  %v2083_v38 = vpop.f32.mrf.mxu0  ;;  %v2085_v39 = vpop.f32.mrf.mxu3  ;;  %v729_v54 = vadd.f32 %v705_v9, %v647_v52  ;;  %v649_v9 = vadd.f32 %v629_v16, %v567_v22  ;;  %v650_v22 = vadd.f32 %v2071_v21, %v568_v28 }
 0x10c   : > { %v2087_v40 = vadd.f32 %v556_v19, %v483_v37  ;;  %v731_v14 = vadd.f32 %v711_v20, %v649_v9  ;;  %v732_v31 = vadd.f32 %v2073_v26, %v650_v22 }
 0x111   : > { %v485_v41 = vpop.f32.mrf.mxu1  ;;  %v872_v42 = vpop.f32.mrf.mxu2 }
 0x112   : > { %v486_v43 = vadd.f32 %v485_v41, %v444_v60  ;;  %v2089_v44 = vpop.f32.mrf.mxu0  ;;  %v2091_v45 = vpop.f32.mrf.mxu3  ;;  %v648_v60 = vadd.f32 %v626_v10, %v566_v17 }
 0x114   : > { %v2093_v46 = vadd.f32 %v559_v24, %v486_v43 }
 0x119   : > { %v488_v47 = vpop.f32.mrf.mxu1  ;;  %v875_v48 = vpop.f32.mrf.mxu2 }
 0x11a   : > { %v489_v49 = vadd.f32 %v488_v47, %v447_v0  ;;  %v2095_v50 = vpop.f32.mrf.mxu0  ;;  %v951_v51 = vpop.f32.mrf.mxu3  ;;  %v730_v0 = vadd.f32 %v708_v15, %v648_v60 }
 0x11c   : > { %v2097_v53 = vadd.f32 %v562_v30, %v489_v49 }
 0x121   : > { %v787_v55 = vpop.f32.mrf.mxu1  ;;  %v878_v56 = vpop.f32.mrf.mxu2 }
 0x122   : > { %v811_v57 = vadd.f32 %v787_v55, %v729_v54  ;;  %v1033_v58 = vpop.f32.mrf.mxu0  ;;  %v954_v59 = vpop.f32.mrf.mxu3 }
 0x124   : > { %v893_v61 = vadd.f32 %v869_v36, %v811_v57 }
 0x126   : > { %v975_v62 = vadd.f32 %v951_v51, %v893_v61 }
 0x128   : > { %v1057_v1 = vadd.f32 %v1033_v58, %v975_v62 }
 0x129   : > { %v790_v3 = vpop.f32.mrf.mxu1  ;;  %v881_v6 = vpop.f32.mrf.mxu2 }
 0x12a   : > { %v1069_v4 = vadd.f32 %v2102_v63, %v1057_v1  ;;  %v812_v5 = vadd.f32 %v790_v3, %v730_v0  ;;  %v1036_v7 = vpop.f32.mrf.mxu0  ;;  %v957_v8 = vpop.f32.mrf.mxu3 }
 0x12c   : > { %vm1077_vm0 = vcmp.gt.f32.partialorder %v1069_v4, 0.0  ;;  %v1085_v10 = vmul.f32 0.01, %v1069_v4  ;;  %v894_v11 = vadd.f32 %v872_v42, %v812_v5  ;;  %v651_v42 = vadd.f32 %v2075_v27, %v2081_v34 }
 0x12d   : > { %v652_v27 = vadd.f32 %v2079_v33, %v2087_v40 }
 0x12e   : > { %v1093_v12 = vsel %vm1077_vm0, %v1069_v4, %v1085_v10  ;;  %v976_v13 = vadd.f32 %v954_v59, %v894_v11  ;;  %v733_v26 = vadd.f32 %v2077_v32, %v651_v42  ;;  %v653_v4 = vadd.f32 %v2085_v39, %v2093_v46 }
 0x12f   : > { %1101 = vst [vmem:[%s2109_s25] sm:$0xff] %v1093_v12  ;;  %v734_v61 = vadd.f32 %v2083_v38, %v652_v27  ;;  %v654_v39 = vadd.f32 %v2091_v45, %v2097_v53 }
 0x130   : > { %v1058_v15 = vadd.f32 %v1036_v7, %v976_v13 }
 0x131   : > { %v793_v17 = vpop.f32.mrf.mxu1  ;;  %v884_v25 = vpop.f32.mrf.mxu2 }
 0x132   : > { %v1070_v18 = vadd.f32 %v2102_v63, %v1058_v15  ;;  %v813_v19 = vadd.f32 %v793_v17, %v731_v14  ;;  %v1039_v16 = vpop.f32.mrf.mxu0  ;;  %v960_v2 = vpop.f32.mrf.mxu3 }
 0x134   : > { %vm1078_vm1 = vcmp.gt.f32.partialorder %v1070_v18, 0.0  ;;  %v1086_v23 = vmul.f32 0.01, %v1070_v18  ;;  %v895_v24 = vadd.f32 %v875_v48, %v813_v19 }
 0x136   : > { %v1094_v29 = vsel %vm1078_vm1, %v1070_v18, %v1086_v23  ;;  %v977_v30 = vadd.f32 %v957_v8, %v895_v24  ;;  %v735_v8 = vadd.f32 %v2089_v44, %v653_v4  ;;  %v736_v18 = vadd.f32 %v2095_v50, %v654_v39 }
 0x137   : > { %1102 = vst [vmem:[%s2109_s25 + $0x8] sm:$0xff] %v1094_v29 }
 0x138   : > { %v1059_v20 = vadd.f32 %v1039_v16, %v977_v30 }
 0x139   : > { %v796_v35 = vpop.f32.mrf.mxu1  ;;  %v887_v49 = vpop.f32.mrf.mxu2 }
 0x13a   : > { %v1071_v36 = vadd.f32 %v2102_v63, %v1059_v20  ;;  %v814_v37 = vadd.f32 %v796_v35, %v732_v31  ;;  %v1042_v41 = vpop.f32.mrf.mxu0  ;;  %v963_v43 = vpop.f32.mrf.mxu3 }
 0x13c   : > { %vm1079_vm2 = vcmp.gt.f32.partialorder %v1071_v36, 0.0  ;;  %v1087_v21 = vmul.f32 0.01, %v1071_v36  ;;  %v896_v28 = vadd.f32 %v878_v56, %v814_v37 }
 0x13e   : > { %v1095_v47 = vsel %vm1079_vm2, %v1071_v36, %v1087_v21  ;;  %v978_v48 = vadd.f32 %v960_v2, %v896_v28 }
 0x13f   : > { %1103 = vst [vmem:[%s2109_s25 + $0x10] sm:$0xff] %v1095_v47 }
 0x140   : > { %v1060_v51 = vadd.f32 %v1042_v41, %v978_v48 }
 0x141   : > { %v799_v52 = vpop.f32.mrf.mxu1  ;;  %v890_v0 = vpop.f32.mrf.mxu2 }
 0x142   : > { %v1072_v54 = vadd.f32 %v2102_v63, %v1060_v51  ;;  %v815_v55 = vadd.f32 %v799_v52, %v733_v26  ;;  %v1045_v57 = vpop.f32.mrf.mxu0  ;;  %v966_v60 = vpop.f32.mrf.mxu3 }
 0x144   : > { %vm1080_vm3 = vcmp.gt.f32.partialorder %v1072_v54, 0.0  ;;  %v1088_v34 = vmul.f32 0.01, %v1072_v54  ;;  %v897_v56 = vadd.f32 %v881_v6, %v815_v55 }
 0x146   : > { %v1096_v58 = vsel %vm1080_vm3, %v1072_v54, %v1088_v34  ;;  %v979_v59 = vadd.f32 %v963_v43, %v897_v56 }
 0x147   : > { %1104 = vst [vmem:[%s2109_s25 + $0x18] sm:$0xff] %v1096_v58 }
 0x148   : > { %v1061_v32 = vadd.f32 %v1045_v57, %v979_v59 }
 0x149   : > { %v802_v62 = vpop.f32.mrf.mxu1  ;;  %v1051_v13 = vpop.f32.mrf.mxu2 }
 0x14a   : > { %v1073_v1 = vadd.f32 %v2102_v63, %v1061_v32  ;;  %v816_v3 = vadd.f32 %v802_v62, %v734_v61  ;;  %v1048_v5 = vpop.f32.mrf.mxu0  ;;  %v969_v10 = vpop.f32.mrf.mxu3 }
 0x14c   : > { %vm1081_vm4 = vcmp.gt.f32.partialorder %v1073_v1, 0.0  ;;  %v1089_v33 = vmul.f32 0.01, %v1073_v1  ;;  %v898_v40 = vadd.f32 %v884_v25, %v816_v3 }
 0x14e   : > { %v1097_v6 = vsel %vm1081_vm4, %v1073_v1, %v1089_v33  ;;  %v980_v7 = vadd.f32 %v966_v60, %v898_v40 }
 0x14f   : > { %1105 = vst [vmem:[%s2109_s25 + $0x20] sm:$0xff] %v1097_v6 }
 0x150   : > { %v1062_v38 = vadd.f32 %v1048_v5, %v980_v7 }
 0x151   : > { %v805_v9 = vpop.f32.mrf.mxu1  ;;  %v1054_v45 = vpop.f32.mrf.mxu2 }
 0x152   : > { %v1074_v11 = vadd.f32 %v2102_v63, %v1062_v38  ;;  %v817_v12 = vadd.f32 %v805_v9, %v735_v8  ;;  %v972_v22 = vpop.f32.mrf.mxu3 }
 0x154   : > { %vm1082_vm5 = vcmp.gt.f32.partialorder %v1074_v11, 0.0  ;;  %v1090_v46 = vmul.f32 0.01, %v1074_v11  ;;  %v899_v14 = vadd.f32 %v887_v49, %v817_v12 }
 0x156   : > { %v1098_v15 = vsel %vm1082_vm5, %v1074_v11, %v1090_v46  ;;  %v981_v17 = vadd.f32 %v969_v10, %v899_v14 }
 0x157   : > { %1106 = vst [vmem:[%s2109_s25 + $0x28] sm:$0xff] %v1098_v15 }
 0x158   : > { %v1063_v44 = vadd.f32 %v1051_v13, %v981_v17 }
 0x159   : > { %v808_v19 = vpop.f32.mrf.mxu1 }
 0x15a   : > { %v1075_v16 = vadd.f32 %v2102_v63, %v1063_v44  ;;  %v818_v2 = vadd.f32 %v808_v19, %v736_v18 }
 0x15c   : > { %vm1083_vm6 = vcmp.gt.f32.partialorder %v1075_v16, 0.0  ;;  %v1091_v23 = vmul.f32 0.01, %v1075_v16  ;;  %v900_v24 = vadd.f32 %v890_v0, %v818_v2 }
 0x15e   : > { %v1099_v53 = vsel %vm1083_vm6, %v1075_v16, %v1091_v23  ;;  %v982_v25 = vadd.f32 %v972_v22, %v900_v24 }
 0x15f   : > { %1107 = vst [vmem:[%s2109_s25 + $0x30] sm:$0xff] %v1099_v53 }
 0x160   : > { %v1064_v29 = vadd.f32 %v1054_v45, %v982_v25 }
 0x162   : > { %v1076_v30 = vadd.f32 %v2102_v63, %v1064_v29 }
 0x164   : > { %vm1084_vm7 = vcmp.gt.f32.partialorder %v1076_v30, 0.0  ;;  %v1092_v31 = vmul.f32 0.01, %v1076_v30 }
 0x166   : > { %v1100_v50 = vsel %vm1084_vm7, %v1076_v30, %v1092_v31 }
 0x167   : > { %1108 = vst [vmem:[%s2109_s25 + $0x38] sm:$0xff] %v1100_v50 }
 0x168 PF: > { %s13_s14 = sadd.s32 1, %s1483_s14   ;;  %s2153_s12 = smov %s1479_s13 }
 0x169   : > { %p10_p5 = scmp.ge.s32.totalorder %s13_s14, 4   ;;  %s2154_s13 = smov %s2156_s15 }
 0x16b   :  { %12 = sbr.rel (!%p10_p5) target bundleno = 2 (0x2), region = 152 }

// kernel: gradual_deformation_block.6
= control target key start
LH: loop header
LB: loop body
LE: loop exit
PB: predicated region body
PF: predicated region fallthrough
CT: control target
= control target key end

     0   :  { %8 = vsyncpa [#allocation4], 0  ;;  %s949_s12 = smov 0   ;;  %s951_s13 = smov 0   ;;  %s1005_s0 = inlined_call_operand.vmem [shape: f32[2,4,4,128], index: 0, kind: input, shape index: {}]   ;;  %s1006_s1 = inlined_call_operand.hbm [shape: f32[3,3,128,128], index: 1, kind: input, shape index: {}]   ;;  %s1007_s2 = inlined_call_operand.vmem [shape: f32[1,128], index: 2, kind: input, shape index: {}]   ;;  %s1008_s3 = inlined_call_operand.vmem [shape: f32[2,2,2,128], index: 3, kind: output, shape index: {}]  }
   0x1   :  { %s953_s14 = smov 0  }
   0x2 LB: > { %s812_s15 = sadd.s32 4294967295, %s923_s14   ;;  %s26_s16 = sadd.s32 1, %s919_s13  ;;  %s923_s14 = sphi %s953_s14, %s14_s14   ;;  %s919_s13 = sphi %s951_s13, %s1010_s13   ;;  %s915_s12 = sphi %s949_s12, %s1009_s12  }
   0x3   : > { %p28_p0 = scmp.ge.s32.totalorder %s26_s16, 2  ;;  %p814_p1 = scmp.ge.s32.totalorder %s923_s14, 1 }
   0x4   : > { %p137_p2 = scmp.lt.s32.totalorder %s923_s14, 3  ;;  %p836_p4 = scmp.eq.s32.totalorder %s812_s15, 0 }
   0x5   : > { %s1012_s16 = smov (%p28_p0, %s26_s16), 0  ;;  %s150_s19 = sshll.u32 %s1006_s1, 4  ;;  %s151_s19 = int_to_ptr.hbm [resolvable:$true] %s150_s19 }
   0x6   : > { %p138_p3 = pnand %p814_p1, %p137_p2  ;;  %s925_s20 = smov [#allocation3]  }
   0x7   : > { %s152_s21 = sshll.u32 %s925_s20, 4  ;;  %s926_s22 = smov 128   ;;  %s153_s21 = int_to_ptr.vmem [resolvable:$true] %s152_s21 }
   0x8   : > { %p832_p5 = pneg %p138_p3  ;;  %s927_s23 = smov 8  }
   0x9   : > { %182 = sbr.rel (%p138_p3) target bundleno = 265 (0x109), region = 32 }
   0xa   : > { %p833_p6 = pnand %p836_p4, %p832_p5 }
   0xc   : > { %835 = dma.hbm_to_vmem [thread:$0]  (!%p833_p6), %s151_s19, 18432, %s153_s21, [#allocation4], %s926_s22, %s926_s22, %s927_s23  }
   0xe   : > { %910 = dma.done.wait (%p836_p4), [#allocation4], 18432  }
   0xf   : > { %912 = vsyncadd (%p836_p4), [#allocation4], 4294948864  ;;  %v928_v0 = vmov 0.0   ;;  %v287_v1 = vld [vmem:[#allocation3 + $0xf8] sm:$0xff]  ;;  %v286_v2 = vld [vmem:[#allocation3 + $0xf0] sm:$0xff]  ;;  %p213_p7 = scmp.lt.s32.totalorder %s915_s12, 1 }
  0x10   : > { %233 = vst [vmem:[#allocation2] sm:$0x3f] %v928_v0  ;;  %295 = vmatpush.msra.mxu0 %v287_v1  ;;  %v362_v3 = vld [vmem:[#allocation3 + $0x178] sm:$0xff]  ;;  %v361_v4 = vld [vmem:[#allocation3 + $0x170] sm:$0xff]  ;;  %v285_v5 = vld [vmem:[#allocation3 + $0xe8] sm:$0xff] }
  0x11   : > { %235 = vst [vmem:[#allocation2 + $0x10] sm:$0x3f] %v928_v0  ;;  %370 = vmatpush.msra.mxu2 %v362_v3  ;;  %v266_v6 = vld [vmem:[#allocation3 + $0x78] sm:$0xff]  ;;  %v360_v7 = vld [vmem:[#allocation3 + $0x168] sm:$0xff]  ;;  %v265_v8 = vld [vmem:[#allocation3 + $0x70] sm:$0xff]  ;;  %s1014_s12 = smov (!%p213_p7, %s915_s12), 1 }
  0x12   : > { %234 = vst [vmem:[#allocation2 + $0x8] sm:$0x3f] %v928_v0  ;;  %296 = vmatpush.msra.mxu0 %v286_v2  ;;  %322 = vmatpush.msra.mxu1 %v266_v6  ;;  %v284_v9 = vld [vmem:[#allocation3 + $0xe0] sm:$0xff]  ;;  %v411_v10 = vld [vmem:[#allocation3 + $0x1f8] sm:$0xff]  ;;  %v264_v11 = vld [vmem:[#allocation3 + $0x68] sm:$0xff]  ;;  %s826_s24 = sshll.u32 %s1014_s12, 4 }
  0x13   : > { %236 = vst [vmem:[#allocation2 + $0x18] sm:$0x3f] %v928_v0  ;;  %371 = vmatpush.msra.mxu2 %v361_v4  ;;  %v359_v12 = vld [vmem:[#allocation3 + $0x160] sm:$0xff]  ;;  %v410_v13 = vld [vmem:[#allocation3 + $0x1f0] sm:$0xff]  ;;  %v283_v14 = vld [vmem:[#allocation3 + $0xd8] sm:$0xff]  ;;  %419 = vmatpush.msra.mxu3 %v411_v10  ;;  %s983_s27 = scalar_lea.vmem %s1005_s0, %s826_s24  ;;  %s827_s30 = sshll.u32 %s1014_s12, 2 }
  0x14   : > { %237 = vst [vmem:[#allocation2 + $0x20] sm:$0x3f] %v928_v0  ;;  %297 = vmatpush.msra.mxu0 %v285_v5  ;;  %323 = vmatpush.msra.mxu1 %v265_v8  ;;  %v263_v15 = vld [vmem:[#allocation3 + $0x60] sm:$0xff]  ;;  %v358_v16 = vld [vmem:[#allocation3 + $0x158] sm:$0xff]  ;;  %v409_v17 = vld [vmem:[#allocation3 + $0x1e8] sm:$0xff]  ;;  %s228_s6 = scalar_lea.vmem %s1008_s3, %s827_s30 }
  0x15   : > { %372 = vmatpush.msra.mxu2 %v360_v7  ;;  %v282_v18 = vld [vmem:[#allocation3 + $0xd0] sm:$0xff]  ;;  %420 = vmatpush.msra.mxu3 %v410_v13  ;;  %v262_v19 = vld [vmem:[#allocation3 + $0x58] sm:$0xff]  ;;  %v408_v21 = vld [vmem:[#allocation3 + $0x1e0] sm:$0xff] }
  0x16   : > { %298 = vmatpush.msra.mxu0 %v284_v9  ;;  %324 = vmatpush.msra.mxu1 %v264_v11  ;;  %v357_v20 = vld [vmem:[#allocation3 + $0x150] sm:$0xff]  ;;  %v281_v22 = vld [vmem:[#allocation3 + $0xc8] sm:$0xff]  ;;  %v407_v25 = vld [vmem:[#allocation3 + $0x1d8] sm:$0xff] }
  0x17   : > { %373 = vmatpush.msra.mxu2 %v359_v12  ;;  %421 = vmatpush.msra.mxu3 %v409_v17  ;;  %v261_v23 = vld [vmem:[#allocation3 + $0x50] sm:$0xff]  ;;  %v356_v24 = vld [vmem:[#allocation3 + $0x148] sm:$0xff]  ;;  %v280_v26 = vld [vmem:[#allocation3 + $0xc0] sm:$0xff] }
  0x18   : > { %299 = vmatpush.msra.mxu0 %v283_v14  ;;  %325 = vmatpush.msra.mxu1 %v263_v15  ;;  %v260_v27 = vld [vmem:[#allocation3 + $0x48] sm:$0xff]  ;;  %v355_v28 = vld [vmem:[#allocation3 + $0x140] sm:$0xff]  ;;  %v406_v29 = vld [vmem:[#allocation3 + $0x1d0] sm:$0xff] }
  0x19   : > { %374 = vmatpush.msra.mxu2 %v358_v16  ;;  %422 = vmatpush.msra.mxu3 %v408_v21  ;;  %v279_v30 = vld [vmem:[#allocation3 + $0xb8] sm:$0xff]  ;;  %v259_v31 = vld [vmem:[#allocation3 + $0x40] sm:$0xff]  ;;  %v405_v33 = vld [vmem:[#allocation3 + $0x1c8] sm:$0xff] }
  0x1a   : > { %300 = vmatpush.msra.mxu0 %v282_v18  ;;  %326 = vmatpush.msra.mxu1 %v262_v19  ;;  %v354_v32 = vld [vmem:[#allocation3 + $0x138] sm:$0xff]  ;;  %v278_v34 = vld [vmem:[#allocation3 + $0xb0] sm:$0xff]  ;;  %v404_v37 = vld [vmem:[#allocation3 + $0x1c0] sm:$0xff] }
  0x1b   : > { %375 = vmatpush.msra.mxu2 %v357_v20  ;;  %423 = vmatpush.msra.mxu3 %v407_v25  ;;  %v258_v35 = vld [vmem:[#allocation3 + $0x38] sm:$0xff]  ;;  %v353_v36 = vld [vmem:[#allocation3 + $0x130] sm:$0xff]  ;;  %v277_v38 = vld [vmem:[#allocation3 + $0xa8] sm:$0xff] }
  0x1c   : > { %301 = vmatpush.msra.mxu0 %v281_v22  ;;  %327 = vmatpush.msra.mxu1 %v261_v23  ;;  %v257_v39 = vld [vmem:[#allocation3 + $0x30] sm:$0xff]  ;;  %v352_v40 = vld [vmem:[#allocation3 + $0x128] sm:$0xff]  ;;  %v403_v41 = vld [vmem:[#allocation3 + $0x1b8] sm:$0xff] }
  0x1d   : > { %376 = vmatpush.msra.mxu2 %v356_v24  ;;  %424 = vmatpush.msra.mxu3 %v406_v29  ;;  %v276_v42 = vld [vmem:[#allocation3 + $0xa0] sm:$0xff]  ;;  %v256_v43 = vld [vmem:[#allocation3 + $0x28] sm:$0xff]  ;;  %v402_v45 = vld [vmem:[#allocation3 + $0x1b0] sm:$0xff] }
  0x1e   : > { %302 = vmatpush.msra.mxu0 %v280_v26  ;;  %328 = vmatpush.msra.mxu1 %v260_v27  ;;  %v351_v44 = vld [vmem:[#allocation3 + $0x120] sm:$0xff]  ;;  %v275_v46 = vld [vmem:[#allocation3 + $0x98] sm:$0xff]  ;;  %v401_v49 = vld [vmem:[#allocation3 + $0x1a8] sm:$0xff] }
  0x1f   : > { %377 = vmatpush.msra.mxu2 %v355_v28  ;;  %425 = vmatpush.msra.mxu3 %v405_v33  ;;  %v255_v47 = vld [vmem:[#allocation3 + $0x20] sm:$0xff]  ;;  %v350_v48 = vld [vmem:[#allocation3 + $0x118] sm:$0xff]  ;;  %v274_v50 = vld [vmem:[#allocation3 + $0x90] sm:$0xff] }
  0x20   : > { %303 = vmatpush.msra.mxu0 %v279_v30  ;;  %329 = vmatpush.msra.mxu1 %v259_v31  ;;  %v254_v51 = vld [vmem:[#allocation3 + $0x18] sm:$0xff]  ;;  %v349_v52 = vld [vmem:[#allocation3 + $0x110] sm:$0xff]  ;;  %v400_v53 = vld [vmem:[#allocation3 + $0x1a0] sm:$0xff] }
  0x21   : > { %378 = vmatpush.msra.mxu2 %v354_v32  ;;  %426 = vmatpush.msra.mxu3 %v404_v37  ;;  %v273_v54 = vld [vmem:[#allocation3 + $0x88] sm:$0xff]  ;;  %v253_v55 = vld [vmem:[#allocation3 + $0x10] sm:$0xff]  ;;  %v399_v57 = vld [vmem:[#allocation3 + $0x198] sm:$0xff] }
  0x22   : > { %304 = vmatpush.msra.mxu0 %v278_v34  ;;  %330 = vmatpush.msra.mxu1 %v258_v35  ;;  %v348_v56 = vld [vmem:[#allocation3 + $0x108] sm:$0xff]  ;;  %v272_v58 = vld [vmem:[#allocation3 + $0x80] sm:$0xff]  ;;  %v460_v60 = vld [vmem:[#allocation3 + $0x278] sm:$0xff] }
  0x23   : > { %379 = vmatpush.msra.mxu2 %v353_v36  ;;  %427 = vmatpush.msra.mxu3 %v403_v41  ;;  %v252_v59 = vld [vmem:[#allocation3 + $0x8] sm:$0xff]  ;;  %v347_v61 = vld [vmem:[#allocation3 + $0x100] sm:$0xff]  ;;  %v558_v62 = vld [vmem:[#allocation3 + $0x378] sm:$0xff] }
  0x24   : > { %305 = vmatpush.msra.mxu0 %v277_v38  ;;  %331 = vmatpush.msra.mxu1 %v257_v39  ;;  %v398_v63 = vld [vmem:[#allocation3 + $0x190] sm:$0xff]  ;;  %v251_v1 = vld [vmem:[#allocation3] sm:$0xff]  ;;  %v397_v3 = vld [vmem:[#allocation3 + $0x188] sm:$0xff] }
  0x25   : > { %380 = vmatpush.msra.mxu2 %v352_v40  ;;  %428 = vmatpush.msra.mxu3 %v402_v45  ;;  %v459_v0 = vld [vmem:[#allocation3 + $0x270] sm:$0xff]  ;;  %v458_v4 = vld [vmem:[#allocation3 + $0x268] sm:$0xff]  ;;  %v509_v5 = vld [vmem:[#allocation3 + $0x2f8] sm:$0xff] }
  0x26   : > { %306 = vmatpush.msra.mxu0 %v276_v42  ;;  %332 = vmatpush.msra.mxu1 %v256_v43  ;;  %v557_v2 = vld [vmem:[#allocation3 + $0x370] sm:$0xff]  ;;  %v556_v6 = vld [vmem:[#allocation3 + $0x368] sm:$0xff]  ;;  %v396_v7 = vld [vmem:[#allocation3 + $0x180] sm:$0xff] }
  0x27   : > { %381 = vmatpush.msra.mxu2 %v351_v44  ;;  %429 = vmatpush.msra.mxu3 %v401_v49  ;;  %v457_v8 = vld [vmem:[#allocation3 + $0x260] sm:$0xff]  ;;  %v456_v9 = vld [vmem:[#allocation3 + $0x258] sm:$0xff]  ;;  %v508_v10 = vld [vmem:[#allocation3 + $0x2f0] sm:$0xff] }
  0x28   : > { %307 = vmatpush.msra.mxu0 %v275_v46  ;;  %333 = vmatpush.msra.mxu1 %v255_v47  ;;  %v555_v11 = vld [vmem:[#allocation3 + $0x360] sm:$0xff]  ;;  %v607_v12 = vld [vmem:[#allocation3 + $0x3f8] sm:$0xff]  ;;  %v240_v13 = vld [vmem:[%s983_s27 + $0x4] sm:$0xf] }
  0x29   : > { %382 = vmatpush.msra.mxu2 %v350_v48  ;;  %430 = vmatpush.msra.mxu3 %v400_v53  ;;  %v507_v14 = vld [vmem:[#allocation3 + $0x2e8] sm:$0xff]  ;;  %245 = vst [vmem:[#allocation2 + $0x11] sm:$0xf] %v240_v13  ;;  %v268_v15 = vld [vmem:[#allocation2 + $0x1] ss:$2 sm:$0x3] }
  0x2a   : > { %308 = vmatpush.msra.mxu0 %v274_v50  ;;  %334 = vmatpush.msra.mxu1 %v254_v51  ;;  %v554_v16 = vld [vmem:[#allocation3 + $0x358] sm:$0xff]  ;;  %v606_v17 = vld [vmem:[#allocation3 + $0x3f0] sm:$0xff]  ;;  %290 = vst [vmem:[#allocation1] ss:$4 sm:$0xff] %v268_v15  ;;  %v506_v19 = vld [vmem:[#allocation3 + $0x2e0] sm:$0xff] }
  0x2b   : > { %383 = vmatpush.msra.mxu2 %v349_v52  ;;  %431 = vmatpush.msra.mxu3 %v399_v57  ;;  %v455_v18 = vld [vmem:[#allocation3 + $0x250] sm:$0xff]  ;;  %v605_v21 = vld [vmem:[#allocation3 + $0x3e8] sm:$0xff]  ;;  %v505_v25 = vld [vmem:[#allocation3 + $0x2d8] sm:$0xff] }
  0x2c   : > { %309 = vmatpush.msra.mxu0 %v273_v54  ;;  %335 = vmatpush.msra.mxu1 %v253_v55  ;;  %v553_v20 = vld [vmem:[#allocation3 + $0x350] sm:$0xff]  ;;  %v239_v22 = vld [vmem:[%s983_s27] sm:$0xf]  ;;  %v604_v27 = vld [vmem:[#allocation3 + $0x3e0] sm:$0xff] }
  0x2d   : > { %384 = vmatpush.msra.mxu2 %v348_v56  ;;  %432 = vmatpush.msra.mxu3 %v398_v63  ;;  %v241_v23 = vld [vmem:[%s983_s27 + $0x8] sm:$0xf]  ;;  %v454_v24 = vld [vmem:[#allocation3 + $0x248] sm:$0xff]  ;;  %244 = vst [vmem:[#allocation2 + $0x9] sm:$0xf] %v239_v22  ;;  %v453_v28 = vld [vmem:[#allocation3 + $0x240] sm:$0xff] }
  0x2e   : > { %310 = vmatpush.msra.mxu0 %v272_v58  ;;  %336 = vmatpush.msra.mxu1 %v252_v59  ;;  %v552_v26 = vld [vmem:[#allocation3 + $0x348] sm:$0xff]  ;;  %246 = vst [vmem:[#allocation2 + $0x19] sm:$0xf] %v241_v23  ;;  %v504_v29 = vld [vmem:[#allocation3 + $0x2d0] sm:$0xff]  ;;  %v551_v30 = vld [vmem:[#allocation3 + $0x340] sm:$0xff] }
  0x2f   : > { %385 = vmatpush.msra.mxu2 %v347_v61  ;;  %433 = vmatpush.msra.mxu3 %v397_v3  ;;  %v603_v31 = vld [vmem:[#allocation3 + $0x3d8] sm:$0xff]  ;;  %v503_v34 = vld [vmem:[#allocation3 + $0x2c8] sm:$0xff]  ;;  %v602_v36 = vld [vmem:[#allocation3 + $0x3d0] sm:$0xff] }
  0x30   : > { %468 = vmatpush.msrb.mxu0 %v460_v60  ;;  %337 = vmatpush.msra.mxu1 %v251_v1  ;;  %v270_v32 = vld [vmem:[#allocation2 + $0x11] ss:$2 sm:$0x3]  ;;  %v452_v33 = vld [vmem:[#allocation3 + $0x238] sm:$0xff]  ;;  %v451_v37 = vld [vmem:[#allocation3 + $0x230] sm:$0xff] }
  0x31   : > { %566 = vmatpush.msrb.mxu2 %v558_v62  ;;  %434 = vmatpush.msra.mxu3 %v396_v7  ;;  %292 = vst [vmem:[#allocation1 + $0x1] ss:$4 sm:$0xff] %v270_v32  ;;  %v550_v35 = vld [vmem:[#allocation3 + $0x338] sm:$0xff]  ;;  %v502_v38 = vld [vmem:[#allocation3 + $0x2c0] sm:$0xff]  ;;  %v549_v39 = vld [vmem:[#allocation3 + $0x330] sm:$0xff] }
  0x32   : > { %469 = vmatpush.msrb.mxu0 %v459_v0  ;;  %517 = vmatpush.msrb.mxu1 %v509_v5  ;;  %v601_v40 = vld [vmem:[#allocation3 + $0x3c8] sm:$0xff]  ;;  %v501_v42 = vld [vmem:[#allocation3 + $0x2b8] sm:$0xff]  ;;  %v600_v44 = vld [vmem:[#allocation3 + $0x3c0] sm:$0xff] }
  0x33   : > { %567 = vmatpush.msrb.mxu2 %v557_v2  ;;  %615 = vmatpush.msrb.mxu3 %v607_v12  ;;  %v450_v41 = vld [vmem:[#allocation3 + $0x228] sm:$0xff]  ;;  %v248_v45 = vld [vmem:[#allocation2] ss:$2 sm:$0x3]  ;;  %v449_v46 = vld [vmem:[#allocation3 + $0x220] sm:$0xff] }
  0x34   : > { %470 = vmatpush.msrb.mxu0 %v458_v4  ;;  %518 = vmatpush.msrb.mxu1 %v508_v10  ;;  %v548_v43 = vld [vmem:[#allocation3 + $0x328] sm:$0xff]  ;;  %v500_v47 = vld [vmem:[#allocation3 + $0x2b0] sm:$0xff]  ;;  %v250_v48 = vld [vmem:[#allocation2 + $0x10] ss:$2 sm:$0x3] }
  0x35   : > { %568 = vmatpush.msrb.mxu2 %v556_v6  ;;  %616 = vmatpush.msrb.mxu3 %v606_v17  ;;  %v547_v49 = vld [vmem:[#allocation3 + $0x320] sm:$0xff]  ;;  %v599_v50 = vld [vmem:[#allocation3 + $0x3b8] sm:$0xff]  ;;  %v499_v53 = vld [vmem:[#allocation3 + $0x2a8] sm:$0xff] }
  0x36   : > { %471 = vmatpush.msrb.mxu0 %v457_v8  ;;  %519 = vmatpush.msrb.mxu1 %v507_v14  ;;  %v448_v52 = vld [vmem:[#allocation3 + $0x218] sm:$0xff]  ;;  %v598_v55 = vld [vmem:[#allocation3 + $0x3b0] sm:$0xff]  ;;  %v498_v58 = vld [vmem:[#allocation3 + $0x2a0] sm:$0xff] }
  0x37   : > { %569 = vmatpush.msrb.mxu2 %v555_v11  ;;  %617 = vmatpush.msrb.mxu3 %v605_v21  ;;  %v546_v54 = vld [vmem:[#allocation3 + $0x318] sm:$0xff]  ;;  %v242_v56 = vld [vmem:[%s983_s27 + $0xc] sm:$0xf]  ;;  %v446_v60 = vld [vmem:[#allocation3 + $0x208] sm:$0xff] }
  0x38   : > { %472 = vmatpush.msrb.mxu0 %v456_v9  ;;  %520 = vmatpush.msrb.mxu1 %v506_v19  ;;  %v293_v51 = vld.sshfl [vmem:[#allocation1] sm:$0xff pattern:$0x73625140]  ;;  %v447_v57 = vld [vmem:[#allocation3 + $0x210] sm:$0xff]  ;;  %247 = vst [vmem:[#allocation2 + $0x21] sm:$0xf] %v242_v56 }
  0x39   : > { %570 = vmatpush.msrb.mxu2 %v554_v16  ;;  %618 = vmatpush.msrb.mxu3 %v604_v27  ;;  %317 = vst [vmem:[#allocation1] ss:$4 sm:$0xff] %v248_v45  ;;  %v545_v59 = vld [vmem:[#allocation3 + $0x310] sm:$0xff]  ;;  %v597_v61 = vld [vmem:[#allocation3 + $0x3a8] sm:$0xff]  ;;  %v497_v62 = vld [vmem:[#allocation3 + $0x298] sm:$0xff] }
  0x3a   : > { %473 = vmatpush.msrb.mxu0 %v455_v18  ;;  %521 = vmatpush.msrb.mxu1 %v505_v25  ;;  %319 = vst [vmem:[#allocation1 + $0x1] ss:$4 sm:$0xff] %v250_v48  ;;  %v544_v63 = vld [vmem:[#allocation3 + $0x308] sm:$0xff]  ;;  %v343_v0 = vld [vmem:[#allocation2 + $0x2] ss:$2 sm:$0x3] }
  0x3b   : > { %571 = vmatpush.msrb.mxu2 %v553_v20  ;;  %619 = vmatpush.msrb.mxu3 %v603_v31  ;;  %v445_v1 = vld [vmem:[#allocation3 + $0x200] sm:$0xff]  ;;  %v656_v3 = vld [vmem:[#allocation3 + $0x478] sm:$0xff]  ;;  %v496_v6 = vld [vmem:[#allocation3 + $0x290] sm:$0xff] }
  0x3c   : > { %474 = vmatpush.msrb.mxu0 %v454_v24  ;;  %522 = vmatpush.msrb.mxu1 %v504_v29  ;;  %v345_v2 = vld [vmem:[#allocation2 + $0x12] ss:$2 sm:$0x3]  ;;  %v655_v8 = vld [vmem:[#allocation3 + $0x470] sm:$0xff]  ;;  %v595_v9 = vld [vmem:[#allocation3 + $0x398] sm:$0xff] }
  0x3d   : > { %572 = vmatpush.msrb.mxu2 %v552_v26  ;;  %620 = vmatpush.msrb.mxu3 %v602_v36  ;;  %v596_v4 = vld [vmem:[#allocation3 + $0x3a0] sm:$0xff]  ;;  %v392_v10 = vld [vmem:[#allocation2 + $0x8] ss:$2 sm:$0x3]  ;;  %v654_v13 = vld [vmem:[#allocation3 + $0x468] sm:$0xff] }
  0x3e   : > { %475 = vmatpush.msrb.mxu0 %v453_v28  ;;  %523 = vmatpush.msrb.mxu1 %v503_v34  ;;  %v543_v7 = vld [vmem:[#allocation3 + $0x300] sm:$0xff]  ;;  %v394_v11 = vld [vmem:[#allocation2 + $0x18] ss:$2 sm:$0x3]  ;;  %v594_v15 = vld [vmem:[#allocation3 + $0x390] sm:$0xff] }
  0x3f   : > { %573 = vmatpush.msrb.mxu2 %v551_v30  ;;  %621 = vmatpush.msrb.mxu3 %v601_v40  ;;  %v495_v14 = vld [vmem:[#allocation3 + $0x288] sm:$0xff]  ;;  %v441_v16 = vld [vmem:[#allocation2 + $0x9] ss:$2 sm:$0x3]  ;;  %v653_v17 = vld [vmem:[#allocation3 + $0x460] sm:$0xff] }
  0x40   : > { %476 = vmatpush.msrb.mxu0 %v452_v33  ;;  %524 = vmatpush.msrb.mxu1 %v502_v38  ;;  %v494_v18 = vld [vmem:[#allocation3 + $0x280] sm:$0xff]  ;;  %v443_v19 = vld [vmem:[#allocation2 + $0x19] ss:$2 sm:$0x3]  ;;  %v652_v21 = vld [vmem:[#allocation3 + $0x458] sm:$0xff] }
  0x41   : > { %574 = vmatpush.msrb.mxu2 %v550_v35  ;;  %622 = vmatpush.msrb.mxu3 %v600_v44  ;;  %v320_v5 = vld.sshfl [vmem:[#allocation1] sm:$0xff pattern:$0x73625140]  ;;  %v592_v23 = vld [vmem:[#allocation3 + $0x380] sm:$0xff]  ;;  %v651_v24 = vld [vmem:[#allocation3 + $0x450] sm:$0xff] }
  0x42   : > { %477 = vmatpush.msrb.mxu0 %v451_v37  ;;  %525 = vmatpush.msrb.mxu1 %v501_v42  ;;  %365 = vst [vmem:[#allocation1] ss:$4 sm:$0xff] %v343_v0  ;;  %v593_v20 = vld [vmem:[#allocation3 + $0x388] sm:$0xff]  ;;  %v649_v26 = vld [vmem:[#allocation3 + $0x440] sm:$0xff]  ;;  %v648_v29 = vld [vmem:[#allocation3 + $0x438] sm:$0xff] }
  0x43   : > { %575 = vmatpush.msrb.mxu2 %v549_v39  ;;  %623 = vmatpush.msrb.mxu3 %v599_v50  ;;  %367 = vst [vmem:[#allocation1 + $0x1] ss:$4 sm:$0xff] %v345_v2  ;;  %v650_v25 = vld [vmem:[#allocation3 + $0x448] sm:$0xff]  ;;  %v490_v27 = vld [vmem:[#allocation2 + $0xa] ss:$2 sm:$0x3] }
  0x44   : > { %478 = vmatpush.msrb.mxu0 %v450_v41  ;;  %526 = vmatpush.msrb.mxu1 %v500_v47  ;;  %v492_v28 = vld [vmem:[#allocation2 + $0x1a] ss:$2 sm:$0x3]  ;;  %v647_v31 = vld [vmem:[#allocation3 + $0x430] sm:$0xff]  ;;  %v645_v33 = vld [vmem:[#allocation3 + $0x420] sm:$0xff] }
  0x45   : > { %576 = vmatpush.msrb.mxu2 %v548_v43  ;;  %624 = vmatpush.msrb.mxu3 %v598_v55  ;;  %v646_v32 = vld [vmem:[#allocation3 + $0x428] sm:$0xff]  ;;  %v539_v34 = vld [vmem:[#allocation2 + $0x10] ss:$2 sm:$0x3]  ;;  %v644_v35 = vld [vmem:[#allocation3 + $0x418] sm:$0xff] }
  0x46   : > { %479 = vmatpush.msrb.mxu0 %v449_v46  ;;  %527 = vmatpush.msrb.mxu1 %v499_v53  ;;  %v541_v36 = vld [vmem:[#allocation2 + $0x20] ss:$2 sm:$0x3]  ;;  %v642_v39 = vld [vmem:[#allocation3 + $0x408] sm:$0xff]  ;;  %v641_v40 = vld [vmem:[#allocation3 + $0x400] sm:$0xff] }
  0x47   : > { %577 = vmatpush.msrb.mxu2 %v547_v49  ;;  %311 = vmatmul.f32.vlgmr.msra.gmra.mxu0 %v293_v51  ;;  %v643_v38 = vld [vmem:[#allocation3 + $0x410] sm:$0xff]  ;;  %v588_v41 = vld [vmem:[#allocation2 + $0x11] ss:$2 sm:$0x3] }
  0x48   : > { %480 = vmatpush.msrb.mxu0 %v448_v52  ;;  %528 = vmatpush.msrb.mxu1 %v498_v58  ;;  %v590_v42 = vld [vmem:[#allocation2 + $0x21] ss:$2 sm:$0x3]  ;;  %v637_v44 = vld [vmem:[#allocation2 + $0x12] ss:$2 sm:$0x3] }
  0x49   : > { %578 = vmatpush.msrb.mxu2 %v546_v54  ;;  %625 = vmatpush.msrb.mxu3 %v597_v61  ;;  %v639_v45 = vld [vmem:[#allocation2 + $0x22] ss:$2 sm:$0x3] }
  0x4a   : > { %481 = vmatpush.msrb.mxu0 %v447_v57  ;;  %529 = vmatpush.msrb.mxu1 %v497_v62  ;;  %v368_v12 = vld.sshfl [vmem:[#allocation1] sm:$0xff pattern:$0x73625140] }
  0x4b   : > { %579 = vmatpush.msrb.mxu2 %v545_v59  ;;  %338 = vmatmul.f32.vlgmr.msra.gmra.mxu1 %v320_v5  ;;  %414 = vst [vmem:[#allocation1] ss:$4 sm:$0xff] %v392_v10 }
  0x4c   : > { %482 = vmatpush.msrb.mxu0 %v446_v60  ;;  %626 = vmatpush.msrb.mxu3 %v596_v4  ;;  %416 = vst [vmem:[#allocation1 + $0x1] ss:$4 sm:$0xff] %v394_v11 }
  0x4d   : > { %580 = vmatpush.msrb.mxu2 %v544_v63  ;;  %530 = vmatpush.msrb.mxu1 %v496_v6  ;;  %v866_v63 = vld [vmem:[%s1007_s2] ss:$0 sm:$0xff] }
  0x4e   : > { %483 = vmatpush.msrb.mxu0 %v445_v1  ;;  %627 = vmatpush.msrb.mxu3 %v595_v9 }
  0x4f   : > { %581 = vmatpush.msrb.mxu2 %v543_v7  ;;  %531 = vmatpush.msrb.mxu1 %v495_v14 }
  0x50   : > { %664 = vmatpush.msra.mxu0 %v656_v3  ;;  %386 = vmatmul.f32.vlgmr.msra.gmra.mxu2 %v368_v12 }
  0x51   : > { %628 = vmatpush.msrb.mxu3 %v594_v15  ;;  %532 = vmatpush.msrb.mxu1 %v494_v18 }
  0x52   : > { %665 = vmatpush.msra.mxu0 %v655_v8 }
  0x53   : > { %v417_v22 = vld.sshfl [vmem:[#allocation1] sm:$0xff pattern:$0x73625140]  ;;  %629 = vmatpush.msrb.mxu3 %v593_v20 }
  0x54   : > { %666 = vmatpush.msra.mxu0 %v654_v13  ;;  %435 = vmatmul.f32.vlgmr.msra.gmra.mxu3 %v417_v22  ;;  %463 = vst [vmem:[#allocation1] ss:$4 sm:$0xff] %v441_v16 }
  0x55   : > { %465 = vst [vmem:[#allocation1 + $0x1] ss:$4 sm:$0xff] %v443_v19  ;;  %630 = vmatpush.msrb.mxu3 %v592_v23 }
  0x56   : > { %667 = vmatpush.msra.mxu0 %v653_v17 }
  0x58   : > { %668 = vmatpush.msra.mxu0 %v652_v21 }
  0x5a   : > { %669 = vmatpush.msra.mxu0 %v651_v24 }
  0x5c   : > { %670 = vmatpush.msra.mxu0 %v650_v25  ;;  %v466_v30 = vld.sshfl [vmem:[#allocation1] sm:$0xff pattern:$0x73625140] }
  0x5d   : > { %512 = vst [vmem:[#allocation1] ss:$4 sm:$0xff] %v490_v27  ;;  %484 = vmatmul.f32.vlgmr.msrb.gmra.mxu0 %v466_v30 }
  0x5e   : > { %671 = vmatpush.msra.mxu0 %v649_v26  ;;  %514 = vst [vmem:[#allocation1 + $0x1] ss:$4 sm:$0xff] %v492_v28 }
  0x60   : > { %672 = vmatpush.msra.mxu0 %v648_v29 }
  0x62   : > { %673 = vmatpush.msra.mxu0 %v647_v31 }
  0x64   : > { %674 = vmatpush.msra.mxu0 %v646_v32 }
  0x65   : > { %v515_v37 = vld.sshfl [vmem:[#allocation1] sm:$0xff pattern:$0x73625140] }
  0x66   : > { %675 = vmatpush.msra.mxu0 %v645_v33  ;;  %561 = vst [vmem:[#allocation1] ss:$4 sm:$0xff] %v539_v34  ;;  %533 = vmatmul.f32.vlgmr.msrb.gmra.mxu1 %v515_v37 }
  0x67   : > { %563 = vst [vmem:[#allocation1 + $0x1] ss:$4 sm:$0xff] %v541_v36 }
  0x68   : > { %676 = vmatpush.msra.mxu0 %v644_v35 }
  0x6a   : > { %677 = vmatpush.msra.mxu0 %v643_v38 }
  0x6c   : > { %678 = vmatpush.msra.mxu0 %v642_v39 }
  0x6e   : > { %679 = vmatpush.msra.mxu0 %v641_v40  ;;  %v564_v43 = vld.sshfl [vmem:[#allocation1] sm:$0xff pattern:$0x73625140] }
  0x6f   : > { %582 = vmatmul.f32.vlgmr.msrb.gmra.mxu2 %v564_v43  ;;  %610 = vst [vmem:[#allocation1] ss:$4 sm:$0xff] %v588_v41 }
  0x70   : > { %612 = vst [vmem:[#allocation1 + $0x1] ss:$4 sm:$0xff] %v590_v42 }
  0x77   : > { %v613_v46 = vld.sshfl [vmem:[#allocation1] sm:$0xff pattern:$0x73625140] }
  0x78   : > { %631 = vmatmul.f32.vlgmr.msrb.gmra.mxu3 %v613_v46  ;;  %659 = vst [vmem:[#allocation1] ss:$4 sm:$0xff] %v637_v44 }
  0x79   : > { %661 = vst [vmem:[#allocation1 + $0x1] ss:$4 sm:$0xff] %v639_v45 }
  0x80   : > { %v662_v47 = vld.sshfl [vmem:[#allocation1] sm:$0xff pattern:$0x73625140] }
  0x81   : > { %680 = vmatmul.f32.vlgmr.msra.gmra.mxu0 %v662_v47 }
  0xc4   : > { %v312_v49 = vpop.f32.mrf.mxu0 }
  0xc8   : > { %v339_v48 = vpop.f32.mrf.mxu1 }
  0xc9   : > { %v340_v50 = vadd.f32 %v339_v48, %v312_v49 }
  0xd3   : > { %v387_v51 = vpop.f32.mrf.mxu2 }
  0xd4   : > { %v390_v52 = vadd.f32 %v387_v51, %v340_v50 }
  0xd7   : > { %v436_v53 = vpop.f32.mrf.mxu3 }
  0xd8   : > { %v439_v54 = vadd.f32 %v436_v53, %v390_v52 }
  0xda   : > { %v485_v55 = vpop.f32.mrf.mxu0 }
  0xdb   : > { %v488_v56 = vadd.f32 %v485_v55, %v439_v54 }
  0xe3   : > { %v534_v57 = vpop.f32.mrf.mxu1 }
  0xe4   : > { %v537_v58 = vadd.f32 %v534_v57, %v488_v56 }
  0xf2   : > { %v583_v59 = vpop.f32.mrf.mxu2 }
  0xf3   : > { %v586_v60 = vadd.f32 %v583_v59, %v537_v58 }
  0xfb   : > { %v632_v61 = vpop.f32.mrf.mxu3 }
  0xfc   : > { %v635_v62 = vadd.f32 %v632_v61, %v586_v60 }
  0xfe   : > { %v681_v0 = vpop.f32.mrf.mxu0 }
  0xff   : > { %v684_v1 = vadd.f32 %v681_v0, %v635_v62 }
 0x101   : > { %v689_v2 = vadd.f32 %v866_v63, %v684_v1 }
 0x103   : > { %vm690_vm0 = vcmp.gt.f32.partialorder %v689_v2, 0.0  ;;  %v691_v3 = vmul.f32 0.01, %v689_v2 }
 0x105   : > { %v692_v4 = vsel %vm690_vm0, %v689_v2, %v691_v3 }
 0x106   : > { %v694_v5 = vrot.slane %v692_v4, 2  ;;  %696 = vst [vmem:[%s228_s6] sm:$0x3] %v692_v4 }
 0x108   : > { %697 = vst [vmem:[%s228_s6 + $0x2] sm:$0x3] %v694_v5 }
 0x109 PF: > { %s14_s14 = sadd.s32 1, %s923_s14   ;;  %s1009_s12 = smov %s919_s13 }
 0x10a   : > { %p11_p8 = scmp.ge.s32.totalorder %s14_s14, 4   ;;  %s1010_s13 = smov %s1012_s16 }
 0x10c   :  { %13 = sbr.rel (!%p11_p8) target bundleno = 2 (0x2), region = 110 }
 0x111   :  { %725 = vsyncpa [#allocation4], 1 }
 0x112   :  { %727 = vsyncpa [#allocation4 + $0x1], 1 }

</bundles_post_ra>
